<compile_context>
chip_gen: v7x
topology: tpu7x:2x2x1
jax: 0.10.0
libtpu: 0.0.40
codegen_flags: <defaults>
</compile_context>

<pallas_src>
import functools

import jax
import jax.numpy as jnp
import numpy as np
from jax.experimental import pallas as pl
from jax.experimental.pallas import tpu as pltpu

EPS = 1e-5


def make_resnet_block_kernels(H, W, C, d):
    """Builds the three stage kernels for a given (H, W, C, dilation)."""
    Hp, Wp = H + 2 * d, W + 2 * d
    M = W * H  # im2col rows are ordered w-major: m = w * H + h

    def im2col_matmul(tap_slice, w_ref):
        # Gather the 9 dilated taps once into an (M, 9*C) matrix, then a single
        # MXU matmul against the stacked (9*C, C) weights.
        cols = [tap_slice(kh, kw).reshape(M, C)
                for kh in range(3) for kw in range(3)]
        pat = jnp.concatenate(cols, axis=1)                          # (M, 9C)
        return jnp.dot(pat, w_ref[...], preferred_element_type=jnp.float32)

    def write_stats(st_ref, y):
        # Per-channel partial sums on the MXU (keeps XLU/VPU free):
        # dot-with-ones for sum(y) and sum(y*y).
        ones = jnp.ones((1, M), jnp.float32)
        st_ref[0, 0:1, :] = jnp.dot(ones, y, preferred_element_type=jnp.float32)
        st_ref[0, 1:2, :] = jnp.dot(ones, y * y,
                                    preferred_element_type=jnp.float32)

    def conv1_kernel(xp_ref, w_ref, y_ref, st_ref):
        # xp_ref: (1, Wp, Hp, C) padded input in w-major spatial layout.
        def tap(kh, kw):
            return xp_ref[0, kw * d:kw * d + W, kh * d:kh * d + H, :]
        y = im2col_matmul(tap, w_ref)                                # (M, C)
        write_stats(st_ref, y)
        y_ref[0] = y

    def conv2_kernel(y1_ref, sc_ref, sh_ref, w_ref, y_ref, st_ref, hp_ref):
        # BN1 (batch-stats affine precomputed outside) + ReLU.
        h1 = jnp.maximum(y1_ref[0] * sc_ref[...] + sh_ref[...], 0.0)  # (M, C)
        # Padded scratch for the second dilated conv: zero ONLY the halo
        # stripes, then write the interior once (no full-buffer zero fill).
        hp_ref[0:d, :, :] = jnp.zeros((d, Hp, C), jnp.float32)
        hp_ref[d + W:Wp, :, :] = jnp.zeros((d, Hp, C), jnp.float32)
        hp_ref[d:d + W, 0:d, :] = jnp.zeros((W, d, C), jnp.float32)
        hp_ref[d:d + W, d + H:Hp, :] = jnp.zeros((W, d, C), jnp.float32)
        hp_ref[d:d + W, d:d + H, :] = h1.reshape(W, H, C)

        def tap(kh, kw):
            return hp_ref[kw * d:kw * d + W, kh * d:kh * d + H, :]
        y = im2col_matmul(tap, w_ref)                                # (M, C)
        write_stats(st_ref, y)
        y_ref[0] = y

    def bn2_residual_kernel(y2_ref, sc_ref, sh_ref, x_ref, o_ref):
        # Repack (M, C) -> lane-dense (H, W*C) using contiguous slices + lane
        # concat, then BN2 affine + residual add + store, all lane-dense.
        cols = [y2_ref[0, w * H:(w + 1) * H, :] for w in range(W)]
        y2 = jnp.concatenate(cols, axis=1)                           # (H, W*C)
        o_ref[0] = y2 * sc_ref[...] + sh_ref[...] + x_ref[0]

    return conv1_kernel, conv2_kernel, bn2_residual_kernel


def _bn_affine(partial_stats, gamma, beta, count):
    """partial_stats: (N, 2, C) per-program [sum, sum_of_squares] -> scale/shift."""
    s = jnp.sum(partial_stats, axis=0)                 # (2, C)
    mean = s[0] / count
    var = s[1] / count - mean * mean                   # biased var (PyTorch BN)
    scale = gamma.astype(jnp.float32) * jax.lax.rsqrt(var + EPS)
    shift = beta.astype(jnp.float32) - mean * scale
    return scale, shift


@functools.partial(jax.jit, static_argnums=(9,))
def resnet_block_pallas(x_nchw, w1, b1, g1, be1, w2, b2, g2, be2, dilation):
    """ResnetBlock forward. x_nchw: (N, C, H, W); w1/w2 in PyTorch OIHW layout."""
    del b1, b2  # conv biases are exactly cancelled by training-mode BatchNorm
    N, C, H, W = x_nchw.shape
    d = dilation
    Hp, Wp = H + 2 * d, W + 2 * d
    M = W * H
    f32 = jnp.float32

    # Padded input in (N, Wp, Hp, C) "w-major" layout: every dilated conv tap is
    # a contiguous slice whose (M, C) flattening matches the kernels' row order.
    x_whc = jnp.transpose(x_nchw, (0, 3, 2, 1)).astype(f32)          # (N, W, H, C)
    x_pad = jnp.pad(x_whc, ((0, 0), (d, d), (d, d), (0, 0)))         # (N, Wp, Hp, C)
    # Lane-dense residual view for stage 3: column index = w*C + c.
    x_dense = jnp.transpose(x_nchw, (0, 2, 3, 1)).astype(f32).reshape(N, H, W * C)

    # OIHW -> (kh, kw, Cin, Cout) -> stacked (9*Cin, Cout) im2col weights.
    w1s = jnp.transpose(w1, (2, 3, 1, 0)).astype(f32).reshape(9 * C, C)
    w2s = jnp.transpose(w2, (2, 3, 1, 0)).astype(f32).reshape(9 * C, C)

    k_conv1, k_conv2, k_bn2res = make_resnet_block_kernels(H, W, C, d)
    cparams = pltpu.CompilerParams(
        dimension_semantics=("parallel",),   # batch axis -> both TCs on v7x
        vmem_limit_bytes=32 * 1024 * 1024,
    )
    count = float(N * H * W)

    # ---- stage 1: conv1 + per-batch BN1 partial statistics ------------------
    y1, st1 = pl.pallas_call(
        k_conv1,
        grid=(N,),
        in_specs=[
            pl.BlockSpec((1, Wp, Hp, C), lambda n: (n, 0, 0, 0)),
            pl.BlockSpec((9 * C, C), lambda n: (0, 0)),
        ],
        out_specs=(
            pl.BlockSpec((1, M, C), lambda n: (n, 0, 0)),
            pl.BlockSpec((1, 2, C), lambda n: (n, 0, 0)),
        ),
        out_shape=(
            jax.ShapeDtypeStruct((N, M, C), f32),
            jax.ShapeDtypeStruct((N, 2, C), f32),
        ),
        compiler_params=cparams,
    )(x_pad, w1s)
    scale1, shift1 = _bn_affine(st1, g1, be1, count)

    # ---- stage 2: BN1 + ReLU + conv2 + per-batch BN2 partial statistics -----
    y2, st2 = pl.pallas_call(
        k_conv2,
        grid=(N,),
        in_specs=[
            pl.BlockSpec((1, M, C), lambda n: (n, 0, 0)),
            pl.BlockSpec((1, C), lambda n: (0, 0)),
            pl.BlockSpec((1, C), lambda n: (0, 0)),
            pl.BlockSpec((9 * C, C), lambda n: (0, 0)),
        ],
        out_specs=(
            pl.BlockSpec((1, M, C), lambda n: (n, 0, 0)),
            pl.BlockSpec((1, 2, C), lambda n: (n, 0, 0)),
        ),
        out_shape=(
            jax.ShapeDtypeStruct((N, M, C), f32),
            jax.ShapeDtypeStruct((N, 2, C), f32),
        ),
        scratch_shapes=[pltpu.VMEM((Wp, Hp, C), f32)],
        compiler_params=cparams,
    )(y1, scale1.reshape(1, C), shift1.reshape(1, C), w2s)
    scale2, shift2 = _bn_affine(st2, g2, be2, count)

    # ---- stage 3: BN2 + residual add, lane-dense output ----------------------
    out_dense = pl.pallas_call(
        k_bn2res,
        grid=(N,),
        in_specs=[
            pl.BlockSpec((1, M, C), lambda n: (n, 0, 0)),
            pl.BlockSpec((1, W * C), lambda n: (0, 0)),
            pl.BlockSpec((1, W * C), lambda n: (0, 0)),
            pl.BlockSpec((1, H, W * C), lambda n: (n, 0, 0)),
        ],
        out_specs=pl.BlockSpec((1, H, W * C), lambda n: (n, 0, 0)),
        out_shape=jax.ShapeDtypeStruct((N, H, W * C), f32),
        compiler_params=cparams,
    )(y2,
      jnp.tile(scale2, W).reshape(1, W * C),
      jnp.tile(shift2, W).reshape(1, W * C),
      x_dense)

    # lane-dense (n, h, w*C + c) -> NCHW
    return jnp.transpose(out_dense.reshape(N, H, W, C), (0, 3, 1, 2))


def resnet_block_reference(x, w1, b1, g1, be1, w2, b2, g2, be2, dilation):
    """Pure-JAX NCHW reference matching PyTorch semantics (training-mode BN,
    biases included -- they must have no effect on the final output)."""
    def conv(h, w, b):
        y = jax.lax.conv_general_dilated(
            h, w, window_strides=(1, 1),
            padding=[(dilation, dilation), (dilation, dilation)],
            rhs_dilation=(dilation, dilation),
            dimension_numbers=('NCHW', 'OIHW', 'NCHW'))
        return y + b[None, :, None, None]

    def bn(y, g, be):
        mean = jnp.mean(y, axis=(0, 2, 3), keepdims=True)
        var = jnp.mean((y - mean) ** 2, axis=(0, 2, 3), keepdims=True)
        return (g[None, :, None, None] * (y - mean) * jax.lax.rsqrt(var + EPS)
                + be[None, :, None, None])

    h = jnp.maximum(bn(conv(x, w1, b1), g1, be1), 0.0)
    h = bn(conv(h, w2, b2), g2, be2)
    return x + h


if __name__ == "__main__":
    # ResnetBlock(dim, dilation) with use_bias=True, use_dropout=False.
    # dim reduced from the module's 64 to 8 for a quick deterministic test;
    # with W=16 this makes W*C = 128, i.e. the lane-dense view fills a full
    # vreg lane width. The design is parameterized in (N, C, H, W, dilation).
    N, C, H, W = 2, 8, 16, 16

    key = jax.random.PRNGKey(0)
    ks = jax.random.split(key, 9)
    x = jax.random.normal(ks[0], (N, C, H, W), jnp.float32)

    w1 = jax.random.normal(ks[1], (C, C, 3, 3), jnp.float32) * 0.1
    b1 = jax.random.normal(ks[2], (C,), jnp.float32) * 0.1
    w2 = jax.random.normal(ks[3], (C, C, 3, 3), jnp.float32) * 0.1
    b2 = jax.random.normal(ks[4], (C,), jnp.float32) * 0.1
    # BN affine params (PyTorch default init is gamma=1, beta=0; perturbed for
    # a stronger test while staying deterministic).
    g1 = 1.0 + 0.1 * jax.random.normal(ks[5], (C,), jnp.float32)
    be1 = 0.1 * jax.random.normal(ks[6], (C,), jnp.float32)
    g2 = 1.0 + 0.1 * jax.random.normal(ks[7], (C,), jnp.float32)
    be2 = 0.1 * jax.random.normal(ks[8], (C,), jnp.float32)

    for dilation in (2, 4):
        out = resnet_block_pallas(x, w1, b1, g1, be1, w2, b2, g2, be2, dilation)
        out = jax.block_until_ready(out)
        ref = resnet_block_reference(x, w1, b1, g1, be1, w2, b2, g2, be2, dilation)
        ref = jax.block_until_ready(ref)

        assert out.shape == (N, C, H, W)
        err = float(np.max(np.abs(np.asarray(out) - np.asarray(ref))))
        assert np.allclose(np.asarray(out), np.asarray(ref),
                           rtol=2e-4, atol=2e-4), (
            "dilation=%d mismatch vs reference: max abs err = %g"
            % (dilation, err))

    print("KERNEL_OK")
</pallas_src>

<mosaic_0001>
module attributes {stable_mosaic.version = 11 : i64} {
  func.func @conv1_kernel(%arg0: i32, %arg1: memref<1x20x20x8xf32, #tpu.memory_space<vmem>>, %arg2: memref<72x8xf32, #tpu.memory_space<vmem>>, %arg3: memref<1x256x8xf32, #tpu.memory_space<vmem>>, %arg4: memref<1x2x8xf32, #tpu.memory_space<vmem>>) attributes {dimension_semantics = [#tpu.dimension_semantics<parallel>], iteration_bounds = array<i64: 2>, scalar_prefetch = 0 : i64, scratch_operands = 0 : i64, tpu.core_type = #tpu.core_type<tc>, window_params = [{transform_indices = @transform_0, window_bounds = array<i64: 1, 20, 20, 8>}, {pipeline_mode = #tpu.pipeline_mode<synchronous>, transform_indices = @transform_1, window_bounds = array<i64: 72, 8>}, {transform_indices = @transform_2, window_bounds = array<i64: 1, 256, 8>}, {transform_indices = @transform_3, window_bounds = array<i64: 1, 2, 8>}]} {
    %c0 = arith.constant 0 : index
    %c0_0 = arith.constant 0 : index
    %c0_1 = arith.constant 0 : index
    %c0_2 = arith.constant 0 : index
    %0 = vector.load %arg1[%c0, %c0_0, %c0_1, %c0_2] : memref<1x20x20x8xf32, #tpu.memory_space<vmem>>, vector<1x16x16x8xf32>
    %1 = vector.shape_cast %0 : vector<1x16x16x8xf32> to vector<16x16x8xf32>
    %2 = vector.shape_cast %1 : vector<16x16x8xf32> to vector<256x8xf32>
    %c0_3 = arith.constant 0 : index
    %c2 = arith.constant 2 : index
    %c0_4 = arith.constant 0 : index
    %c0_5 = arith.constant 0 : index
    %3 = vector.load %arg1[%c0_3, %c2, %c0_4, %c0_5] : memref<1x20x20x8xf32, #tpu.memory_space<vmem>>, vector<1x16x16x8xf32>
    %4 = vector.shape_cast %3 : vector<1x16x16x8xf32> to vector<16x16x8xf32>
    %5 = vector.shape_cast %4 : vector<16x16x8xf32> to vector<256x8xf32>
    %c0_6 = arith.constant 0 : index
    %c4 = arith.constant 4 : index
    %c0_7 = arith.constant 0 : index
    %c0_8 = arith.constant 0 : index
    %6 = vector.load %arg1[%c0_6, %c4, %c0_7, %c0_8] : memref<1x20x20x8xf32, #tpu.memory_space<vmem>>, vector<1x16x16x8xf32>
    %7 = vector.shape_cast %6 : vector<1x16x16x8xf32> to vector<16x16x8xf32>
    %8 = vector.shape_cast %7 : vector<16x16x8xf32> to vector<256x8xf32>
    %c0_9 = arith.constant 0 : index
    %c0_10 = arith.constant 0 : index
    %c2_11 = arith.constant 2 : index
    %c0_12 = arith.constant 0 : index
    %9 = vector.load %arg1[%c0_9, %c0_10, %c2_11, %c0_12] : memref<1x20x20x8xf32, #tpu.memory_space<vmem>>, vector<1x16x16x8xf32>
    %10 = vector.shape_cast %9 : vector<1x16x16x8xf32> to vector<16x16x8xf32>
    %11 = vector.shape_cast %10 : vector<16x16x8xf32> to vector<256x8xf32>
    %c0_13 = arith.constant 0 : index
    %c2_14 = arith.constant 2 : index
    %c2_15 = arith.constant 2 : index
    %c0_16 = arith.constant 0 : index
    %12 = vector.load %arg1[%c0_13, %c2_14, %c2_15, %c0_16] : memref<1x20x20x8xf32, #tpu.memory_space<vmem>>, vector<1x16x16x8xf32>
    %13 = vector.shape_cast %12 : vector<1x16x16x8xf32> to vector<16x16x8xf32>
    %14 = vector.shape_cast %13 : vector<16x16x8xf32> to vector<256x8xf32>
    %c0_17 = arith.constant 0 : index
    %c4_18 = arith.constant 4 : index
    %c2_19 = arith.constant 2 : index
    %c0_20 = arith.constant 0 : index
    %15 = vector.load %arg1[%c0_17, %c4_18, %c2_19, %c0_20] : memref<1x20x20x8xf32, #tpu.memory_space<vmem>>, vector<1x16x16x8xf32>
    %16 = vector.shape_cast %15 : vector<1x16x16x8xf32> to vector<16x16x8xf32>
    %17 = vector.shape_cast %16 : vector<16x16x8xf32> to vector<256x8xf32>
    %c0_21 = arith.constant 0 : index
    %c0_22 = arith.constant 0 : index
    %c4_23 = arith.constant 4 : index
    %c0_24 = arith.constant 0 : index
    %18 = vector.load %arg1[%c0_21, %c0_22, %c4_23, %c0_24] : memref<1x20x20x8xf32, #tpu.memory_space<vmem>>, vector<1x16x16x8xf32>
    %19 = vector.shape_cast %18 : vector<1x16x16x8xf32> to vector<16x16x8xf32>
    %20 = vector.shape_cast %19 : vector<16x16x8xf32> to vector<256x8xf32>
    %c0_25 = arith.constant 0 : index
    %c2_26 = arith.constant 2 : index
    %c4_27 = arith.constant 4 : index
    %c0_28 = arith.constant 0 : index
    %21 = vector.load %arg1[%c0_25, %c2_26, %c4_27, %c0_28] : memref<1x20x20x8xf32, #tpu.memory_space<vmem>>, vector<1x16x16x8xf32>
    %22 = vector.shape_cast %21 : vector<1x16x16x8xf32> to vector<16x16x8xf32>
    %23 = vector.shape_cast %22 : vector<16x16x8xf32> to vector<256x8xf32>
    %c0_29 = arith.constant 0 : index
    %c4_30 = arith.constant 4 : index
    %c4_31 = arith.constant 4 : index
    %c0_32 = arith.constant 0 : index
    %24 = vector.load %arg1[%c0_29, %c4_30, %c4_31, %c0_32] : memref<1x20x20x8xf32, #tpu.memory_space<vmem>>, vector<1x16x16x8xf32>
    %25 = vector.shape_cast %24 : vector<1x16x16x8xf32> to vector<16x16x8xf32>
    %26 = vector.shape_cast %25 : vector<16x16x8xf32> to vector<256x8xf32>
    %27 = tpu.concatenate %2, %5, %8, %11, %14, %17, %20, %23, %26 in 1 : vector<256x8xf32>, vector<256x8xf32>, vector<256x8xf32>, vector<256x8xf32>, vector<256x8xf32>, vector<256x8xf32>, vector<256x8xf32>, vector<256x8xf32>, vector<256x8xf32> -> vector<256x72xf32>
    %c0_33 = arith.constant 0 : index
    %c0_34 = arith.constant 0 : index
    %28 = vector.load %arg2[%c0_33, %c0_34] : memref<72x8xf32, #tpu.memory_space<vmem>>, vector<72x8xf32>
    %cst = arith.constant dense<0.000000e+00> : vector<256x8xf32>
    %29 = tpu.matmul %27, %28, %cst {dimension_numbers = #tpu.dot_dimension_numbers<[1], [0], [0], [1], [0, 0, 1, 1], [], []>} : vector<256x72xf32>, vector<72x8xf32>, vector<256x8xf32> -> vector<256x8xf32>
    %cst_35 = arith.constant 1.000000e+00 : f32
    %30 = vector.broadcast %cst_35 : f32 to vector<1x256xf32>
    %cst_36 = arith.constant dense<0.000000e+00> : vector<1x8xf32>
    %31 = tpu.matmul %30, %29, %cst_36 {dimension_numbers = #tpu.dot_dimension_numbers<[1], [0], [0], [1], [0, 0, 1, 1], [], []>} : vector<1x256xf32>, vector<256x8xf32>, vector<1x8xf32> -> vector<1x8xf32>
    %c0_37 = arith.constant 0 : index
    %c0_38 = arith.constant 0 : index
    %c0_39 = arith.constant 0 : index
    %32 = vector.load %arg4[%c0_37, %c0_38, %c0_39] : memref<1x2x8xf32, #tpu.memory_space<vmem>>, vector<1x1x8xf32>
    %33 = vector.shape_cast %32 : vector<1x1x8xf32> to vector<1x8xf32>
    %34 = vector.shape_cast %31 : vector<1x8xf32> to vector<1x1x8xf32>
    tpu.vector_store %arg4[%c0_37, %c0_38, %c0_39], %34 {strides = array<i32>} : memref<1x2x8xf32, #tpu.memory_space<vmem>>, vector<1x1x8xf32>,
    %35 = arith.mulf %29, %29 : vector<256x8xf32>
    %cst_40 = arith.constant dense<0.000000e+00> : vector<1x8xf32>
    %36 = tpu.matmul %30, %35, %cst_40 {dimension_numbers = #tpu.dot_dimension_numbers<[1], [0], [0], [1], [0, 0, 1, 1], [], []>} : vector<1x256xf32>, vector<256x8xf32>, vector<1x8xf32> -> vector<1x8xf32>
    %c0_41 = arith.constant 0 : index
    %c1 = arith.constant 1 : index
    %c0_42 = arith.constant 0 : index
    %37 = vector.load %arg4[%c0_41, %c1, %c0_42] : memref<1x2x8xf32, #tpu.memory_space<vmem>>, vector<1x1x8xf32>
    %38 = vector.shape_cast %37 : vector<1x1x8xf32> to vector<1x8xf32>
    %39 = vector.shape_cast %36 : vector<1x8xf32> to vector<1x1x8xf32>
    tpu.vector_store %arg4[%c0_41, %c1, %c0_42], %39 {strides = array<i32>} : memref<1x2x8xf32, #tpu.memory_space<vmem>>, vector<1x1x8xf32>,
    %c0_43 = arith.constant 0 : index
    %c0_44 = arith.constant 0 : index
    %c0_45 = arith.constant 0 : index
    %40 = vector.load %arg3[%c0_43, %c0_44, %c0_45] : memref<1x256x8xf32, #tpu.memory_space<vmem>>, vector<1x256x8xf32>
    %41 = vector.shape_cast %40 : vector<1x256x8xf32> to vector<256x8xf32>
    %42 = vector.shape_cast %29 : vector<256x8xf32> to vector<1x256x8xf32>
    tpu.vector_store %arg3[%c0_43, %c0_44, %c0_45], %42 {strides = array<i32>} : memref<1x256x8xf32, #tpu.memory_space<vmem>>, vector<1x256x8xf32>,
    return
  }
  func.func @transform_0(%arg0: i32) -> (i32, i32, i32, i32) {
    %c0_i32 = arith.constant 0 : i32
    %c0_i32_0 = arith.constant 0 : i32
    %c0_i32_1 = arith.constant 0 : i32
    %c0_i32_2 = arith.constant 0 : i32
    return %arg0, %c0_i32, %c0_i32_0, %c0_i32_1 : i32, i32, i32, i32
  }
  func.func @transform_1(%arg0: i32) -> (i32, i32) {
    %c0_i32 = arith.constant 0 : i32
    %c0_i32_0 = arith.constant 0 : i32
    %c0_i32_1 = arith.constant 0 : i32
    return %c0_i32, %c0_i32_0 : i32, i32
  }
  func.func @transform_2(%arg0: i32) -> (i32, i32, i32) {
    %c0_i32 = arith.constant 0 : i32
    %c0_i32_0 = arith.constant 0 : i32
    %c0_i32_1 = arith.constant 0 : i32
    return %arg0, %c0_i32, %c0_i32_0 : i32, i32, i32
  }
  func.func @transform_3(%arg0: i32) -> (i32, i32, i32) {
    %c0_i32 = arith.constant 0 : i32
    %c0_i32_0 = arith.constant 0 : i32
    %c0_i32_1 = arith.constant 0 : i32
    return %arg0, %c0_i32, %c0_i32_0 : i32, i32, i32
  }
}

module attributes {stable_mosaic.version = 11 : i64} {
  func.func @conv2_kernel(%arg0: i32, %arg1: memref<1x256x8xf32, #tpu.memory_space<vmem>>, %arg2: memref<1x8xf32, #tpu.memory_space<vmem>>, %arg3: memref<1x8xf32, #tpu.memory_space<vmem>>, %arg4: memref<72x8xf32, #tpu.memory_space<vmem>>, %arg5: memref<1x256x8xf32, #tpu.memory_space<vmem>>, %arg6: memref<1x2x8xf32, #tpu.memory_space<vmem>>, %arg7: memref<20x20x8xf32, #tpu.memory_space<vmem>>) attributes {dimension_semantics = [#tpu.dimension_semantics<parallel>], iteration_bounds = array<i64: 2>, scalar_prefetch = 0 : i64, scratch_operands = 1 : i64, tpu.core_type = #tpu.core_type<tc>, window_params = [{transform_indices = @transform_0, window_bounds = array<i64: 1, 256, 8>}, {pipeline_mode = #tpu.pipeline_mode<synchronous>, transform_indices = @transform_1, window_bounds = array<i64: 1, 8>}, {pipeline_mode = #tpu.pipeline_mode<synchronous>, transform_indices = @transform_2, window_bounds = array<i64: 1, 8>}, {pipeline_mode = #tpu.pipeline_mode<synchronous>, transform_indices = @transform_3, window_bounds = array<i64: 72, 8>}, {transform_indices = @transform_4, window_bounds = array<i64: 1, 256, 8>}, {transform_indices = @transform_5, window_bounds = array<i64: 1, 2, 8>}]} {
    %c0 = arith.constant 0 : index
    %c0_0 = arith.constant 0 : index
    %c0_1 = arith.constant 0 : index
    %0 = vector.load %arg1[%c0, %c0_0, %c0_1] : memref<1x256x8xf32, #tpu.memory_space<vmem>>, vector<1x256x8xf32>
    %1 = vector.shape_cast %0 : vector<1x256x8xf32> to vector<256x8xf32>
    %c0_2 = arith.constant 0 : index
    %c0_3 = arith.constant 0 : index
    %2 = vector.load %arg2[%c0_2, %c0_3] : memref<1x8xf32, #tpu.memory_space<vmem>>, vector<1x8xf32>
    %3 = vector.broadcast %2 : vector<1x8xf32> to vector<256x8xf32>
    %4 = arith.mulf %1, %3 : vector<256x8xf32>
    %c0_4 = arith.constant 0 : index
    %c0_5 = arith.constant 0 : index
    %5 = vector.load %arg3[%c0_4, %c0_5] : memref<1x8xf32, #tpu.memory_space<vmem>>, vector<1x8xf32>
    %6 = vector.broadcast %5 : vector<1x8xf32> to vector<256x8xf32>
    %7 = arith.addf %4, %6 : vector<256x8xf32>
    %cst = arith.constant 0.000000e+00 : f32
    %8 = vector.broadcast %cst : f32 to vector<256x8xf32>
    %9 = arith.maximumf %7, %8 : vector<256x8xf32>
    %cst_6 = arith.constant 0.000000e+00 : f32
    %10 = vector.broadcast %cst_6 : f32 to vector<2x20x8xf32>
    %c0_7 = arith.constant 0 : index
    %c0_8 = arith.constant 0 : index
    %c0_9 = arith.constant 0 : index
    %11 = vector.load %arg7[%c0_7, %c0_8, %c0_9] : memref<20x20x8xf32, #tpu.memory_space<vmem>>, vector<2x20x8xf32>
    tpu.vector_store %arg7[%c0_7, %c0_8, %c0_9], %10 {strides = array<i32>} : memref<20x20x8xf32, #tpu.memory_space<vmem>>, vector<2x20x8xf32>,
    %cst_10 = arith.constant 0.000000e+00 : f32
    %12 = vector.broadcast %cst_10 : f32 to vector<2x20x8xf32>
    %c18 = arith.constant 18 : index
    %c0_11 = arith.constant 0 : index
    %c0_12 = arith.constant 0 : index
    %13 = vector.load %arg7[%c18, %c0_11, %c0_12] : memref<20x20x8xf32, #tpu.memory_space<vmem>>, vector<2x20x8xf32>
    tpu.vector_store %arg7[%c18, %c0_11, %c0_12], %12 {strides = array<i32>} : memref<20x20x8xf32, #tpu.memory_space<vmem>>, vector<2x20x8xf32>,
    %cst_13 = arith.constant 0.000000e+00 : f32
    %14 = vector.broadcast %cst_13 : f32 to vector<16x2x8xf32>
    %c2 = arith.constant 2 : index
    %c0_14 = arith.constant 0 : index
    %c0_15 = arith.constant 0 : index
    %15 = vector.load %arg7[%c2, %c0_14, %c0_15] : memref<20x20x8xf32, #tpu.memory_space<vmem>>, vector<16x2x8xf32>
    tpu.vector_store %arg7[%c2, %c0_14, %c0_15], %14 {strides = array<i32>} : memref<20x20x8xf32, #tpu.memory_space<vmem>>, vector<16x2x8xf32>,
    %cst_16 = arith.constant 0.000000e+00 : f32
    %16 = vector.broadcast %cst_16 : f32 to vector<16x2x8xf32>
    %c2_17 = arith.constant 2 : index
    %c18_18 = arith.constant 18 : index
    %c0_19 = arith.constant 0 : index
    %17 = vector.load %arg7[%c2_17, %c18_18, %c0_19] : memref<20x20x8xf32, #tpu.memory_space<vmem>>, vector<16x2x8xf32>
    tpu.vector_store %arg7[%c2_17, %c18_18, %c0_19], %16 {strides = array<i32>} : memref<20x20x8xf32, #tpu.memory_space<vmem>>, vector<16x2x8xf32>,
    %18 = vector.shape_cast %9 : vector<256x8xf32> to vector<16x16x8xf32>
    %c2_20 = arith.constant 2 : index
    %c2_21 = arith.constant 2 : index
    %c0_22 = arith.constant 0 : index
    %19 = vector.load %arg7[%c2_20, %c2_21, %c0_22] : memref<20x20x8xf32, #tpu.memory_space<vmem>>, vector<16x16x8xf32>
    tpu.vector_store %arg7[%c2_20, %c2_21, %c0_22], %18 {strides = array<i32>} : memref<20x20x8xf32, #tpu.memory_space<vmem>>, vector<16x16x8xf32>,
    %c0_23 = arith.constant 0 : index
    %c0_24 = arith.constant 0 : index
    %c0_25 = arith.constant 0 : index
    %20 = vector.load %arg7[%c0_23, %c0_24, %c0_25] : memref<20x20x8xf32, #tpu.memory_space<vmem>>, vector<16x16x8xf32>
    %21 = vector.shape_cast %20 : vector<16x16x8xf32> to vector<256x8xf32>
    %c2_26 = arith.constant 2 : index
    %c0_27 = arith.constant 0 : index
    %c0_28 = arith.constant 0 : index
    %22 = vector.load %arg7[%c2_26, %c0_27, %c0_28] : memref<20x20x8xf32, #tpu.memory_space<vmem>>, vector<16x16x8xf32>
    %23 = vector.shape_cast %22 : vector<16x16x8xf32> to vector<256x8xf32>
    %c4 = arith.constant 4 : index
    %c0_29 = arith.constant 0 : index
    %c0_30 = arith.constant 0 : index
    %24 = vector.load %arg7[%c4, %c0_29, %c0_30] : memref<20x20x8xf32, #tpu.memory_space<vmem>>, vector<16x16x8xf32>
    %25 = vector.shape_cast %24 : vector<16x16x8xf32> to vector<256x8xf32>
    %c0_31 = arith.constant 0 : index
    %c2_32 = arith.constant 2 : index
    %c0_33 = arith.constant 0 : index
    %26 = vector.load %arg7[%c0_31, %c2_32, %c0_33] : memref<20x20x8xf32, #tpu.memory_space<vmem>>, vector<16x16x8xf32>
    %27 = vector.shape_cast %26 : vector<16x16x8xf32> to vector<256x8xf32>
    %c2_34 = arith.constant 2 : index
    %c2_35 = arith.constant 2 : index
    %c0_36 = arith.constant 0 : index
    %28 = vector.load %arg7[%c2_34, %c2_35, %c0_36] : memref<20x20x8xf32, #tpu.memory_space<vmem>>, vector<16x16x8xf32>
    %29 = vector.shape_cast %28 : vector<16x16x8xf32> to vector<256x8xf32>
    %c4_37 = arith.constant 4 : index
    %c2_38 = arith.constant 2 : index
    %c0_39 = arith.constant 0 : index
    %30 = vector.load %arg7[%c4_37, %c2_38, %c0_39] : memref<20x20x8xf32, #tpu.memory_space<vmem>>, vector<16x16x8xf32>
    %31 = vector.shape_cast %30 : vector<16x16x8xf32> to vector<256x8xf32>
    %c0_40 = arith.constant 0 : index
    %c4_41 = arith.constant 4 : index
    %c0_42 = arith.constant 0 : index
    %32 = vector.load %arg7[%c0_40, %c4_41, %c0_42] : memref<20x20x8xf32, #tpu.memory_space<vmem>>, vector<16x16x8xf32>
    %33 = vector.shape_cast %32 : vector<16x16x8xf32> to vector<256x8xf32>
    %c2_43 = arith.constant 2 : index
    %c4_44 = arith.constant 4 : index
    %c0_45 = arith.constant 0 : index
    %34 = vector.load %arg7[%c2_43, %c4_44, %c0_45] : memref<20x20x8xf32, #tpu.memory_space<vmem>>, vector<16x16x8xf32>
    %35 = vector.shape_cast %34 : vector<16x16x8xf32> to vector<256x8xf32>
    %c4_46 = arith.constant 4 : index
    %c4_47 = arith.constant 4 : index
    %c0_48 = arith.constant 0 : index
    %36 = vector.load %arg7[%c4_46, %c4_47, %c0_48] : memref<20x20x8xf32, #tpu.memory_space<vmem>>, vector<16x16x8xf32>
    %37 = vector.shape_cast %36 : vector<16x16x8xf32> to vector<256x8xf32>
    %38 = tpu.concatenate %21, %23, %25, %27, %29, %31, %33, %35, %37 in 1 : vector<256x8xf32>, vector<256x8xf32>, vector<256x8xf32>, vector<256x8xf32>, vector<256x8xf32>, vector<256x8xf32>, vector<256x8xf32>, vector<256x8xf32>, vector<256x8xf32> -> vector<256x72xf32>
    %c0_49 = arith.constant 0 : index
    %c0_50 = arith.constant 0 : index
    %39 = vector.load %arg4[%c0_49, %c0_50] : memref<72x8xf32, #tpu.memory_space<vmem>>, vector<72x8xf32>
    %cst_51 = arith.constant dense<0.000000e+00> : vector<256x8xf32>
    %40 = tpu.matmul %38, %39, %cst_51 {dimension_numbers = #tpu.dot_dimension_numbers<[1], [0], [0], [1], [0, 0, 1, 1], [], []>} : vector<256x72xf32>, vector<72x8xf32>, vector<256x8xf32> -> vector<256x8xf32>
    %cst_52 = arith.constant 1.000000e+00 : f32
    %41 = vector.broadcast %cst_52 : f32 to vector<1x256xf32>
    %cst_53 = arith.constant dense<0.000000e+00> : vector<1x8xf32>
    %42 = tpu.matmul %41, %40, %cst_53 {dimension_numbers = #tpu.dot_dimension_numbers<[1], [0], [0], [1], [0, 0, 1, 1], [], []>} : vector<1x256xf32>, vector<256x8xf32>, vector<1x8xf32> -> vector<1x8xf32>
    %c0_54 = arith.constant 0 : index
    %c0_55 = arith.constant 0 : index
    %c0_56 = arith.constant 0 : index
    %43 = vector.load %arg6[%c0_54, %c0_55, %c0_56] : memref<1x2x8xf32, #tpu.memory_space<vmem>>, vector<1x1x8xf32>
    %44 = vector.shape_cast %43 : vector<1x1x8xf32> to vector<1x8xf32>
    %45 = vector.shape_cast %42 : vector<1x8xf32> to vector<1x1x8xf32>
    tpu.vector_store %arg6[%c0_54, %c0_55, %c0_56], %45 {strides = array<i32>} : memref<1x2x8xf32, #tpu.memory_space<vmem>>, vector<1x1x8xf32>,
    %46 = arith.mulf %40, %40 : vector<256x8xf32>
    %cst_57 = arith.constant dense<0.000000e+00> : vector<1x8xf32>
    %47 = tpu.matmul %41, %46, %cst_57 {dimension_numbers = #tpu.dot_dimension_numbers<[1], [0], [0], [1], [0, 0, 1, 1], [], []>} : vector<1x256xf32>, vector<256x8xf32>, vector<1x8xf32> -> vector<1x8xf32>
    %c0_58 = arith.constant 0 : index
    %c1 = arith.constant 1 : index
    %c0_59 = arith.constant 0 : index
    %48 = vector.load %arg6[%c0_58, %c1, %c0_59] : memref<1x2x8xf32, #tpu.memory_space<vmem>>, vector<1x1x8xf32>
    %49 = vector.shape_cast %48 : vector<1x1x8xf32> to vector<1x8xf32>
    %50 = vector.shape_cast %47 : vector<1x8xf32> to vector<1x1x8xf32>
    tpu.vector_store %arg6[%c0_58, %c1, %c0_59], %50 {strides = array<i32>} : memref<1x2x8xf32, #tpu.memory_space<vmem>>, vector<1x1x8xf32>,
    %c0_60 = arith.constant 0 : index
    %c0_61 = arith.constant 0 : index
    %c0_62 = arith.constant 0 : index
    %51 = vector.load %arg5[%c0_60, %c0_61, %c0_62] : memref<1x256x8xf32, #tpu.memory_space<vmem>>, vector<1x256x8xf32>
    %52 = vector.shape_cast %51 : vector<1x256x8xf32> to vector<256x8xf32>
    %53 = vector.shape_cast %40 : vector<256x8xf32> to vector<1x256x8xf32>
    tpu.vector_store %arg5[%c0_60, %c0_61, %c0_62], %53 {strides = array<i32>} : memref<1x256x8xf32, #tpu.memory_space<vmem>>, vector<1x256x8xf32>,
    return
  }
  func.func @transform_0(%arg0: i32) -> (i32, i32, i32) {
    %c0_i32 = arith.constant 0 : i32
    %c0_i32_0 = arith.constant 0 : i32
    %c0_i32_1 = arith.constant 0 : i32
    return %arg0, %c0_i32, %c0_i32_0 : i32, i32, i32
  }
  func.func @transform_1(%arg0: i32) -> (i32, i32) {
    %c0_i32 = arith.constant 0 : i32
    %c0_i32_0 = arith.constant 0 : i32
    %c0_i32_1 = arith.constant 0 : i32
    return %c0_i32, %c0_i32_0 : i32, i32
  }
  func.func @transform_2(%arg0: i32) -> (i32, i32) {
    %c0_i32 = arith.constant 0 : i32
    %c0_i32_0 = arith.constant 0 : i32
    %c0_i32_1 = arith.constant 0 : i32
    return %c0_i32, %c0_i32_0 : i32, i32
  }
  func.func @transform_3(%arg0: i32) -> (i32, i32) {
    %c0_i32 = arith.constant 0 : i32
    %c0_i32_0 = arith.constant 0 : i32
    %c0_i32_1 = arith.constant 0 : i32
    return %c0_i32, %c0_i32_0 : i32, i32
  }
  func.func @transform_4(%arg0: i32) -> (i32, i32, i32) {
    %c0_i32 = arith.constant 0 : i32
    %c0_i32_0 = arith.constant 0 : i32
    %c0_i32_1 = arith.constant 0 : i32
    return %arg0, %c0_i32, %c0_i32_0 : i32, i32, i32
  }
  func.func @transform_5(%arg0: i32) -> (i32, i32, i32) {
    %c0_i32 = arith.constant 0 : i32
    %c0_i32_0 = arith.constant 0 : i32
    %c0_i32_1 = arith.constant 0 : i32
    return %arg0, %c0_i32, %c0_i32_0 : i32, i32, i32
  }
}

module attributes {stable_mosaic.version = 11 : i64} {
  func.func @bn2_residual_kernel(%arg0: i32, %arg1: memref<1x256x8xf32, #tpu.memory_space<vmem>>, %arg2: memref<1x128xf32, #tpu.memory_space<vmem>>, %arg3: memref<1x128xf32, #tpu.memory_space<vmem>>, %arg4: memref<1x16x128xf32, #tpu.memory_space<vmem>>, %arg5: memref<1x16x128xf32, #tpu.memory_space<vmem>>) attributes {dimension_semantics = [#tpu.dimension_semantics<parallel>], iteration_bounds = array<i64: 2>, scalar_prefetch = 0 : i64, scratch_operands = 0 : i64, tpu.core_type = #tpu.core_type<tc>, window_params = [{transform_indices = @transform_0, window_bounds = array<i64: 1, 256, 8>}, {pipeline_mode = #tpu.pipeline_mode<synchronous>, transform_indices = @transform_1, window_bounds = array<i64: 1, 128>}, {pipeline_mode = #tpu.pipeline_mode<synchronous>, transform_indices = @transform_2, window_bounds = array<i64: 1, 128>}, {transform_indices = @transform_3, window_bounds = array<i64: 1, 16, 128>}, {transform_indices = @transform_4, window_bounds = array<i64: 1, 16, 128>}]} {
    %c0 = arith.constant 0 : index
    %c0_0 = arith.constant 0 : index
    %c0_1 = arith.constant 0 : index
    %0 = vector.load %arg1[%c0, %c0_0, %c0_1] : memref<1x256x8xf32, #tpu.memory_space<vmem>>, vector<1x16x8xf32>
    %1 = vector.shape_cast %0 : vector<1x16x8xf32> to vector<16x8xf32>
    %c0_2 = arith.constant 0 : index
    %c16 = arith.constant 16 : index
    %c0_3 = arith.constant 0 : index
    %2 = vector.load %arg1[%c0_2, %c16, %c0_3] : memref<1x256x8xf32, #tpu.memory_space<vmem>>, vector<1x16x8xf32>
    %3 = vector.shape_cast %2 : vector<1x16x8xf32> to vector<16x8xf32>
    %c0_4 = arith.constant 0 : index
    %c32 = arith.constant 32 : index
    %c0_5 = arith.constant 0 : index
    %4 = vector.load %arg1[%c0_4, %c32, %c0_5] : memref<1x256x8xf32, #tpu.memory_space<vmem>>, vector<1x16x8xf32>
    %5 = vector.shape_cast %4 : vector<1x16x8xf32> to vector<16x8xf32>
    %c0_6 = arith.constant 0 : index
    %c48 = arith.constant 48 : index
    %c0_7 = arith.constant 0 : index
    %6 = vector.load %arg1[%c0_6, %c48, %c0_7] : memref<1x256x8xf32, #tpu.memory_space<vmem>>, vector<1x16x8xf32>
    %7 = vector.shape_cast %6 : vector<1x16x8xf32> to vector<16x8xf32>
    %c0_8 = arith.constant 0 : index
    %c64 = arith.constant 64 : index
    %c0_9 = arith.constant 0 : index
    %8 = vector.load %arg1[%c0_8, %c64, %c0_9] : memref<1x256x8xf32, #tpu.memory_space<vmem>>, vector<1x16x8xf32>
    %9 = vector.shape_cast %8 : vector<1x16x8xf32> to vector<16x8xf32>
    %c0_10 = arith.constant 0 : index
    %c80 = arith.constant 80 : index
    %c0_11 = arith.constant 0 : index
    %10 = vector.load %arg1[%c0_10, %c80, %c0_11] : memref<1x256x8xf32, #tpu.memory_space<vmem>>, vector<1x16x8xf32>
    %11 = vector.shape_cast %10 : vector<1x16x8xf32> to vector<16x8xf32>
    %c0_12 = arith.constant 0 : index
    %c96 = arith.constant 96 : index
    %c0_13 = arith.constant 0 : index
    %12 = vector.load %arg1[%c0_12, %c96, %c0_13] : memref<1x256x8xf32, #tpu.memory_space<vmem>>, vector<1x16x8xf32>
    %13 = vector.shape_cast %12 : vector<1x16x8xf32> to vector<16x8xf32>
    %c0_14 = arith.constant 0 : index
    %c112 = arith.constant 112 : index
    %c0_15 = arith.constant 0 : index
    %14 = vector.load %arg1[%c0_14, %c112, %c0_15] : memref<1x256x8xf32, #tpu.memory_space<vmem>>, vector<1x16x8xf32>
    %15 = vector.shape_cast %14 : vector<1x16x8xf32> to vector<16x8xf32>
    %c0_16 = arith.constant 0 : index
    %c128 = arith.constant 128 : index
    %c0_17 = arith.constant 0 : index
    %16 = vector.load %arg1[%c0_16, %c128, %c0_17] : memref<1x256x8xf32, #tpu.memory_space<vmem>>, vector<1x16x8xf32>
    %17 = vector.shape_cast %16 : vector<1x16x8xf32> to vector<16x8xf32>
    %c0_18 = arith.constant 0 : index
    %c144 = arith.constant 144 : index
    %c0_19 = arith.constant 0 : index
    %18 = vector.load %arg1[%c0_18, %c144, %c0_19] : memref<1x256x8xf32, #tpu.memory_space<vmem>>, vector<1x16x8xf32>
    %19 = vector.shape_cast %18 : vector<1x16x8xf32> to vector<16x8xf32>
    %c0_20 = arith.constant 0 : index
    %c160 = arith.constant 160 : index
    %c0_21 = arith.constant 0 : index
    %20 = vector.load %arg1[%c0_20, %c160, %c0_21] : memref<1x256x8xf32, #tpu.memory_space<vmem>>, vector<1x16x8xf32>
    %21 = vector.shape_cast %20 : vector<1x16x8xf32> to vector<16x8xf32>
    %c0_22 = arith.constant 0 : index
    %c176 = arith.constant 176 : index
    %c0_23 = arith.constant 0 : index
    %22 = vector.load %arg1[%c0_22, %c176, %c0_23] : memref<1x256x8xf32, #tpu.memory_space<vmem>>, vector<1x16x8xf32>
    %23 = vector.shape_cast %22 : vector<1x16x8xf32> to vector<16x8xf32>
    %c0_24 = arith.constant 0 : index
    %c192 = arith.constant 192 : index
    %c0_25 = arith.constant 0 : index
    %24 = vector.load %arg1[%c0_24, %c192, %c0_25] : memref<1x256x8xf32, #tpu.memory_space<vmem>>, vector<1x16x8xf32>
    %25 = vector.shape_cast %24 : vector<1x16x8xf32> to vector<16x8xf32>
    %c0_26 = arith.constant 0 : index
    %c208 = arith.constant 208 : index
    %c0_27 = arith.constant 0 : index
    %26 = vector.load %arg1[%c0_26, %c208, %c0_27] : memref<1x256x8xf32, #tpu.memory_space<vmem>>, vector<1x16x8xf32>
    %27 = vector.shape_cast %26 : vector<1x16x8xf32> to vector<16x8xf32>
    %c0_28 = arith.constant 0 : index
    %c224 = arith.constant 224 : index
    %c0_29 = arith.constant 0 : index
    %28 = vector.load %arg1[%c0_28, %c224, %c0_29] : memref<1x256x8xf32, #tpu.memory_space<vmem>>, vector<1x16x8xf32>
    %29 = vector.shape_cast %28 : vector<1x16x8xf32> to vector<16x8xf32>
    %c0_30 = arith.constant 0 : index
    %c240 = arith.constant 240 : index
    %c0_31 = arith.constant 0 : index
    %30 = vector.load %arg1[%c0_30, %c240, %c0_31] : memref<1x256x8xf32, #tpu.memory_space<vmem>>, vector<1x16x8xf32>
    %31 = vector.shape_cast %30 : vector<1x16x8xf32> to vector<16x8xf32>
    %32 = tpu.concatenate %1, %3, %5, %7, %9, %11, %13, %15, %17, %19, %21, %23, %25, %27, %29, %31 in 1 : vector<16x8xf32>, vector<16x8xf32>, vector<16x8xf32>, vector<16x8xf32>, vector<16x8xf32>, vector<16x8xf32>, vector<16x8xf32>, vector<16x8xf32>, vector<16x8xf32>, vector<16x8xf32>, vector<16x8xf32>, vector<16x8xf32>, vector<16x8xf32>, vector<16x8xf32>, vector<16x8xf32>, vector<16x8xf32> -> vector<16x128xf32>
    %c0_32 = arith.constant 0 : index
    %c0_33 = arith.constant 0 : index
    %33 = vector.load %arg2[%c0_32, %c0_33] : memref<1x128xf32, #tpu.memory_space<vmem>>, vector<1x128xf32>
    %34 = vector.broadcast %33 : vector<1x128xf32> to vector<16x128xf32>
    %35 = arith.mulf %32, %34 : vector<16x128xf32>
    %c0_34 = arith.constant 0 : index
    %c0_35 = arith.constant 0 : index
    %36 = vector.load %arg3[%c0_34, %c0_35] : memref<1x128xf32, #tpu.memory_space<vmem>>, vector<1x128xf32>
    %37 = vector.broadcast %36 : vector<1x128xf32> to vector<16x128xf32>
    %38 = arith.addf %35, %37 : vector<16x128xf32>
    %c0_36 = arith.constant 0 : index
    %c0_37 = arith.constant 0 : index
    %c0_38 = arith.constant 0 : index
    %39 = vector.load %arg4[%c0_36, %c0_37, %c0_38] : memref<1x16x128xf32, #tpu.memory_space<vmem>>, vector<1x16x128xf32>
    %40 = vector.shape_cast %39 : vector<1x16x128xf32> to vector<16x128xf32>
    %41 = arith.addf %38, %40 : vector<16x128xf32>
    %c0_39 = arith.constant 0 : index
    %c0_40 = arith.constant 0 : index
    %c0_41 = arith.constant 0 : index
    %42 = vector.load %arg5[%c0_39, %c0_40, %c0_41] : memref<1x16x128xf32, #tpu.memory_space<vmem>>, vector<1x16x128xf32>
    %43 = vector.shape_cast %42 : vector<1x16x128xf32> to vector<16x128xf32>
    %44 = vector.shape_cast %41 : vector<16x128xf32> to vector<1x16x128xf32>
    tpu.vector_store %arg5[%c0_39, %c0_40, %c0_41], %44 {strides = array<i32>} : memref<1x16x128xf32, #tpu.memory_space<vmem>>, vector<1x16x128xf32>,
    return
  }
  func.func @transform_0(%arg0: i32) -> (i32, i32, i32) {
    %c0_i32 = arith.constant 0 : i32
    %c0_i32_0 = arith.constant 0 : i32
    %c0_i32_1 = arith.constant 0 : i32
    return %arg0, %c0_i32, %c0_i32_0 : i32, i32, i32
  }
  func.func @transform_1(%arg0: i32) -> (i32, i32) {
    %c0_i32 = arith.constant 0 : i32
    %c0_i32_0 = arith.constant 0 : i32
    %c0_i32_1 = arith.constant 0 : i32
    return %c0_i32, %c0_i32_0 : i32, i32
  }
  func.func @transform_2(%arg0: i32) -> (i32, i32) {
    %c0_i32 = arith.constant 0 : i32
    %c0_i32_0 = arith.constant 0 : i32
    %c0_i32_1 = arith.constant 0 : i32
    return %c0_i32, %c0_i32_0 : i32, i32
  }
  func.func @transform_3(%arg0: i32) -> (i32, i32, i32) {
    %c0_i32 = arith.constant 0 : i32
    %c0_i32_0 = arith.constant 0 : i32
    %c0_i32_1 = arith.constant 0 : i32
    return %arg0, %c0_i32, %c0_i32_0 : i32, i32, i32
  }
  func.func @transform_4(%arg0: i32) -> (i32, i32, i32) {
    %c0_i32 = arith.constant 0 : i32
    %c0_i32_0 = arith.constant 0 : i32
    %c0_i32_1 = arith.constant 0 : i32
    return %arg0, %c0_i32, %c0_i32_0 : i32, i32, i32
  }
}

</mosaic_0001>

<bundles_post_ra>
// kernel: tile.13
= control target key start
LH: loop header
LB: loop body
LE: loop exit
PB: predicated region body
PF: predicated region fallthrough
CT: control target
= control target key end

     0   :  { %s28_s0 = inlined_call_operand.vmem [shape: f32[8], index: 0, kind: input, shape index: {}]   ;;  %s29_s1 = inlined_call_operand.vmem [shape: f32[16,8], index: 1, kind: output, shape index: {}]  }
   0x1   :  { %v4_v0 = vld [vmem:[%s28_s0] ss:$0 sm:$0xff] }
   0x2   :  { %5 = vst [vmem:[%s29_s1] sm:$0xff] %v4_v0  ;;  %8 = vst [vmem:[%s29_s1 + $0x8] sm:$0xff] %v4_v0 }

// kernel: tile.14
= control target key start
LH: loop header
LB: loop body
LE: loop exit
PB: predicated region body
PF: predicated region fallthrough
CT: control target
= control target key end

     0   :  { %s131_s10 = smov 120   ;;  %s132_s11 = smov 104   ;;  %vm3_vm0 = vcmask 64512   ;;  %vm9_vm1 = vcmask 1048512   ;;  %vm15_vm2 = vcmask 982912   ;;  %vm21_vm3 = vcmask 917312   ;;  %s207_s0 = inlined_call_operand.vmem [shape: f32[16,8], index: 0, kind: input, shape index: {}]   ;;  %s208_s1 = inlined_call_operand.vmem [shape: f32[1,128], index: 1, kind: output, shape index: {}]  }
   0x1   :  { %v101_v0 = vld [vmem:[%s207_s0 + $0xf] sm:$0x1]   ;;  %v103_v1 = vld [vmem:[%s207_s0 + $0xd] sm:$0x1]   ;;  %v102_v2 = vld [vmem:[%s207_s0 + $0xe] sm:$0x1]  }
   0x2   :  { %7 = vrot.lane.b32.xlu0 %v101_v0, %s131_s10  ;;  %19 = vrot.lane.b32.xlu1 %v103_v1, %s132_s11  ;;  %v104_v3 = vld [vmem:[%s207_s0 + $0xc] sm:$0x1]   ;;  %s133_s16 = smov 112   ;;  %s134_s17 = smov 96   ;;  %v105_v4 = vld [vmem:[%s207_s0 + $0xb] sm:$0x1]  }
   0x3   :  { %v106_v5 = vld [vmem:[%s207_s0 + $0xa] sm:$0x1]   ;;  %v2_v6 = vld [vmem:[%s207_s0] sm:$0x1]   ;;  %s135_s24 = smov 88   ;;  %s136_s25 = smov 80  }
   0x4   :  { %4 = vst.msk [vmem:[#allocation0] sm:$0x1] %vm3_vm0, %v2_v6   ;;  %v107_v7 = vld [vmem:[%s207_s0 + $0x9] sm:$0x1]   ;;  %v108_v8 = vld [vmem:[%s207_s0 + $0x8] sm:$0x1]  }
   0x5   :  { %s137_s30 = smov 72   ;;  %s138_s2 = smov 64   ;;  %v109_v9 = vld [vmem:[%s207_s0 + $0x7] sm:$0x1]   ;;  %v110_v10 = vld [vmem:[%s207_s0 + $0x6] sm:$0x1]  }
   0x6   :  { %13 = vrot.lane.b32.xlu0 %v102_v2, %s133_s16  ;;  %25 = vrot.lane.b32.xlu1 %v104_v3, %s134_s17  ;;  %s139_s7 = smov 56   ;;  %s140_s8 = smov 48   ;;  %v111_v11 = vld [vmem:[%s207_s0 + $0x5] sm:$0x1]   ;;  %v112_v12 = vld [vmem:[%s207_s0 + $0x4] sm:$0x1]  }
   0x7   :  { %s141_s13 = smov 40   ;;  %s142_s14 = smov 32   ;;  %v113_v13 = vld [vmem:[%s207_s0 + $0x3] sm:$0x1]   ;;  %v114_v14 = vld [vmem:[%s207_s0 + $0x2] sm:$0x1]  }
   0x8   :  { %s143_s19 = smov 24   ;;  %s144_s20 = smov 16   ;;  %v115_v15 = vld [vmem:[%s207_s0 + $0x1] sm:$0x1]   ;;  %vm27_vm4 = vcmask 851712   ;;  %vm33_vm5 = vcmask 786112  }
   0x9   :  { %s145_s0 = smov 8   ;;  %vm39_vm6 = vcmask 720512   ;;  %vm45_vm7 = vcmask 654912   ;;  %vm51_vm8 = vcmask 589312   ;;  %vm57_vm9 = vcmask 523712  }
   0xa   :  { %31 = vrot.lane.b32.xlu0 %v105_v4, %s135_s24  ;;  %37 = vrot.lane.b32.xlu1 %v106_v5, %s136_s25  ;;  %vm63_vm10 = vcmask 458112   ;;  %vm69_vm11 = vcmask 392512   ;;  %vm75_vm12 = vcmask 326912   ;;  %vm81_vm13 = vcmask 261312  }
   0xb   :  { %vm87_vm14 = vcmask 195712   ;;  %vm93_vm15 = vcmask 130112  }
   0xe   :  { %43 = vrot.lane.b32.xlu0 %v107_v7, %s137_s30  ;;  %49 = vrot.lane.b32.xlu1 %v108_v8, %s138_s2 }
  0x12   :  { %55 = vrot.lane.b32.xlu0 %v109_v9, %s139_s7  ;;  %61 = vrot.lane.b32.xlu1 %v110_v10, %s140_s8 }
  0x16   :  { %67 = vrot.lane.b32.xlu0 %v111_v11, %s141_s13  ;;  %73 = vrot.lane.b32.xlu1 %v112_v12, %s142_s14 }
  0x1a   :  { %79 = vrot.lane.b32.xlu0 %v113_v13, %s143_s19  ;;  %85 = vrot.lane.b32.xlu1 %v114_v14, %s144_s20 }
  0x1e   :  { %91 = vrot.lane.b32.xlu0 %v115_v15, %s145_s0 }
  0x74   :  { %v8_v16 = vpop.permute.xlu0 %7   ;;  %v20_v17 = vpop.permute.xlu1 %19  }
  0x75   :  { %10 = vst.msk [vmem:[#allocation0] sm:$0x1] %vm9_vm1, %v8_v16  }
  0x78   :  { %v14_v18 = vpop.permute.xlu0 %13   ;;  %v26_v19 = vpop.permute.xlu1 %25  }
  0x79   :  { %16 = vst.msk [vmem:[#allocation0] sm:$0x1] %vm15_vm2, %v14_v18  }
  0x7a   :  { %22 = vst.msk [vmem:[#allocation0] sm:$0x1] %vm21_vm3, %v20_v17  }
  0x7b   :  { %28 = vst.msk [vmem:[#allocation0] sm:$0x1] %vm27_vm4, %v26_v19  }
  0x7c   :  { %v32_v20 = vpop.permute.xlu0 %31   ;;  %v38_v21 = vpop.permute.xlu1 %37  }
  0x7d   :  { %34 = vst.msk [vmem:[#allocation0] sm:$0x1] %vm33_vm5, %v32_v20  }
  0x7e   :  { %40 = vst.msk [vmem:[#allocation0] sm:$0x1] %vm39_vm6, %v38_v21  }
  0x80   :  { %v44_v22 = vpop.permute.xlu0 %43   ;;  %v50_v23 = vpop.permute.xlu1 %49  }
  0x81   :  { %46 = vst.msk [vmem:[#allocation0] sm:$0x1] %vm45_vm7, %v44_v22  }
  0x82   :  { %52 = vst.msk [vmem:[#allocation0] sm:$0x1] %vm51_vm8, %v50_v23  }
  0x84   :  { %v56_v24 = vpop.permute.xlu0 %55   ;;  %v62_v25 = vpop.permute.xlu1 %61  }
  0x85   :  { %58 = vst.msk [vmem:[#allocation0] sm:$0x1] %vm57_vm9, %v56_v24  }
  0x86   :  { %64 = vst.msk [vmem:[#allocation0] sm:$0x1] %vm63_vm10, %v62_v25  }
  0x88   :  { %v68_v26 = vpop.permute.xlu0 %67   ;;  %v74_v27 = vpop.permute.xlu1 %73  }
  0x89   :  { %70 = vst.msk [vmem:[#allocation0] sm:$0x1] %vm69_vm11, %v68_v26  }
  0x8a   :  { %76 = vst.msk [vmem:[#allocation0] sm:$0x1] %vm75_vm12, %v74_v27  }
  0x8c   :  { %v80_v28 = vpop.permute.xlu0 %79   ;;  %v86_v29 = vpop.permute.xlu1 %85  }
  0x8d   :  { %82 = vst.msk [vmem:[#allocation0] sm:$0x1] %vm81_vm13, %v80_v28  }
  0x8e   :  { %88 = vst.msk [vmem:[#allocation0] sm:$0x1] %vm87_vm14, %v86_v29  }
  0x90   :  { %v92_v30 = vpop.permute.xlu0 %91  }
  0x91   :  { %94 = vst.msk [vmem:[#allocation0] sm:$0x1] %vm93_vm15, %v92_v30  }
  0x98   :  { %v98_v31 = vld [vmem:[#allocation0] sm:$0x1] }
  0x99   :  { %100 = vst [vmem:[%s208_s1] sm:$0x1] %v98_v31 }

// kernel: resnet_block_pallas.5
= control target key start
LH: loop header
LB: loop body
LE: loop exit
PB: predicated region body
PF: predicated region fallthrough
CT: control target
= control target key end

     0   :  { %s595_s15 = smov 0   ;;  %s659_s0 = inlined_call_operand.vmem [shape: f32[2,256,8], index: 0, kind: input, shape index: {}]   ;;  %s660_s1 = inlined_call_operand.vmem [shape: f32[1,128], index: 1, kind: input, shape index: {}]   ;;  %s661_s2 = inlined_call_operand.vmem [shape: f32[1,128], index: 2, kind: input, shape index: {}]   ;;  %s662_s3 = inlined_call_operand.vmem [shape: f32[2,16,128], index: 3, kind: input, shape index: {}]   ;;  %s663_s4 = inlined_call_operand.vmem [shape: f32[2,16,128], index: 4, kind: output, shape index: {}]  }
   0x1 LB: > { %s506_s16 = sadd.s32 4294967295, %s553_s15   ;;  %p510_p0 = scmp.ge.s32.totalorder %s553_s15, 1  ;;  %s553_s15 = sphi %s595_s15, %s14_s15  }
   0x2   : > { %p172_p1 = scmp.lt.s32.totalorder %s553_s15, 3 }
   0x4   : > { %p173_p2 = pnand %p510_p0, %p172_p1 }
   0x5   : > { %p203_p3 = scmp.lt.s32.totalorder (!%p173_p2), %s506_s16, 1  ;;  %s555_s21 = smov (!%p173_p2), 16   ;;  %vm370_vm0 = vcmask (!%p173_p2), 64512   ;;  %vm373_vm1 = vcmask (!%p173_p2), 130048   ;;  %vm376_vm2 = vcmask (!%p173_p2), 195584   ;;  %vm379_vm3 = vcmask (!%p173_p2), 261120  }
   0x6   : > { %176 = sbr.rel (%p173_p2) target bundleno = 196 (0xc4), region = 36  ;;  %s556_s22 = smov (!%p173_p2), 8   ;;  %vm382_vm4 = vcmask (!%p173_p2), 326656   ;;  %vm385_vm5 = vcmask (!%p173_p2), 392192   ;;  %vm388_vm6 = vcmask (!%p173_p2), 457728   ;;  %vm391_vm7 = vcmask (!%p173_p2), 523264  }
   0x7   : > { %s557_s23 = smov (!%p173_p2), 24   ;;  %s558_s24 = smov (!%p173_p2), 32   ;;  %vm394_vm8 = vcmask (!%p173_p2), 588800   ;;  %vm397_vm9 = vcmask (!%p173_p2), 654336   ;;  %vm400_vm10 = vcmask (!%p173_p2), 719872   ;;  %vm403_vm11 = vcmask (!%p173_p2), 785408  }
   0x8   : > { %s559_s25 = smov (!%p173_p2), 40   ;;  %s560_s26 = smov (!%p173_p2), 48   ;;  %vm406_vm12 = vcmask (!%p173_p2), 850944   ;;  %vm409_vm13 = vcmask (!%p173_p2), 916480   ;;  %vm412_vm14 = vcmask (!%p173_p2), 982016  }
   0x9   : > { %s561_s27 = smov (!%p173_p2), 56   ;;  %s562_s28 = smov (!%p173_p2), 64  }
   0xa   : > { %s563_s29 = smov (!%p173_p2), 72   ;;  %s564_s30 = smov (!%p173_p2), 80  }
   0xb   : > { %s565_s5 = smov (!%p173_p2), 88   ;;  %s566_s6 = smov (!%p173_p2), 96  }
   0xc   : > { %s567_s7 = smov (!%p173_p2), 104   ;;  %s568_s8 = smov (!%p173_p2), 112  }
   0xd   : > { %s665_s16 = smov (!%p203_p3, %s506_s16), 1  ;;  %s569_s9 = smov 120  }
   0xe   : > { %s521_s17 = sshll.u32 %s665_s16, 8  ;;  %s522_s10 = sshll.u32 %s665_s16, 4 }
   0xf   : > { %s609_s20 = scalar_lea.vmem %s659_s0, %s521_s17  ;;  %s212_s17 = scalar_lea.vmem %s662_s3, %s522_s10 }
  0x10   : > { %v222_v0 = vld [vmem:[%s609_s20 + $0x20] sm:$0xff]  ;;  %v220_v1 = vld [vmem:[%s609_s20 + $0x10] sm:$0xff]  ;;  %v223_v2 = vld [vmem:[%s609_s20 + $0x28] sm:$0xff] }
  0x11   : > { %260 = vrot.lane.b32.xlu1 %v222_v0, %s555_s21  ;;  %252 = vrot.lane.b32.xlu0 %v220_v1, %s556_s22  ;;  %v221_v3 = vld [vmem:[%s609_s20 + $0x18] sm:$0xff]  ;;  %v224_v5 = vld [vmem:[%s609_s20 + $0x30] sm:$0xff] }
  0x12   : > { %v225_v4 = vld [vmem:[%s609_s20 + $0x38] sm:$0xff]  ;;  %v227_v6 = vld [vmem:[%s609_s20 + $0x48] sm:$0xff]  ;;  %v226_v7 = vld [vmem:[%s609_s20 + $0x40] sm:$0xff] }
  0x13   : > { %v229_v8 = vld [vmem:[%s609_s20 + $0x58] sm:$0xff]  ;;  %v228_v9 = vld [vmem:[%s609_s20 + $0x50] sm:$0xff]  ;;  %v231_v10 = vld [vmem:[%s609_s20 + $0x68] sm:$0xff] }
  0x14   : > { %v230_v11 = vld [vmem:[%s609_s20 + $0x60] sm:$0xff]  ;;  %v233_v12 = vld [vmem:[%s609_s20 + $0x78] sm:$0xff]  ;;  %v232_v13 = vld [vmem:[%s609_s20 + $0x70] sm:$0xff] }
  0x15   : > { %262 = vrot.lane.b32.xlu1 %v223_v2, %s555_s21  ;;  %254 = vrot.lane.b32.xlu0 %v221_v3, %s556_s22  ;;  %v235_v14 = vld [vmem:[%s609_s20 + $0x88] sm:$0xff]  ;;  %v234_v15 = vld [vmem:[%s609_s20 + $0x80] sm:$0xff]  ;;  %s217_s21 = scalar_lea.vmem %s663_s4, %s522_s10 }
  0x16   : > { %v237_v16 = vld [vmem:[%s609_s20 + $0x98] sm:$0xff]  ;;  %v236_v17 = vld [vmem:[%s609_s20 + $0x90] sm:$0xff]  ;;  %v239_v18 = vld [vmem:[%s609_s20 + $0xa8] sm:$0xff] }
  0x17   : > { %v238_v19 = vld [vmem:[%s609_s20 + $0xa0] sm:$0xff]  ;;  %v241_v20 = vld [vmem:[%s609_s20 + $0xb8] sm:$0xff]  ;;  %v240_v21 = vld [vmem:[%s609_s20 + $0xb0] sm:$0xff] }
  0x18   : > { %v243_v22 = vld [vmem:[%s609_s20 + $0xc8] sm:$0xff]  ;;  %v242_v23 = vld [vmem:[%s609_s20 + $0xc0] sm:$0xff]  ;;  %v245_v24 = vld [vmem:[%s609_s20 + $0xd8] sm:$0xff] }
  0x19   : > { %270 = vrot.lane.b32.xlu1 %v225_v4, %s557_s23  ;;  %268 = vrot.lane.b32.xlu0 %v224_v5, %s557_s23  ;;  %v244_v25 = vld [vmem:[%s609_s20 + $0xd0] sm:$0xff]  ;;  %v247_v26 = vld [vmem:[%s609_s20 + $0xe8] sm:$0xff] }
  0x1a   : > { %v246_v27 = vld [vmem:[%s609_s20 + $0xe0] sm:$0xff]  ;;  %v249_v28 = vld [vmem:[%s609_s20 + $0xf8] sm:$0xff]  ;;  %v248_v29 = vld [vmem:[%s609_s20 + $0xf0] sm:$0xff] }
  0x1b   : > { %v218_v50 = vld [vmem:[%s609_s20] sm:$0xff]  ;;  %v219_v51 = vld [vmem:[%s609_s20 + $0x8] sm:$0xff] }
  0x1d   : > { %278 = vrot.lane.b32.xlu1 %v227_v6, %s558_s24  ;;  %276 = vrot.lane.b32.xlu0 %v226_v7, %s558_s24 }
  0x21   : > { %286 = vrot.lane.b32.xlu1 %v229_v8, %s559_s25  ;;  %284 = vrot.lane.b32.xlu0 %v228_v9, %s559_s25 }
  0x25   : > { %294 = vrot.lane.b32.xlu1 %v231_v10, %s560_s26  ;;  %292 = vrot.lane.b32.xlu0 %v230_v11, %s560_s26 }
  0x29   : > { %302 = vrot.lane.b32.xlu1 %v233_v12, %s561_s27  ;;  %300 = vrot.lane.b32.xlu0 %v232_v13, %s561_s27 }
  0x2d   : > { %310 = vrot.lane.b32.xlu1 %v235_v14, %s562_s28  ;;  %308 = vrot.lane.b32.xlu0 %v234_v15, %s562_s28 }
  0x31   : > { %318 = vrot.lane.b32.xlu1 %v237_v16, %s563_s29  ;;  %316 = vrot.lane.b32.xlu0 %v236_v17, %s563_s29 }
  0x35   : > { %326 = vrot.lane.b32.xlu1 %v239_v18, %s564_s30  ;;  %324 = vrot.lane.b32.xlu0 %v238_v19, %s564_s30 }
  0x39   : > { %334 = vrot.lane.b32.xlu1 %v241_v20, %s565_s5  ;;  %332 = vrot.lane.b32.xlu0 %v240_v21, %s565_s5 }
  0x3d   : > { %342 = vrot.lane.b32.xlu1 %v243_v22, %s566_s6  ;;  %340 = vrot.lane.b32.xlu0 %v242_v23, %s566_s6  ;;  %v517_v22 = vld [vmem:[%s660_s1] ss:$0 sm:$0xff] }
  0x41   : > { %350 = vrot.lane.b32.xlu1 %v245_v24, %s567_s7  ;;  %348 = vrot.lane.b32.xlu0 %v244_v25, %s567_s7 }
  0x45   : > { %358 = vrot.lane.b32.xlu1 %v247_v26, %s568_s8  ;;  %356 = vrot.lane.b32.xlu0 %v246_v27, %s568_s8  ;;  %v518_v27 = vld [vmem:[%s661_s2] ss:$0 sm:$0xff] }
  0x49   : > { %366 = vrot.lane.b32.xlu1 %v249_v28, %s569_s9  ;;  %364 = vrot.lane.b32.xlu0 %v248_v29, %s569_s9 }
  0x83   : > { %v261_v30 = vpop.permute.xlu1 %260  ;;  %v253_v31 = vpop.permute.xlu0 %252 }
  0x84   : > { %v371_v54 = vsel %vm370_vm0, %v218_v50, %v253_v31 }
  0x85   : > { %v374_v57 = vsel %vm373_vm1, %v371_v54, %v261_v30 }
  0x87   : > { %v263_v32 = vpop.permute.xlu1 %262  ;;  %v255_v33 = vpop.permute.xlu0 %254 }
  0x88   : > { %v372_v55 = vsel %vm370_vm0, %v219_v51, %v255_v33  ;;  %v433_v33 = vld [vmem:[%s212_s17] sm:$0xff] }
  0x89   : > { %v375_v56 = vsel %vm373_vm1, %v372_v55, %v263_v32  ;;  %v434_v32 = vld [vmem:[%s212_s17 + $0x8] sm:$0xff] }
  0x8b   : > { %v271_v34 = vpop.permute.xlu1 %270  ;;  %v269_v35 = vpop.permute.xlu0 %268 }
  0x8c   : > { %v378_v60 = vsel %vm376_vm2, %v375_v56, %v271_v34  ;;  %v377_v61 = vsel %vm376_vm2, %v374_v57, %v269_v35 }
  0x8f   : > { %v279_v36 = vpop.permute.xlu1 %278  ;;  %v277_v37 = vpop.permute.xlu0 %276 }
  0x90   : > { %v381_v62 = vsel %vm379_vm3, %v378_v60, %v279_v36  ;;  %v380_v63 = vsel %vm379_vm3, %v377_v61, %v277_v37 }
  0x93   : > { %v287_v38 = vpop.permute.xlu1 %286  ;;  %v285_v39 = vpop.permute.xlu0 %284 }
  0x94   : > { %v384_v0 = vsel %vm382_vm4, %v381_v62, %v287_v38  ;;  %v383_v1 = vsel %vm382_vm4, %v380_v63, %v285_v39 }
  0x97   : > { %v295_v40 = vpop.permute.xlu1 %294  ;;  %v293_v41 = vpop.permute.xlu0 %292 }
  0x98   : > { %v387_v2 = vsel %vm385_vm5, %v384_v0, %v295_v40  ;;  %v386_v3 = vsel %vm385_vm5, %v383_v1, %v293_v41 }
  0x9b   : > { %v303_v42 = vpop.permute.xlu1 %302  ;;  %v301_v43 = vpop.permute.xlu0 %300 }
  0x9c   : > { %v390_v6 = vsel %vm388_vm6, %v387_v2, %v303_v42  ;;  %v389_v7 = vsel %vm388_vm6, %v386_v3, %v301_v43 }
  0x9f   : > { %v311_v44 = vpop.permute.xlu1 %310  ;;  %v309_v45 = vpop.permute.xlu0 %308 }
  0xa0   : > { %v393_v8 = vsel %vm391_vm7, %v390_v6, %v311_v44  ;;  %v392_v9 = vsel %vm391_vm7, %v389_v7, %v309_v45 }
  0xa3   : > { %v319_v46 = vpop.permute.xlu1 %318  ;;  %v317_v47 = vpop.permute.xlu0 %316 }
  0xa4   : > { %v396_v10 = vsel %vm394_vm8, %v393_v8, %v319_v46  ;;  %v395_v11 = vsel %vm394_vm8, %v392_v9, %v317_v47 }
  0xa7   : > { %v327_v48 = vpop.permute.xlu1 %326  ;;  %v325_v49 = vpop.permute.xlu0 %324 }
  0xa8   : > { %v399_v12 = vsel %vm397_vm9, %v396_v10, %v327_v48  ;;  %v398_v13 = vsel %vm397_vm9, %v395_v11, %v325_v49 }
  0xab   : > { %v335_v52 = vpop.permute.xlu1 %334  ;;  %v333_v53 = vpop.permute.xlu0 %332 }
  0xac   : > { %v402_v16 = vsel %vm400_vm10, %v399_v12, %v335_v52  ;;  %v401_v17 = vsel %vm400_vm10, %v398_v13, %v333_v53 }
  0xaf   : > { %v343_v58 = vpop.permute.xlu1 %342  ;;  %v341_v59 = vpop.permute.xlu0 %340 }
  0xb0   : > { %v405_v18 = vsel %vm403_vm11, %v402_v16, %v343_v58  ;;  %v404_v19 = vsel %vm403_vm11, %v401_v17, %v341_v59 }
  0xb3   : > { %v351_v4 = vpop.permute.xlu1 %350  ;;  %v349_v5 = vpop.permute.xlu0 %348 }
  0xb4   : > { %v408_v20 = vsel %vm406_vm12, %v405_v18, %v351_v4  ;;  %v407_v21 = vsel %vm406_vm12, %v404_v19, %v349_v5 }
  0xb7   : > { %v359_v14 = vpop.permute.xlu1 %358  ;;  %v357_v15 = vpop.permute.xlu0 %356 }
  0xb8   : > { %v411_v23 = vsel %vm409_vm13, %v408_v20, %v359_v14  ;;  %v410_v24 = vsel %vm409_vm13, %v407_v21, %v357_v15 }
  0xbb   : > { %v367_v25 = vpop.permute.xlu1 %366  ;;  %v365_v26 = vpop.permute.xlu0 %364 }
  0xbc   : > { %v414_v28 = vsel %vm412_vm14, %v411_v23, %v367_v25  ;;  %v413_v29 = vsel %vm412_vm14, %v410_v24, %v365_v26 }
  0xbd   : > { %v423_v30 = vmul.f32 %v517_v22, %v414_v28  ;;  %v422_v31 = vmul.f32 %v517_v22, %v413_v29 }
  0xbf   : > { %v432_v34 = vadd.f32 %v518_v27, %v423_v30  ;;  %v431_v35 = vadd.f32 %v518_v27, %v422_v31 }
  0xc1   : > { %v436_v36 = vadd.f32 %v434_v32, %v432_v34  ;;  %v435_v37 = vadd.f32 %v433_v33, %v431_v35 }
  0xc3   : > { %438 = vst [vmem:[%s217_s21 + $0x8] sm:$0xff] %v436_v36  ;;  %437 = vst [vmem:[%s217_s21] sm:$0xff] %v435_v37 }
  0xc4 PF: > { %s14_s15 = sadd.s32 1, %s553_s15  }
  0xc5   : > { %p11_p4 = scmp.ge.s32.totalorder %s14_s15, 4  }
  0xc7   :  { %13 = sbr.rel (!%p11_p4) target bundleno = 1 (0x1), region = 69 }

// kernel: resnet_block_pallas.3
= control target key start
LH: loop header
LB: loop body
LE: loop exit
PB: predicated region body
PF: predicated region fallthrough
CT: control target
= control target key end

     0   :  { %s2933_s12 = smov 0   ;;  %s4642_s0 = inlined_call_operand.vmem [shape: f32[2,20,20,8], index: 0, kind: input, shape index: {}]   ;;  %s4643_s1 = inlined_call_operand.vmem [shape: f32[72,8], index: 1, kind: input, shape index: {}]   ;;  %s4644_s2 = inlined_call_operand.vmem [shape: f32[2,256,8], index: 2, kind: output, shape index: {0}]   ;;  %s4645_s3 = inlined_call_operand.vmem [shape: f32[2,2,8], index: 3, kind: output, shape index: {1}]  }
   0x1 LB: > { %s2384_s13 = sadd.s32 4294967295, %s2902_s12   ;;  %p2388_p0 = scmp.ge.s32.totalorder %s2902_s12, 1  ;;  %s2902_s12 = sphi %s2933_s12, %s14_s12  }
   0x2   : > { %p140_p1 = scmp.lt.s32.totalorder %s2902_s12, 3 }
   0x4   : > { %p141_p2 = pnand %p2388_p0, %p140_p1 }
   0x5   : > { %p168_p3 = scmp.lt.s32.totalorder (!%p141_p2), %s2384_s13, 1  ;;  %s2904_s18 = smov (!%p141_p2), 16   ;;  %v1760_v12 = vld [vmem:[%s4643_s1] sm:$0xff] (!%p141_p2)  ;;  %v1761_v13 = vld [vmem:[%s4643_s1 + $0x8] sm:$0xff] (!%p141_p2)  ;;  %v1762_v15 = vld [vmem:[%s4643_s1 + $0x10] sm:$0xff] (!%p141_p2)  ;;  %vm1496_vm0 = vcmask (!%p141_p2), 64512  }
   0x6   : > { %144 = sbr.rel (%p141_p2) target bundleno = 1110 (0x456), region = 28  ;;  %s2905_s19 = smov (!%p141_p2), 8   ;;  %v2797_v14 = vpack.c.bf16 (!%p141_p2), %v1761_v13, %v1760_v12  ;;  %v1763_v16 = vld [vmem:[%s4643_s1 + $0x18] sm:$0xff] (!%p141_p2)  ;;  %v1764_v20 = vld [vmem:[%s4643_s1 + $0x20] sm:$0xff] (!%p141_p2)  ;;  %v1765_v21 = vld [vmem:[%s4643_s1 + $0x28] sm:$0xff] (!%p141_p2)  ;;  %vm1529_vm1 = vcmask (!%p141_p2), 130048  }
   0x7   : > { %s2906_s20 = smov (!%p141_p2), 24   ;;  %s2907_s21 = smov (!%p141_p2), 32   ;;  %v2801_v17 = vpack.c.bf16 (!%p141_p2), %v1763_v16, %v1762_v15  ;;  %v2805_v22 = vpack.c.bf16 (!%p141_p2), %v1765_v21, %v1764_v20  ;;  %v1766_v25 = vld [vmem:[%s4643_s1 + $0x30] sm:$0xff] (!%p141_p2)  ;;  %v1767_v26 = vld [vmem:[%s4643_s1 + $0x38] sm:$0xff] (!%p141_p2)  ;;  %v1768_v30 = vld [vmem:[%s4643_s1 + $0x40] sm:$0xff] (!%p141_p2)  ;;  %vm1562_vm2 = vcmask (!%p141_p2), 195584  }
   0x8   : > { %s2908_s22 = smov (!%p141_p2), 40   ;;  %2798 = vmatprep.subr.bf16.mxu0 (!%p141_p2), %v2797_v14  ;;  %s2909_s8 = smov (!%p141_p2), 48   ;;  %v2809_v29 = vpack.c.bf16 (!%p141_p2), %v1767_v26, %v1766_v25  ;;  %vm1595_vm3 = vcmask (!%p141_p2), 261120   ;;  %vm1628_vm4 = vcmask (!%p141_p2), 326656   ;;  %vm1661_vm5 = vcmask (!%p141_p2), 392192  }
   0x9   : > { %2800 = vmatpush3.bf16.msra.mxu0 (!%p141_p2), %v2797_v14  ;;  %s2910_s15 = smov (!%p141_p2), 56   ;;  %s2911_s24 = smov (!%p141_p2), 64   ;;  %vm1694_vm6 = vcmask (!%p141_p2), 457728   ;;  %vm1727_vm7 = vcmask (!%p141_p2), 523264   ;;  %vm1769_vm8 = vcmask (!%p141_p2), 588800   ;;  %vm2161_vm9 = vcmask (!%p141_p2), 57344  }
   0xa   : > { %2802 = vmatprep.subr.bf16.mxu0 (!%p141_p2), %v2801_v17 }
   0xd   : > { %s4658_s13 = smov (!%p168_p3, %s2384_s13), 1  ;;  %2804 = vmatpush3.bf16.msra.mxu0 %v2801_v17 }
   0xe   : > { %s2877_s14 = smul.u32 480, %s4658_s13  ;;  %2806 = vmatprep.subr.bf16.mxu0 %v2805_v22  ;;  %s2619_s25 = sshll.u32 %s4658_s13, 8 }
   0xf   : > { %s3873_s28 = scalar_lea.vmem %s4644_s2, %s2619_s25 }
  0x10   : > { %s2947_s17 = scalar_lea.vmem %s4642_s0, %s2877_s14 }
  0x11   : > { %v2950_v0 = vld [vmem:[%s2947_s17 + $0x60] sm:$0xff]  ;;  %v2953_v1 = vld [vmem:[%s2947_s17 + $0x30] sm:$0xff]  ;;  %v2960_v2 = vld [vmem:[%s2947_s17 + $0x68] sm:$0xff]  ;;  %2808 = vmatpush3.bf16.msra.mxu0 %v2805_v22 }
  0x12   : > { %632 = vrot.lane.b32.xlu1 %v2950_v0, %s2904_s18  ;;  %504 = vrot.lane.b32.xlu0 %v2953_v1, %s2905_s19  ;;  %v2963_v3 = vld [vmem:[%s2947_s17 + $0x38] sm:$0xff]  ;;  %v281_v4 = vld [vmem:[%s2947_s17 + $0xa] sm:$0xff] }
  0x13   : > { %v280_v5 = vld [vmem:[%s2947_s17 + $0x2] sm:$0xff]  ;;  %v2977_v7 = vld [vmem:[%s2947_s17 + $0x32] sm:$0xff]  ;;  %v2987_v9 = vld [vmem:[%s2947_s17 + $0x3a] sm:$0xff]  ;;  %2810 = vmatprep.subr.bf16.mxu0 %v2809_v29 }
  0x14   : > { %v2974_v6 = vld [vmem:[%s2947_s17 + $0x48] sm:$0xff]  ;;  %v2994_v10 = vld [vmem:[%s2947_s17 + $0x78] sm:$0xff]  ;;  %v2997_v11 = vld [vmem:[%s2947_s17 + $0x50] sm:$0xff] }
  0x15   : > { %v2984_v8 = vld [vmem:[%s2947_s17 + $0x62] sm:$0xff]  ;;  %v3017_v19 = vld [vmem:[%s2947_s17 + $0x6a] sm:$0xff]  ;;  %v282_v23 = vld [vmem:[%s2947_s17 + $0x1a] sm:$0xff]  ;;  %2812 = vmatpush3.bf16.msra.mxu0 %v2809_v29 }
  0x16   : > { %634 = vrot.lane.b32.xlu1 %v2960_v2, %s2904_s18  ;;  %506 = vrot.lane.b32.xlu0 %v2963_v3, %s2905_s19  ;;  %v376_v18 = vld [vmem:[%s2947_s17 + $0x4] sm:$0xff]  ;;  %v2521_v27 = vld [vmem:[%s2947_s17 + $0x34] sm:$0xff] }
  0x17   : > { %v3030_v24 = vld [vmem:[%s2947_s17 + $0x80] sm:$0xff]  ;;  %v377_v28 = vld [vmem:[%s2947_s17 + $0xc] sm:$0xff]  ;;  %2747 = vmatprep.subr.mxu0 %v1768_v30  ;;  %v3088_v41 = vld [vmem:[%s2947_s17 + $0x98] sm:$0xff] }
  0x18   : > { %v2459_v31 = vld [vmem:[%s2947_s17 + $0x4a] sm:$0xff]  ;;  %v283_v32 = vld [vmem:[%s2947_s17 + $0x22] sm:$0xff]  ;;  %v2460_v35 = vld [vmem:[%s2947_s17 + $0x52] sm:$0xff] }
  0x19   : > { %v3053_v33 = vld [vmem:[%s2947_s17 + $0x64] sm:$0xff]  ;;  %v2522_v34 = vld [vmem:[%s2947_s17 + $0x3c] sm:$0xff]  ;;  %2748 = vmatpush3.msra.mxu0 %v1768_v30  ;;  %v3064_v36 = vld [vmem:[%s2947_s17 + $0x6c] sm:$0xff] }
  0x1a   : > { %762 = vrot.lane.b32.xlu1 %v281_v4, %s2906_s20  ;;  %760 = vrot.lane.b32.xlu0 %v280_v5, %s2906_s20  ;;  %v3067_v37 = vld [vmem:[%s2947_s17 + $0x7a] sm:$0xff]  ;;  %v3074_v38 = vld [vmem:[%s2947_s17 + $0x90] sm:$0xff] }
  0x1b   : > { %v378_v39 = vld [vmem:[%s2947_s17 + $0x1c] sm:$0xff]  ;;  %v2523_v42 = vld [vmem:[%s2947_s17 + $0x4c] sm:$0xff]  ;;  %v379_v43 = vld [vmem:[%s2947_s17 + $0x24] sm:$0xff] }
  0x1c   : > { %v3082_v40 = vld [vmem:[%s2947_s17 + $0x82] sm:$0xff]  ;;  %v2524_v45 = vld [vmem:[%s2947_s17 + $0x54] sm:$0xff]  ;;  %v3163_v53 = vld [vmem:[%s2947_s17 + $0xaa] sm:$0xff] }
  0x1d   : > { %v3103_v44 = vld [vmem:[%s2947_s17 + $0x7c] sm:$0xff]  ;;  %v3114_v46 = vld [vmem:[%s2947_s17 + $0x84] sm:$0xff]  ;;  %v3117_v47 = vld [vmem:[%s2947_s17 + $0x92] sm:$0xff] }
  0x1e   : > { %508 = vrot.lane.b32.xlu1 %v2974_v6, %s2905_s19  ;;  %888 = vrot.lane.b32.xlu0 %v2977_v7, %s2907_s21  ;;  %v3124_v48 = vld [vmem:[%s2947_s17 + $0xa8] sm:$0xff]  ;;  %v3131_v49 = vld [vmem:[%s2947_s17 + $0x9a] sm:$0xff] }
  0x1f   : > { %v3137_v50 = vld [vmem:[%s2947_s17 + $0xb0] sm:$0xff]  ;;  %v3160_v52 = vld [vmem:[%s2947_s17 + $0x9c] sm:$0xff]  ;;  %v3185_v60 = vld [vmem:[%s2947_s17 + $0xc8] sm:$0xff] }
  0x20   : > { %v3149_v51 = vld [vmem:[%s2947_s17 + $0x94] sm:$0xff]  ;;  %v3170_v54 = vld [vmem:[%s2947_s17 + $0xc0] sm:$0xff]  ;;  %v3242_v26 = vld [vmem:[%s2947_s17 + $0xca] sm:$0xff] }
  0x21   : > { %v3177_v57 = vld [vmem:[%s2947_s17 + $0xb2] sm:$0xff]  ;;  %v3221_v16 = vld [vmem:[%s2947_s17 + $0xc2] sm:$0xff] }
  0x22   : > { %1016 = vrot.lane.b32.xlu1 %v2984_v8, %s2908_s22  ;;  %890 = vrot.lane.b32.xlu0 %v2987_v9, %s2907_s21  ;;  %v3218_v15 = vld [vmem:[%s2947_s17 + $0xb4] sm:$0xff]  ;;  %v183_v30 = vld [vmem:[%s2947_s17 + $0x8] sm:$0xff] }
  0x23   : > { %v3233_v20 = vld [vmem:[%s2947_s17 + $0xd8] sm:$0xff] }
  0x26   : > { %636 = vrot.lane.b32.xlu1 %v2994_v10, %s2904_s18  ;;  %510 = vrot.lane.b32.xlu0 %v2997_v11, %s2905_s19 }
  0x2a   : > { %1144 = vrot.lane.b32.xlu1 %v376_v18, %s2909_s8  ;;  %1018 = vrot.lane.b32.xlu0 %v3017_v19, %s2908_s22 }
  0x2e   : > { %764 = vrot.lane.b32.xlu1 %v282_v23, %s2906_s20  ;;  %638 = vrot.lane.b32.xlu0 %v3030_v24, %s2904_s18 }
  0x32   : > { %1272 = vrot.lane.b32.xlu1 %v2521_v27, %s2910_s15  ;;  %1146 = vrot.lane.b32.xlu0 %v377_v28, %s2909_s8 }
  0x36   : > { %892 = vrot.lane.b32.xlu1 %v2459_v31, %s2907_s21  ;;  %766 = vrot.lane.b32.xlu0 %v283_v32, %s2906_s20 }
  0x3a   : > { %1400 = vrot.lane.b32.xlu1 %v3053_v33, %s2911_s24  ;;  %1274 = vrot.lane.b32.xlu0 %v2522_v34, %s2910_s15 }
  0x3e   : > { %894 = vrot.lane.b32.xlu1 %v2460_v35, %s2907_s21  ;;  %512 = vrot.lane.b32.xlu0 %v2950_v0, %s2905_s19 }
  0x42   : > { %1402 = vrot.lane.b32.xlu1 %v3064_v36, %s2911_s24  ;;  %1020 = vrot.lane.b32.xlu0 %v3067_v37, %s2908_s22 }
  0x46   : > { %640 = vrot.lane.b32.xlu1 %v3074_v38, %s2904_s18  ;;  %514 = vrot.lane.b32.xlu0 %v2960_v2, %s2905_s19 }
  0x4a   : > { %1148 = vrot.lane.b32.xlu1 %v378_v39, %s2909_s8  ;;  %1022 = vrot.lane.b32.xlu0 %v3082_v40, %s2908_s22 }
  0x4e   : > { %768 = vrot.lane.b32.xlu1 %v2977_v7, %s2906_s20  ;;  %642 = vrot.lane.b32.xlu0 %v3088_v41, %s2904_s18 }
  0x52   : > { %1276 = vrot.lane.b32.xlu1 %v2523_v42, %s2910_s15  ;;  %1150 = vrot.lane.b32.xlu0 %v379_v43, %s2909_s8 }
  0x56   : > { %896 = vrot.lane.b32.xlu1 %v2984_v8, %s2907_s21  ;;  %770 = vrot.lane.b32.xlu0 %v2987_v9, %s2906_s20 }
  0x5a   : > { %1404 = vrot.lane.b32.xlu1 %v3103_v44, %s2911_s24  ;;  %1278 = vrot.lane.b32.xlu0 %v2524_v45, %s2910_s15 }
  0x5e   : > { %898 = vrot.lane.b32.xlu1 %v3017_v19, %s2907_s21  ;;  %516 = vrot.lane.b32.xlu0 %v2994_v10, %s2905_s19 }
  0x62   : > { %1406 = vrot.lane.b32.xlu1 %v3114_v46, %s2911_s24  ;;  %1024 = vrot.lane.b32.xlu0 %v3117_v47, %s2908_s22 }
  0x66   : > { %644 = vrot.lane.b32.xlu1 %v3124_v48, %s2904_s18  ;;  %518 = vrot.lane.b32.xlu0 %v3030_v24, %s2905_s19 }
  0x6a   : > { %1152 = vrot.lane.b32.xlu1 %v2521_v27, %s2909_s8  ;;  %1026 = vrot.lane.b32.xlu0 %v3131_v49, %s2908_s22 }
  0x6e   : > { %772 = vrot.lane.b32.xlu1 %v2459_v31, %s2906_s20  ;;  %646 = vrot.lane.b32.xlu0 %v3137_v50, %s2904_s18 }
  0x72   : > { %1280 = vrot.lane.b32.xlu1 %v3053_v33, %s2910_s15  ;;  %1154 = vrot.lane.b32.xlu0 %v2522_v34, %s2909_s8 }
  0x76   : > { %900 = vrot.lane.b32.xlu1 %v3067_v37, %s2907_s21  ;;  %774 = vrot.lane.b32.xlu0 %v2460_v35, %s2906_s20  ;;  %v3258_v35 = vld [vmem:[%s2947_s17 + $0xe0] sm:$0xff] }
  0x7a   : > { %1408 = vrot.lane.b32.xlu1 %v3149_v51, %s2911_s24  ;;  %1282 = vrot.lane.b32.xlu0 %v3064_v36, %s2910_s15 }
  0x7e   : > { %902 = vrot.lane.b32.xlu1 %v3082_v40, %s2907_s21  ;;  %520 = vrot.lane.b32.xlu0 %v3074_v38, %s2905_s19 }
  0x82   : > { %1410 = vrot.lane.b32.xlu1 %v3160_v52, %s2911_s24  ;;  %1028 = vrot.lane.b32.xlu0 %v3163_v53, %s2908_s22 }
  0x84   : > { %v633_v55 = vpop.permute.xlu1 %632  ;;  %v505_v56 = vpop.permute.xlu0 %504 }
  0x86   : > { %648 = vrot.lane.b32.xlu1 %v3170_v54, %s2904_s18  ;;  %522 = vrot.lane.b32.xlu0 %v3088_v41, %s2905_s19 }
  0x88   : > { %v3179_v58 = vpop.permute.xlu1 %634  ;;  %v507_v59 = vpop.permute.xlu0 %506 }
  0x89   : > { %v1498_v39 = vsel %vm1496_vm0, %v183_v30, %v507_v59  ;;  %v184_v30 = vld [vmem:[%s2947_s17 + $0x18] sm:$0xff] }
  0x8a   : > { %1156 = vrot.lane.b32.xlu1 %v2523_v42, %s2909_s8  ;;  %1030 = vrot.lane.b32.xlu0 %v3177_v57, %s2908_s22 }
  0x8c   : > { %v3187_v61 = vpop.permute.xlu1 %762  ;;  %v761_v62 = vpop.permute.xlu0 %760 }
  0x8e   : > { %776 = vrot.lane.b32.xlu1 %v2984_v8, %s2906_s20  ;;  %650 = vrot.lane.b32.xlu0 %v3185_v60, %s2904_s18  ;;  %v3203_v8 = vld [vmem:[%s2947_s17 + $0xac] sm:$0xff] }
  0x90   : > { %v3193_v63 = vpop.permute.xlu1 %508  ;;  %v889_v4 = vpop.permute.xlu0 %888 }
  0x92   : > { %1284 = vrot.lane.b32.xlu1 %v3103_v44, %s2910_s15  ;;  %1158 = vrot.lane.b32.xlu0 %v2524_v45, %s2909_s8 }
  0x94   : > { %v1017_v5 = vpop.permute.xlu1 %1016  ;;  %v891_v7 = vpop.permute.xlu0 %890 }
  0x96   : > { %904 = vrot.lane.b32.xlu1 %v3117_v47, %s2907_s21  ;;  %778 = vrot.lane.b32.xlu0 %v3017_v19, %s2906_s20  ;;  %v182_v19 = vld [vmem:[%s2947_s17] sm:$0xff] }
  0x97   : > { %v1497_v21 = vsel %vm1496_vm0, %v182_v19, %v505_v56 }
  0x98   : > { %v3205_v9 = vpop.permute.xlu1 %636  ;;  %v3207_v12 = vpop.permute.xlu0 %510  ;;  %v1530_v25 = vsel %vm1529_vm1, %v1497_v21, %v633_v55 }
  0x99   : > { %v1563_v27 = vsel %vm1562_vm2, %v1530_v25, %v761_v62 }
  0x9a   : > { %1412 = vrot.lane.b32.xlu1 %v3203_v8, %s2911_s24  ;;  %1286 = vrot.lane.b32.xlu0 %v3114_v46, %s2910_s15  ;;  %v1596_v31 = vsel %vm1595_vm3, %v1563_v27, %v889_v4 }
  0x9b   : > { %v1629_v32 = vsel %vm1628_vm4, %v1596_v31, %v1017_v5  ;;  %v3319_v31 = vld [vmem:[%s2947_s17 + $0xf0] sm:$0xff] }
  0x9c   : > { %v1145_v13 = vpop.permute.xlu1 %1144  ;;  %v1019_v14 = vpop.permute.xlu0 %1018 }
  0x9d   : > { %v1662_v34 = vsel %vm1661_vm5, %v1629_v32, %v1145_v13 }
  0x9e   : > { %906 = vrot.lane.b32.xlu1 %v3131_v49, %s2907_s21  ;;  %524 = vrot.lane.b32.xlu0 %v3124_v48, %s2905_s19 }
  0xa0   : > { %v3223_v17 = vpop.permute.xlu1 %764  ;;  %v3225_v18 = vpop.permute.xlu0 %638 }
  0xa2   : > { %1414 = vrot.lane.b32.xlu1 %v3218_v15, %s2911_s24  ;;  %1032 = vrot.lane.b32.xlu0 %v3221_v16, %s2908_s22 }
  0xa4   : > { %v1273_v22 = vpop.permute.xlu1 %1272  ;;  %v1147_v23 = vpop.permute.xlu0 %1146 }
  0xa5   : > { %v1695_v42 = vsel %vm1694_vm6, %v1662_v34, %v1273_v22  ;;  %v1499_v34 = vsel %vm1496_vm0, %v184_v30, %v3193_v63 }
  0xa6   : > { %652 = vrot.lane.b32.xlu1 %v3233_v20, %s2904_s18  ;;  %526 = vrot.lane.b32.xlu0 %v3137_v50, %s2905_s19 }
  0xa8   : > { %v3245_v28 = vpop.permute.xlu1 %892  ;;  %v3247_v29 = vpop.permute.xlu0 %766 }
  0xaa   : > { %1160 = vrot.lane.b32.xlu1 %v3053_v33, %s2909_s8  ;;  %1034 = vrot.lane.b32.xlu0 %v3242_v26, %s2908_s22  ;;  %v1531_v33 = vsel %vm1529_vm1, %v1498_v39, %v3179_v58  ;;  %v1532_v39 = vsel %vm1529_vm1, %v1499_v34, %v3205_v9  ;;  %v3396_v34 = vld [vmem:[%s2947_s17 + $0xf2] sm:$0xff] }
  0xab   : > { %v1564_v56 = vsel %vm1562_vm2, %v1531_v33, %v3187_v61 }
  0xac   : > { %v1401_v43 = vpop.permute.xlu1 %1400  ;;  %v1275_v45 = vpop.permute.xlu0 %1274  ;;  %v1597_v4 = vsel %vm1595_vm3, %v1564_v56, %v891_v7  ;;  %v3346_v56 = vld [vmem:[%s2947_s17 + $0xf8] sm:$0xff] }
  0xad   : > { %v1728_v55 = vsel %vm1727_vm7, %v1695_v42, %v1401_v43  ;;  %v1630_v5 = vsel %vm1628_vm4, %v1597_v4, %v1019_v14  ;;  %v3330_v42 = vld [vmem:[%s2947_s17 + $0xe2] sm:$0xff]  ;;  %v1565_v43 = vsel %vm1562_vm2, %v1532_v39, %v3223_v17 }
  0xae   : > { %780 = vrot.lane.b32.xlu1 %v3067_v37, %s2906_s20  ;;  %654 = vrot.lane.b32.xlu0 %v3258_v35, %s2904_s18  ;;  %v1663_v37 = vsel %vm1661_vm5, %v1630_v5, %v1147_v23  ;;  %v3307_v23 = vld [vmem:[%s2947_s17 + $0xda] sm:$0xff]  ;;  %v1598_v63 = vsel %vm1595_vm3, %v1565_v43, %v3245_v28 }
  0xaf   : > { %2749 = vmatprep.mubr.msk.f32.mxu0 %vm1769_vm8, %v1728_v55  ;;  %v1696_v58 = vsel %vm1694_vm6, %v1663_v37, %v1275_v45 }
  0xb0   : > { %v895_v59 = vpop.permute.xlu1 %894  ;;  %v3272_v62 = vpop.permute.xlu0 %512 }
  0xb2   : > { %1288 = vrot.lane.b32.xlu1 %v3149_v51, %s2910_s15  ;;  %1162 = vrot.lane.b32.xlu0 %v3064_v36, %s2909_s8  ;;  %v3289_v36 = vld [vmem:[%s2947_s17 + $0xc4] sm:$0xff] }
  0xb4   : > { %v1403_v13 = vpop.permute.xlu1 %1402  ;;  %v1021_v61 = vpop.permute.xlu0 %1020 }
  0xb5   : > { %v1729_v19 = vsel %vm1727_vm7, %v1696_v58, %v1403_v13  ;;  %v1631_v33 = vsel %vm1628_vm4, %v1598_v63, %v1021_v61  ;;  %v3407_v63 = vld [vmem:[%s2947_s17 + $0x108] sm:$0xff] }
  0xb6   : > { %908 = vrot.lane.b32.xlu1 %v3163_v53, %s2907_s21  ;;  %782 = vrot.lane.b32.xlu0 %v3082_v40, %s2906_s20  ;;  %v3304_v40 = vld [vmem:[%s2947_s17 + $0xcc] sm:$0xff] }
  0xb7   : > { %2750 = vmatmul.mubr.msk.f32.vlgmr.msra.gmra.mrb[0].mxu0 %vm1769_vm8, %v1729_v19 }
  0xb8   : > { %v3291_v7 = vpop.permute.xlu1 %640  ;;  %v3293_v14 = vpop.permute.xlu0 %514 }
  0xba   : > { %1416 = vrot.lane.b32.xlu1 %v3289_v36, %s2911_s24  ;;  %1290 = vrot.lane.b32.xlu0 %v3160_v52, %s2910_s15 }
  0xbc   : > { %v1149_v21 = vpop.permute.xlu1 %1148  ;;  %v1023_v22 = vpop.permute.xlu0 %1022 }
  0xbd   : > { %v1664_v9 = vsel %vm1661_vm5, %v1631_v33, %v1149_v21 }
  0xbe   : > { %910 = vrot.lane.b32.xlu1 %v3177_v57, %s2907_s21  ;;  %528 = vrot.lane.b32.xlu0 %v3170_v54, %s2905_s19 }
  0xc0   : > { %v3309_v25 = vpop.permute.xlu1 %768  ;;  %v3311_v27 = vpop.permute.xlu0 %642 }
  0xc2   : > { %1418 = vrot.lane.b32.xlu1 %v3304_v40, %s2911_s24  ;;  %1036 = vrot.lane.b32.xlu0 %v3307_v23, %s2908_s22 }
  0xc4   : > { %v1277_v32 = vpop.permute.xlu1 %1276  ;;  %v1151_v54 = vpop.permute.xlu0 %1150 }
  0xc5   : > { %v1697_v17 = vsel %vm1694_vm6, %v1664_v9, %v1277_v32 }
  0xc6   : > { %656 = vrot.lane.b32.xlu1 %v3319_v31, %s2904_s18  ;;  %530 = vrot.lane.b32.xlu0 %v3185_v60, %s2905_s19  ;;  %v185_v60 = vld [vmem:[%s2947_s17 + $0x20] sm:$0xff] }
  0xc7   : > { %v1500_v28 = vsel %vm1496_vm0, %v185_v60, %v3207_v12 }
  0xc8   : > { %v897_v45 = vpop.permute.xlu1 %896  ;;  %v3334_v55 = vpop.permute.xlu0 %770 }
  0xca   : > { %1164 = vrot.lane.b32.xlu1 %v3103_v44, %s2909_s8  ;;  %1038 = vrot.lane.b32.xlu0 %v3330_v42, %s2908_s22  ;;  %v1533_v44 = vsel %vm1529_vm1, %v1500_v28, %v3225_v18 }
  0xcb   : > { %v1566_v58 = vsel %vm1562_vm2, %v1533_v44, %v3247_v29 }
  0xcc   : > { %v1405_v4 = vpop.permute.xlu1 %1404  ;;  %v1279_v5 = vpop.permute.xlu0 %1278  ;;  %v1599_v12 = vsel %vm1595_vm3, %v1566_v58, %v895_v59 }
  0xcd   : > { %v1730_v37 = vsel %vm1727_vm7, %v1697_v17, %v1405_v4  ;;  %v1632_v19 = vsel %vm1628_vm4, %v1599_v12, %v1023_v22  ;;  %v3419_v17 = vld [vmem:[%s2947_s17 + $0xfa] sm:$0xff] }
  0xce   : > { %784 = vrot.lane.b32.xlu1 %v3117_v47, %s2906_s20  ;;  %658 = vrot.lane.b32.xlu0 %v3346_v56, %s2904_s18  ;;  %v1665_v47 = vsel %vm1661_vm5, %v1632_v19, %v1151_v54 }
  0xcf   : > { %2752 = vmatprep.mubr.msk.f32.mxu0 %vm1769_vm8, %v1730_v37  ;;  %v1698_v18 = vsel %vm1694_vm6, %v1665_v47, %v1279_v5 }
  0xd0   : > { %v899_v13 = vpop.permute.xlu1 %898  ;;  %v3361_v61 = vpop.permute.xlu0 %516 }
  0xd2   : > { %1292 = vrot.lane.b32.xlu1 %v3203_v8, %s2910_s15  ;;  %1166 = vrot.lane.b32.xlu0 %v3114_v46, %s2909_s8  ;;  %v3378_v46 = vld [vmem:[%s2947_s17 + $0xdc] sm:$0xff] }
  0xd4   : > { %v1407_v21 = vpop.permute.xlu1 %1406  ;;  %v1025_v29 = vpop.permute.xlu0 %1024 }
  0xd5   : > { %v1731_v30 = vsel %vm1727_vm7, %v1698_v18, %v1407_v21 }
  0xd6   : > { %912 = vrot.lane.b32.xlu1 %v3221_v16, %s2907_s21  ;;  %786 = vrot.lane.b32.xlu0 %v3131_v49, %s2906_s20  ;;  %v3393_v49 = vld [vmem:[%s2947_s17 + $0xe4] sm:$0xff] }
  0xd7   : > { %2753 = vmatmul.mubr.msk.f32.gmra.mrb[2].mxu0 %vm1769_vm8, %v1731_v30 }
  0xd8   : > { %v3380_v59 = vpop.permute.xlu1 %644  ;;  %v3382_v22 = vpop.permute.xlu0 %518 }
  0xda   : > { %1420 = vrot.lane.b32.xlu1 %v3378_v46, %s2911_s24  ;;  %1294 = vrot.lane.b32.xlu0 %v3218_v15, %s2910_s15 }
  0xdc   : > { %v1153_v32 = vpop.permute.xlu1 %1152  ;;  %v1027_v54 = vpop.permute.xlu0 %1026 }
  0xde   : > { %914 = vrot.lane.b32.xlu1 %v3242_v26, %s2907_s21  ;;  %532 = vrot.lane.b32.xlu0 %v3233_v20, %s2905_s19  ;;  %v1501_v20 = vsel %vm1496_vm0, %v2953_v1, %v3272_v62  ;;  %v3433_v62 = vld [vmem:[%s2947_s17 + $0x110] sm:$0xff] }
  0xdf   : > { %v1534_v9 = vsel %vm1529_vm1, %v1501_v20, %v3291_v7  ;;  %v3495_v20 = vld [vmem:[%s2947_s17 + $0x120] sm:$0xff] }
  0xe0   : > { %v3398_v39 = vpop.permute.xlu1 %772  ;;  %v3400_v43 = vpop.permute.xlu0 %646  ;;  %v1567_v4 = vsel %vm1562_vm2, %v1534_v9, %v3309_v25 }
  0xe1   : > { %v1600_v28 = vsel %vm1595_vm3, %v1567_v4, %v897_v45  ;;  %v1502_v45 = vsel %vm1496_vm0, %v2963_v3, %v3293_v14 }
  0xe2   : > { %1422 = vrot.lane.b32.xlu1 %v3393_v49, %s2911_s24  ;;  %1040 = vrot.lane.b32.xlu0 %v3396_v34, %s2908_s22  ;;  %v1633_v1 = vsel %vm1628_vm4, %v1600_v28, %v1025_v29 }
  0xe4   : > { %v1281_v33 = vpop.permute.xlu1 %1280  ;;  %v1155_v60 = vpop.permute.xlu0 %1154 }
  0xe6   : > { %660 = vrot.lane.b32.xlu1 %v3407_v63, %s2904_s18  ;;  %534 = vrot.lane.b32.xlu0 %v3258_v35, %s2905_s19  ;;  %v1666_v35 = vsel %vm1661_vm5, %v1633_v1, %v1153_v32  ;;  %v3507_v1 = vld [vmem:[%s2947_s17 + $0x112] sm:$0xff] }
  0xe7   : > { %v1699_v7 = vsel %vm1694_vm6, %v1666_v35, %v1281_v33 }
  0xe8   : > { %v901_v5 = vpop.permute.xlu1 %900  ;;  %v3423_v37 = vpop.permute.xlu0 %774 }
  0xea   : > { %1168 = vrot.lane.b32.xlu1 %v3149_v51, %s2909_s8  ;;  %1042 = vrot.lane.b32.xlu0 %v3419_v17, %s2908_s22  ;;  %v1535_v51 = vsel %vm1529_vm1, %v1502_v45, %v3311_v27 }
  0xeb   : > { %v1568_v12 = vsel %vm1562_vm2, %v1535_v51, %v3334_v55 }
  0xec   : > { %v1409_v25 = vpop.permute.xlu1 %1408  ;;  %v1283_v44 = vpop.permute.xlu0 %1282  ;;  %v1601_v3 = vsel %vm1595_vm3, %v1568_v12, %v899_v13 }
  0xed   : > { %v1732_v58 = vsel %vm1727_vm7, %v1699_v7, %v1409_v25  ;;  %v1634_v14 = vsel %vm1628_vm4, %v1601_v3, %v1027_v54  ;;  %v3484_v54 = vld [vmem:[%s2947_s17 + $0x10a] sm:$0xff] }
  0xee   : > { %788 = vrot.lane.b32.xlu1 %v3163_v53, %s2906_s20  ;;  %662 = vrot.lane.b32.xlu0 %v3433_v62, %s2904_s18  ;;  %v1667_v53 = vsel %vm1661_vm5, %v1634_v14, %v1155_v60 }
  0xef   : > { %2755 = vmatprep.mubr.msk.f32.mxu0 %vm1769_vm8, %v1732_v58  ;;  %v1700_v27 = vsel %vm1694_vm6, %v1667_v53, %v1283_v44 }
  0xf0   : > { %v903_v19 = vpop.permute.xlu1 %902  ;;  %v3449_v47 = vpop.permute.xlu0 %520 }
  0xf2   : > { %1296 = vrot.lane.b32.xlu1 %v3289_v36, %s2910_s15  ;;  %1170 = vrot.lane.b32.xlu0 %v3160_v52, %s2909_s8  ;;  %v3466_v52 = vld [vmem:[%s2947_s17 + $0xf4] sm:$0xff] }
  0xf4   : > { %v1411_v18 = vpop.permute.xlu1 %1410  ;;  %v1029_v55 = vpop.permute.xlu0 %1028 }
  0xf5   : > { %v1733_v21 = vsel %vm1727_vm7, %v1700_v27, %v1411_v18 }
  0xf6   : > { %916 = vrot.lane.b32.xlu1 %v3307_v23, %s2907_s21  ;;  %790 = vrot.lane.b32.xlu0 %v3177_v57, %s2906_s20  ;;  %v3481_v57 = vld [vmem:[%s2947_s17 + $0xfc] sm:$0xff] }
  0xf7   : > { %2756 = vmatmul.mubr.msk.f32.gmra.mrb[4].mxu0 %vm1769_vm8, %v1733_v21  ;;  %v3572_v21 = vld [vmem:[%s2947_s17 + $0x122] sm:$0xff] }
  0xf8   : > { %v3468_v13 = vpop.permute.xlu1 %648  ;;  %v3470_v29 = vpop.permute.xlu0 %522 }
  0xfa   : > { %1424 = vrot.lane.b32.xlu1 %v3466_v52, %s2911_s24  ;;  %1298 = vrot.lane.b32.xlu0 %v3304_v40, %s2910_s15 }
  0xfc   : > { %v1157_v30 = vpop.permute.xlu1 %1156  ;;  %v1031_v32 = vpop.permute.xlu0 %1030 }
  0xfe   : > { %918 = vrot.lane.b32.xlu1 %v3330_v42, %s2907_s21  ;;  %536 = vrot.lane.b32.xlu0 %v3319_v31, %s2905_s19  ;;  %v1503_v31 = vsel %vm1496_vm0, %v2974_v6, %v3361_v61  ;;  %v3521_v61 = vld [vmem:[%s2947_s17 + $0x128] sm:$0xff] }
  0xff   : > { %v1536_v28 = vsel %vm1529_vm1, %v1503_v31, %v3380_v59 }
 0x100   : > { %v3486_v33 = vpop.permute.xlu1 %776  ;;  %v3488_v60 = vpop.permute.xlu0 %650  ;;  %v1569_v35 = vsel %vm1562_vm2, %v1536_v28, %v3398_v39 }
 0x101   : > { %v1602_v44 = vsel %vm1595_vm3, %v1569_v35, %v901_v5  ;;  %v1504_v5 = vsel %vm1496_vm0, %v2997_v11, %v3382_v22  ;;  %v3595_v35 = vld [vmem:[%s2947_s17 + $0x12a] sm:$0xff] }
 0x102   : > { %1426 = vrot.lane.b32.xlu1 %v3481_v57, %s2911_s24  ;;  %1044 = vrot.lane.b32.xlu0 %v3484_v54, %s2908_s22  ;;  %v1635_v6 = vsel %vm1628_vm4, %v1602_v44, %v1029_v55 }
 0x104   : > { %v1285_v9 = vpop.permute.xlu1 %1284  ;;  %v1159_v4 = vpop.permute.xlu0 %1158 }
 0x106   : > { %664 = vrot.lane.b32.xlu1 %v3495_v20, %s2904_s18  ;;  %538 = vrot.lane.b32.xlu0 %v3346_v56, %s2905_s19  ;;  %v1668_v56 = vsel %vm1661_vm5, %v1635_v6, %v1157_v30 }
 0x107   : > { %v1701_v59 = vsel %vm1694_vm6, %v1668_v56, %v1285_v9  ;;  %v3583_v9 = vld [vmem:[%s2947_s17 + $0x138] sm:$0xff] }
 0x108   : > { %v905_v7 = vpop.permute.xlu1 %904  ;;  %v3511_v25 = vpop.permute.xlu0 %778 }
 0x10a   : > { %1172 = vrot.lane.b32.xlu1 %v3203_v8, %s2909_s8  ;;  %1046 = vrot.lane.b32.xlu0 %v3507_v1, %s2908_s22  ;;  %v1537_v8 = vsel %vm1529_vm1, %v1504_v5, %v3400_v43 }
 0x10b   : > { %v1570_v51 = vsel %vm1562_vm2, %v1537_v8, %v3423_v37 }
 0x10c   : > { %v1413_v39 = vpop.permute.xlu1 %1412  ;;  %v1287_v58 = vpop.permute.xlu0 %1286  ;;  %v1603_v11 = vsel %vm1595_vm3, %v1570_v51, %v903_v19 }
 0x10d   : > { %v1734_v45 = vsel %vm1727_vm7, %v1701_v59, %v1413_v39  ;;  %v1636_v22 = vsel %vm1628_vm4, %v1603_v11, %v1031_v32 }
 0x10e   : > { %792 = vrot.lane.b32.xlu1 %v3221_v16, %s2906_s20  ;;  %666 = vrot.lane.b32.xlu0 %v3521_v61, %s2904_s18  ;;  %v1669_v16 = vsel %vm1661_vm5, %v1636_v22, %v1159_v4 }
 0x10f   : > { %2758 = vmatprep.mubr.msk.f32.mxu0 %vm1769_vm8, %v1734_v45  ;;  %v1702_v43 = vsel %vm1694_vm6, %v1669_v16, %v1287_v58 }
 0x110   : > { %v907_v12 = vpop.permute.xlu1 %906  ;;  %v3537_v3 = vpop.permute.xlu0 %524 }
 0x112   : > { %1300 = vrot.lane.b32.xlu1 %v3378_v46, %s2910_s15  ;;  %1174 = vrot.lane.b32.xlu0 %v3218_v15, %s2909_s8  ;;  %v3554_v15 = vld [vmem:[%s2947_s17 + $0x10c] sm:$0xff] }
 0x114   : > { %v1415_v14 = vpop.permute.xlu1 %1414  ;;  %v1033_v37 = vpop.permute.xlu0 %1032 }
 0x115   : > { %v1735_v53 = vsel %vm1727_vm7, %v1702_v43, %v1415_v14  ;;  %v3660_v14 = vld [vmem:[%s2947_s17 + $0x13a] sm:$0xff] }
 0x116   : > { %920 = vrot.lane.b32.xlu1 %v3396_v34, %s2907_s21  ;;  %794 = vrot.lane.b32.xlu0 %v3242_v26, %s2906_s20  ;;  %v3569_v26 = vld [vmem:[%s2947_s17 + $0x114] sm:$0xff] }
 0x117   : > { %2759 = vmatmul.mubr.msk.f32.gmra.mrb[6].mxu0 %vm1769_vm8, %v1735_v53 }
 0x118   : > { %v3556_v19 = vpop.permute.xlu1 %652  ;;  %v3558_v27 = vpop.permute.xlu0 %526 }
 0x11a   : > { %1428 = vrot.lane.b32.xlu1 %v3554_v15, %s2911_s24  ;;  %1302 = vrot.lane.b32.xlu0 %v3393_v49, %s2910_s15 }
 0x11c   : > { %v1161_v18 = vpop.permute.xlu1 %1160  ;;  %v1035_v55 = vpop.permute.xlu0 %1034 }
 0x11e   : > { %922 = vrot.lane.b32.xlu1 %v3419_v17, %s2907_s21  ;;  %540 = vrot.lane.b32.xlu0 %v3407_v63, %s2905_s19  ;;  %v1505_v63 = vsel %vm1496_vm0, %v2950_v0, %v3449_v47  ;;  %v3609_v47 = vld [vmem:[%s2947_s17 + $0x140] sm:$0xff] }
 0x11f   : > { %v1538_v28 = vsel %vm1529_vm1, %v1505_v63, %v3468_v13  ;;  %v3683_v63 = vld [vmem:[%s2947_s17 + $0x142] sm:$0xff] }
 0x120   : > { %v3574_v30 = vpop.permute.xlu1 %780  ;;  %v3576_v32 = vpop.permute.xlu0 %654  ;;  %v1571_v44 = vsel %vm1562_vm2, %v1538_v28, %v3486_v33 }
 0x121   : > { %v1604_v59 = vsel %vm1595_vm3, %v1571_v44, %v905_v7  ;;  %v1506_v7 = vsel %vm1496_vm0, %v2960_v2, %v3470_v29 }
 0x122   : > { %1430 = vrot.lane.b32.xlu1 %v3569_v26, %s2911_s24  ;;  %1048 = vrot.lane.b32.xlu0 %v3572_v21, %s2908_s22  ;;  %v1637_v0 = vsel %vm1628_vm4, %v1604_v59, %v1033_v37 }
 0x124   : > { %v1289_v4 = vpop.permute.xlu1 %1288  ;;  %v1163_v31 = vpop.permute.xlu0 %1162 }
 0x126   : > { %668 = vrot.lane.b32.xlu1 %v3583_v9, %s2904_s18  ;;  %542 = vrot.lane.b32.xlu0 %v3433_v62, %s2905_s19  ;;  %v1670_v62 = vsel %vm1661_vm5, %v1637_v0, %v1161_v18  ;;  %v3671_v18 = vld [vmem:[%s2947_s17 + $0x150] sm:$0xff] }
 0x127   : > { %v1703_v13 = vsel %vm1694_vm6, %v1670_v62, %v1289_v4 }
 0x128   : > { %v909_v6 = vpop.permute.xlu1 %908  ;;  %v3599_v56 = vpop.permute.xlu0 %782 }
 0x12a   : > { %1176 = vrot.lane.b32.xlu1 %v3289_v36, %s2909_s8  ;;  %1050 = vrot.lane.b32.xlu0 %v3595_v35, %s2908_s22  ;;  %v1539_v36 = vsel %vm1529_vm1, %v1506_v7, %v3488_v60 }
 0x12b   : > { %v1572_v45 = vsel %vm1562_vm2, %v1539_v36, %v3511_v25 }
 0x12c   : > { %v1417_v33 = vpop.permute.xlu1 %1416  ;;  %v1291_v39 = vpop.permute.xlu0 %1290  ;;  %v1605_v2 = vsel %vm1595_vm3, %v1572_v45, %v907_v12 }
 0x12d   : > { %v1736_v58 = vsel %vm1727_vm7, %v1703_v13, %v1417_v33  ;;  %v1638_v29 = vsel %vm1628_vm4, %v1605_v2, %v1035_v55 }
 0x12e   : > { %796 = vrot.lane.b32.xlu1 %v3307_v23, %s2906_s20  ;;  %670 = vrot.lane.b32.xlu0 %v3609_v47, %s2904_s18  ;;  %v1671_v23 = vsel %vm1661_vm5, %v1638_v29, %v1163_v31 }
 0x12f   : > { %2761 = vmatprep.mubr.msk.f32.mxu0 %vm1769_vm8, %v1736_v58  ;;  %v1704_v60 = vsel %vm1694_vm6, %v1671_v23, %v1291_v39  ;;  %v3748_v23 = vld [vmem:[%s2947_s17 + $0x152] sm:$0xff] }
 0x130   : > { %v911_v5 = vpop.permute.xlu1 %910  ;;  %v3625_v8 = vpop.permute.xlu0 %528 }
 0x132   : > { %1304 = vrot.lane.b32.xlu1 %v3466_v52, %s2910_s15  ;;  %1178 = vrot.lane.b32.xlu0 %v3304_v40, %s2909_s8  ;;  %v3642_v40 = vld [vmem:[%s2947_s17 + $0x124] sm:$0xff] }
 0x134   : > { %v1419_v51 = vpop.permute.xlu1 %1418  ;;  %v1037_v25 = vpop.permute.xlu0 %1036 }
 0x135   : > { %v1737_v11 = vsel %vm1727_vm7, %v1704_v60, %v1419_v51 }
 0x136   : > { %924 = vrot.lane.b32.xlu1 %v3484_v54, %s2907_s21  ;;  %798 = vrot.lane.b32.xlu0 %v3330_v42, %s2906_s20  ;;  %v3657_v42 = vld [vmem:[%s2947_s17 + $0x12c] sm:$0xff] }
 0x137   : > { %2762 = vmatmul.mubr.msk.f32.gmra.mrb[8].mxu0 %vm1769_vm8, %v1737_v11 }
 0x138   : > { %v3644_v12 = vpop.permute.xlu1 %656  ;;  %v3646_v22 = vpop.permute.xlu0 %530 }
 0x13a   : > { %1432 = vrot.lane.b32.xlu1 %v3642_v40, %s2911_s24  ;;  %1306 = vrot.lane.b32.xlu0 %v3481_v57, %s2910_s15 }
 0x13c   : > { %v1165_v16 = vpop.permute.xlu1 %1164  ;;  %v1039_v43 = vpop.permute.xlu0 %1038 }
 0x13e   : > { %926 = vrot.lane.b32.xlu1 %v3507_v1, %s2907_s21  ;;  %544 = vrot.lane.b32.xlu0 %v3495_v20, %s2905_s19  ;;  %v1507_v20 = vsel %vm1496_vm0, %v2994_v10, %v3537_v3  ;;  %v3697_v3 = vld [vmem:[%s2947_s17 + $0x158] sm:$0xff] }
 0x13f   : > { %v1540_v31 = vsel %vm1529_vm1, %v1507_v20, %v3556_v19 }
 0x140   : > { %v3662_v37 = vpop.permute.xlu1 %784  ;;  %v3664_v53 = vpop.permute.xlu0 %658  ;;  %v1573_v28 = vsel %vm1562_vm2, %v1540_v31, %v3574_v30 }
 0x141   : > { %v1606_v0 = vsel %vm1595_vm3, %v1573_v28, %v909_v6  ;;  %v1508_v6 = vsel %vm1496_vm0, %v3030_v24, %v3558_v27 }
 0x142   : > { %1434 = vrot.lane.b32.xlu1 %v3657_v42, %s2911_s24  ;;  %1052 = vrot.lane.b32.xlu0 %v3660_v14, %s2908_s22  ;;  %v1639_v10 = vsel %vm1628_vm4, %v1606_v0, %v1037_v25  ;;  %v3759_v25 = vld [vmem:[%s2947_s17 + $0x168] sm:$0xff] }
 0x144   : > { %v1293_v55 = vpop.permute.xlu1 %1292  ;;  %v1167_v4 = vpop.permute.xlu0 %1166 }
 0x146   : > { %672 = vrot.lane.b32.xlu1 %v3671_v18, %s2904_s18  ;;  %546 = vrot.lane.b32.xlu0 %v3521_v61, %s2905_s19  ;;  %v1672_v61 = vsel %vm1661_vm5, %v1639_v10, %v1165_v16 }
 0x147   : > { %v1705_v19 = vsel %vm1694_vm6, %v1672_v61, %v1293_v55  ;;  %v3771_v55 = vld [vmem:[%s2947_s17 + $0x15a] sm:$0xff] }
 0x148   : > { %v913_v44 = vpop.permute.xlu1 %912  ;;  %v3687_v59 = vpop.permute.xlu0 %786 }
 0x14a   : > { %1180 = vrot.lane.b32.xlu1 %v3378_v46, %s2909_s8  ;;  %1054 = vrot.lane.b32.xlu0 %v3683_v63, %s2908_s22  ;;  %v1541_v46 = vsel %vm1529_vm1, %v1508_v6, %v3576_v32 }
 0x14b   : > { %v1574_v33 = vsel %vm1562_vm2, %v1541_v46, %v3599_v56 }
 0x14c   : > { %v1421_v30 = vpop.permute.xlu1 %1420  ;;  %v1295_v62 = vpop.permute.xlu0 %1294  ;;  %v1607_v24 = vsel %vm1595_vm3, %v1574_v33, %v911_v5 }
 0x14d   : > { %v1738_v13 = vsel %vm1727_vm7, %v1705_v19, %v1421_v30  ;;  %v1640_v27 = vsel %vm1628_vm4, %v1607_v24, %v1039_v43  ;;  %v3838_v24 = vld [vmem:[%s2947_s17 + $0x16a] sm:$0xff] }
 0x14e   : > { %800 = vrot.lane.b32.xlu1 %v3396_v34, %s2906_s20  ;;  %674 = vrot.lane.b32.xlu0 %v3697_v3, %s2904_s18  ;;  %v1673_v34 = vsel %vm1661_vm5, %v1640_v27, %v1167_v4 }
 0x14f   : > { %2764 = vmatprep.mubr.msk.f32.mxu0 %vm1769_vm8, %v1738_v13  ;;  %v1706_v32 = vsel %vm1694_vm6, %v1673_v34, %v1295_v62 }
 0x150   : > { %v915_v39 = vpop.permute.xlu1 %914  ;;  %v3713_v58 = vpop.permute.xlu0 %532 }
 0x152   : > { %1308 = vrot.lane.b32.xlu1 %v3554_v15, %s2910_s15  ;;  %1182 = vrot.lane.b32.xlu0 %v3393_v49, %s2909_s8  ;;  %v3730_v49 = vld [vmem:[%s2947_s17 + $0x13c] sm:$0xff] }
 0x154   : > { %v1423_v7 = vpop.permute.xlu1 %1422  ;;  %v1041_v56 = vpop.permute.xlu0 %1040 }
 0x155   : > { %v1739_v36 = vsel %vm1727_vm7, %v1706_v32, %v1423_v7  ;;  %v3849_v32 = vld [vmem:[%s2947_s17 + $0x180] sm:$0xff] }
 0x156   : > { %928 = vrot.lane.b32.xlu1 %v3572_v21, %s2907_s21  ;;  %802 = vrot.lane.b32.xlu0 %v3419_v17, %s2906_s20  ;;  %v3745_v17 = vld [vmem:[%s2947_s17 + $0x144] sm:$0xff] }
 0x157   : > { %2765 = vmatmul.mubr.msk.f32.gmra.mrb[10].mxu0 %vm1769_vm8, %v1739_v36 }
 0x158   : > { %v3732_v45 = vpop.permute.xlu1 %660  ;;  %v3734_v5 = vpop.permute.xlu0 %534 }
 0x15a   : > { %1436 = vrot.lane.b32.xlu1 %v3730_v49, %s2911_s24  ;;  %1310 = vrot.lane.b32.xlu0 %v3569_v26, %s2910_s15 }
 0x15c   : > { %v1169_v2 = vpop.permute.xlu1 %1168  ;;  %v1043_v29 = vpop.permute.xlu0 %1042 }
 0x15e   : > { %930 = vrot.lane.b32.xlu1 %v3595_v35, %s2907_s21  ;;  %548 = vrot.lane.b32.xlu0 %v3583_v9, %s2905_s19  ;;  %v1509_v9 = vsel %vm1496_vm0, %v3074_v38, %v3625_v8  ;;  %v3785_v8 = vld [vmem:[%s2947_s17 + $0x170] sm:$0xff] }
 0x15f   : > { %v1542_v43 = vsel %vm1529_vm1, %v1509_v9, %v3644_v12 }
 0x160   : > { %v3750_v60 = vpop.permute.xlu1 %788  ;;  %v3752_v51 = vpop.permute.xlu0 %662  ;;  %v1575_v4 = vsel %vm1562_vm2, %v1542_v43, %v3662_v37  ;;  %v3894_v43 = vld [vmem:[%s2947_s17 + $0x188] sm:$0xff] }
 0x161   : > { %v1608_v28 = vsel %vm1595_vm3, %v1575_v4, %v913_v44  ;;  %v1510_v44 = vsel %vm1496_vm0, %v3088_v41, %v3646_v22 }
 0x162   : > { %1438 = vrot.lane.b32.xlu1 %v3745_v17, %s2911_s24  ;;  %1056 = vrot.lane.b32.xlu0 %v3748_v23, %s2908_s22  ;;  %v1641_v38 = vsel %vm1628_vm4, %v1608_v28, %v1041_v56 }
 0x164   : > { %v1297_v11 = vpop.permute.xlu1 %1296  ;;  %v1171_v16 = vpop.permute.xlu0 %1170 }
 0x166   : > { %676 = vrot.lane.b32.xlu1 %v3759_v25, %s2904_s18  ;;  %550 = vrot.lane.b32.xlu0 %v3609_v47, %s2905_s19  ;;  %v1674_v47 = vsel %vm1661_vm5, %v1641_v38, %v1169_v2  ;;  %v3862_v2 = vld [vmem:[%s2947_s17 + $0x172] sm:$0xff] }
 0x167   : > { %v1707_v12 = vsel %vm1694_vm6, %v1674_v47, %v1297_v11 }
 0x168   : > { %v917_v20 = vpop.permute.xlu1 %916  ;;  %v3775_v31 = vpop.permute.xlu0 %790 }
 0x16a   : > { %1184 = vrot.lane.b32.xlu1 %v3466_v52, %s2909_s8  ;;  %1058 = vrot.lane.b32.xlu0 %v3771_v55, %s2908_s22  ;;  %v1543_v52 = vsel %vm1529_vm1, %v1510_v44, %v3664_v53 }
 0x16b   : > { %v1576_v61 = vsel %vm1562_vm2, %v1543_v52, %v3687_v59 }
 0x16c   : > { %v1425_v37 = vpop.permute.xlu1 %1424  ;;  %v1299_v0 = vpop.permute.xlu0 %1298  ;;  %v1609_v41 = vsel %vm1595_vm3, %v1576_v61, %v915_v39 }
 0x16d   : > { %v1740_v10 = vsel %vm1727_vm7, %v1707_v12, %v1425_v37  ;;  %v1512_v12 = vsel %vm1496_vm0, %v3137_v50, %v3734_v5 }
 0x16e   : > { %804 = vrot.lane.b32.xlu1 %v3484_v54, %s2906_s20  ;;  %678 = vrot.lane.b32.xlu0 %v3785_v8, %s2904_s18  ;;  %v1642_v54 = vsel %vm1628_vm4, %v1609_v41, %v1043_v29 }
 0x16f   : > { %2767 = vmatprep.mubr.msk.f32.mxu0 %vm1769_vm8, %v1740_v10  ;;  %v1675_v22 = vsel %vm1661_vm5, %v1642_v54, %v1171_v16 }
 0x170   : > { %v3801_v19 = vpop.permute.xlu1 %918  ;;  %v3803_v30 = vpop.permute.xlu0 %536  ;;  %v1708_v53 = vsel %vm1694_vm6, %v1675_v22, %v1299_v0  ;;  %v1545_v0 = vsel %vm1529_vm1, %v1512_v12, %v3752_v51 }
 0x171   : > { %v1578_v10 = vsel %vm1562_vm2, %v1545_v0, %v3775_v31 }
 0x172   : > { %1312 = vrot.lane.b32.xlu1 %v3642_v40, %s2910_s15  ;;  %1186 = vrot.lane.b32.xlu0 %v3481_v57, %s2909_s8  ;;  %v3820_v57 = vld [vmem:[%s2947_s17 + $0x154] sm:$0xff]  ;;  %v1611_v5 = vsel %vm1595_vm3, %v1578_v10, %v3801_v19 }
 0x174   : > { %v1427_v59 = vpop.permute.xlu1 %1426  ;;  %v1045_v62 = vpop.permute.xlu0 %1044 }
 0x175   : > { %v1741_v13 = vsel %vm1727_vm7, %v1708_v53, %v1427_v59  ;;  %v3959_v59 = vld [vmem:[%s2947_s17 + $0x182] sm:$0xff] }
 0x176   : > { %932 = vrot.lane.b32.xlu1 %v3660_v14, %s2907_s21  ;;  %806 = vrot.lane.b32.xlu0 %v3507_v1, %s2906_s20  ;;  %v3835_v1 = vld [vmem:[%s2947_s17 + $0x15c] sm:$0xff] }
 0x177   : > { %2768 = vmatmul.mubr.msk.f32.gmra.mrb[12].mxu0 %vm1769_vm8, %v1741_v13 }
 0x178   : > { %v3822_v6 = vpop.permute.xlu1 %664  ;;  %v3824_v46 = vpop.permute.xlu0 %538 }
 0x17a   : > { %1440 = vrot.lane.b32.xlu1 %v3820_v57, %s2911_s24  ;;  %1314 = vrot.lane.b32.xlu0 %v3657_v42, %s2910_s15 }
 0x17c   : > { %v1173_v33 = vpop.permute.xlu1 %1172  ;;  %v1047_v39 = vpop.permute.xlu0 %1046 }
 0x17e   : > { %934 = vrot.lane.b32.xlu1 %v3683_v63, %s2907_s21  ;;  %552 = vrot.lane.b32.xlu0 %v3671_v18, %s2905_s19  ;;  %v1511_v18 = vsel %vm1496_vm0, %v3124_v48, %v3713_v58 }
 0x17f   : > { %v1544_v36 = vsel %vm1529_vm1, %v1511_v18, %v3732_v45 }
 0x180   : > { %v3840_v27 = vpop.permute.xlu1 %792  ;;  %v3842_v34 = vpop.permute.xlu0 %666  ;;  %v1577_v29 = vsel %vm1562_vm2, %v1544_v36, %v3750_v60 }
 0x181   : > { %v1610_v48 = vsel %vm1595_vm3, %v1577_v29, %v917_v20  ;;  %v3982_v29 = vld [vmem:[%s2947_s17 + $0x18a] sm:$0xff] }
 0x182   : > { %1442 = vrot.lane.b32.xlu1 %v3835_v1, %s2911_s24  ;;  %1060 = vrot.lane.b32.xlu0 %v3838_v24, %s2908_s22 }
 0x184   : > { %v1301_v7 = vpop.permute.xlu1 %1300  ;;  %v1175_v56 = vpop.permute.xlu0 %1174 }
 0x186   : > { %680 = vrot.lane.b32.xlu1 %v3849_v32, %s2904_s18  ;;  %554 = vrot.lane.b32.xlu0 %v3697_v3, %s2905_s19  ;;  %v1643_v3 = vsel %vm1628_vm4, %v1610_v48, %v1045_v62 }
 0x187   : > { %v1676_v45 = vsel %vm1661_vm5, %v1643_v3, %v1173_v33  ;;  %v198_v33 = vld [vmem:[%s2947_s17 + $0xc0] sm:$0xff] }
 0x188   : > { %v3866_v11 = vpop.permute.xlu1 %920  ;;  %v3868_v16 = vpop.permute.xlu0 %794  ;;  %v1709_v4 = vsel %vm1694_vm6, %v1676_v45, %v1301_v7  ;;  %v1513_v18 = vsel %vm1496_vm0, %v198_v33, %v3803_v30 }
 0x189   : > { %v1546_v36 = vsel %vm1529_vm1, %v1513_v18, %v3822_v6  ;;  %v199_v6 = vld [vmem:[%s2947_s17 + $0xc8] sm:$0xff] }
 0x18a   : > { %v3877_v58 = vpop.f32.mrb[0].mxu0  ;;  %1188 = vrot.lane.b32.xlu1 %v3554_v15, %s2909_s8  ;;  %1062 = vrot.lane.b32.xlu0 %v3862_v2, %s2908_s22  ;;  %v1579_v48 = vsel %vm1562_vm2, %v1546_v36, %v3840_v27 }
 0x18b   : > { %v3886_v60 = vmul.f32 %v3877_v58, %v3877_v58  ;;  %2267 = vst.msk [vmem:[%s3873_s28 + $0x8] sm:$0xff] %vm1496_vm0, %v3877_v58  ;;  %v3891_v9 = vpop.f32.mrb[1].mxu0  ;;  %v1612_v45 = vsel %vm1595_vm3, %v1579_v48, %v3866_v11  ;;  %v4075_v48 = vld [vmem:[%s2947_s17 + $0x19a] sm:$0xff] }
 0x18c   : > { %v3899_v15 = vmul.f32 %v3891_v9, %v3891_v9  ;;  %2266 = vst.msk [vmem:[%s3873_s28] sm:$0xff] %vm1496_vm0, %v3891_v9  ;;  %v1429_v20 = vpop.permute.xlu1 %1428  ;;  %v1303_v28 = vpop.permute.xlu0 %1302  ;;  %v2815_v38 = vpack.c.bf16 %v3877_v58, %v3891_v9 }
 0x18d   : > { %v1742_v47 = vsel %vm1727_vm7, %v1709_v4, %v1429_v20 }
 0x18e   : > { %808 = vrot.lane.b32.xlu1 %v3572_v21, %s2906_s20  ;;  %682 = vrot.lane.b32.xlu0 %v3894_v43, %s2904_s18  ;;  %v1644_v21 = vsel %vm1628_vm4, %v1611_v5, %v1047_v39  ;;  %v3971_v39 = vld [vmem:[%s2947_s17 + $0x198] sm:$0xff] }
 0x18f   : > { %2770 = vmatprep.mubr.msk.f32.mxu0 %vm1769_vm8, %v1742_v47  ;;  %v1677_v51 = vsel %vm1661_vm5, %v1644_v21, %v1175_v56  ;;  %v4011_v47 = vld [vmem:[%s2947_s17 + $0x1a0] sm:$0xff] }
 0x190   : > { %v3921_v44 = vpop.permute.xlu1 %922  ;;  %v3923_v50 = vpop.permute.xlu0 %540  ;;  %v1710_v52 = vsel %vm1694_vm6, %v1677_v51, %v1303_v28  ;;  %v1514_v51 = vsel %vm1496_vm0, %v199_v6, %v3824_v46  ;;  %v200_v6 = vld [vmem:[%s2947_s17 + $0xd8] sm:$0xff] }
 0x192   : > { %1316 = vrot.lane.b32.xlu1 %v3730_v49, %s2910_s15  ;;  %1190 = vrot.lane.b32.xlu0 %v3569_v26, %s2909_s8  ;;  %v3941_v26 = vld [vmem:[%s2947_s17 + $0x16c] sm:$0xff] }
 0x194   : > { %v1431_v31 = vpop.permute.xlu1 %1430  ;;  %v1049_v61 = vpop.permute.xlu0 %1048 }
 0x195   : > { %v1743_v41 = vsel %vm1727_vm7, %v1710_v52, %v1431_v31  ;;  %v1645_v4 = vsel %vm1628_vm4, %v1612_v45, %v1049_v61  ;;  %v1547_v31 = vsel %vm1529_vm1, %v1514_v51, %v3842_v34 }
 0x196   : > { %936 = vrot.lane.b32.xlu1 %v3748_v23, %s2907_s21  ;;  %810 = vrot.lane.b32.xlu0 %v3595_v35, %s2906_s20  ;;  %v3956_v35 = vld [vmem:[%s2947_s17 + $0x174] sm:$0xff]  ;;  %v1580_v61 = vsel %vm1562_vm2, %v1547_v31, %v3868_v16 }
 0x197   : > { %2771 = vmatmul.mubr.msk.f32.gmra.mrb[14].mxu0 %vm1769_vm8, %v1743_v41 }
 0x198   : > { %v3943_v19 = vpop.permute.xlu1 %668  ;;  %v3945_v54 = vpop.permute.xlu0 %542 }
 0x19a   : > { %1444 = vrot.lane.b32.xlu1 %v3941_v26, %s2911_s24  ;;  %1318 = vrot.lane.b32.xlu0 %v3745_v17, %s2910_s15 }
 0x19c   : > { %v1177_v22 = vpop.permute.xlu1 %1176  ;;  %v1051_v53 = vpop.permute.xlu0 %1050 }
 0x19d   : > { %v1678_v27 = vsel %vm1661_vm5, %v1645_v4, %v1177_v22  ;;  %v1613_v22 = vsel %vm1595_vm3, %v1580_v61, %v3921_v44 }
 0x19e   : > { %938 = vrot.lane.b32.xlu1 %v3771_v55, %s2907_s21  ;;  %556 = vrot.lane.b32.xlu0 %v3759_v25, %s2905_s19 }
 0x1a0   : > { %v3961_v62 = vpop.permute.xlu1 %796  ;;  %v3963_v13 = vpop.permute.xlu0 %670 }
 0x1a2   : > { %1446 = vrot.lane.b32.xlu1 %v3956_v35, %s2911_s24  ;;  %1064 = vrot.lane.b32.xlu0 %v3959_v59, %s2908_s22 }
 0x1a4   : > { %v1305_v7 = vpop.permute.xlu1 %1304  ;;  %v1179_v56 = vpop.permute.xlu0 %1178 }
 0x1a5   : > { %v1711_v12 = vsel %vm1694_vm6, %v1678_v27, %v1305_v7  ;;  %v2453_v27 = vld [vmem:[%s2947_s17 + $0x1b0] sm:$0xff] }
 0x1a6   : > { %684 = vrot.lane.b32.xlu1 %v3971_v39, %s2904_s18  ;;  %558 = vrot.lane.b32.xlu0 %v3785_v8, %s2905_s19 }
 0x1a8   : > { %v3986_v3 = vpop.permute.xlu1 %924  ;;  %v3988_v30 = vpop.permute.xlu0 %798 }
 0x1aa   : > { %v3993_v20 = vpop.f32.mrb[2].mxu0  ;;  %1192 = vrot.lane.b32.xlu1 %v3642_v40, %s2909_s8  ;;  %1066 = vrot.lane.b32.xlu0 %v3982_v29, %s2908_s22 }
 0x1ab   : > { %v4003_v28 = vmul.f32 %v3993_v20, %v3993_v20  ;;  %2269 = vst.msk [vmem:[%s3873_s28 + $0x18] sm:$0xff] %vm1496_vm0, %v3993_v20  ;;  %v4008_v11 = vpop.f32.mrb[3].mxu0 }
 0x1ac   : > { %v2819_v40 = vpack.c.bf16 %v3993_v20, %v4008_v11  ;;  %v4018_v0 = vmul.f32 %v4008_v11, %v4008_v11  ;;  %2268 = vst.msk [vmem:[%s3873_s28 + $0x10] sm:$0xff] %vm1496_vm0, %v4008_v11  ;;  %v1433_v10 = vpop.permute.xlu1 %1432  ;;  %v1307_v5 = vpop.permute.xlu0 %1306  ;;  %v2912_v20 = vmov 1.0  }
 0x1ad   : > { %v1744_v21 = vsel %vm1727_vm7, %v1711_v12, %v1433_v10  ;;  %2155 = vmatprep.mubr.f32.mxu1 %v2912_v20 }
 0x1ae   : > { %812 = vrot.lane.b32.xlu1 %v3660_v14, %s2906_s20  ;;  %686 = vrot.lane.b32.xlu0 %v4011_v47, %s2904_s18  ;;  %v1646_v14 = vsel %vm1628_vm4, %v1613_v22, %v1051_v53 }
 0x1af   : > { %2773 = vmatprep.mubr.msk.f32.mxu0 %vm1769_vm8, %v1744_v21  ;;  %v1679_v34 = vsel %vm1661_vm5, %v1646_v14, %v1179_v56  ;;  %v4095_v21 = vld [vmem:[%s2947_s17 + $0x1a2] sm:$0xff] }
 0x1b0   : > { %v4037_v41 = vpop.permute.xlu1 %926  ;;  %v4039_v46 = vpop.permute.xlu0 %544  ;;  %v1712_v33 = vsel %vm1694_vm6, %v1679_v34, %v1307_v5  ;;  %v2454_v34 = vld [vmem:[%s2947_s17 + $0x1b8] sm:$0xff] }
 0x1b2   : > { %1320 = vrot.lane.b32.xlu1 %v3820_v57, %s2910_s15  ;;  %1194 = vrot.lane.b32.xlu0 %v3657_v42, %s2909_s8  ;;  %v4057_v42 = vld [vmem:[%s2947_s17 + $0x184] sm:$0xff] }
 0x1b4   : > { %v1435_v16 = vpop.permute.xlu1 %1434  ;;  %v1053_v7 = vpop.permute.xlu0 %1052 }
 0x1b5   : > { %v1745_v18 = vsel %vm1727_vm7, %v1712_v33, %v1435_v16 }
 0x1b6   : > { %940 = vrot.lane.b32.xlu1 %v3838_v24, %s2907_s21  ;;  %814 = vrot.lane.b32.xlu0 %v3683_v63, %s2906_s20  ;;  %v4072_v63 = vld [vmem:[%s2947_s17 + $0x18c] sm:$0xff] }
 0x1b7   : > { %2774 = vmatmul.mubr.msk.f32.gmra.mrb[16].mxu0 %vm1769_vm8, %v1745_v18 }
 0x1b8   : > { %v4059_v44 = vpop.permute.xlu1 %672  ;;  %v4061_v53 = vpop.permute.xlu0 %546 }
 0x1ba   : > { %1448 = vrot.lane.b32.xlu1 %v4057_v42, %s2911_s24  ;;  %1322 = vrot.lane.b32.xlu0 %v3835_v1, %s2910_s15 }
 0x1bc   : > { %v1181_v56 = vpop.permute.xlu1 %1180  ;;  %v1055_v36 = vpop.permute.xlu0 %1054 }
 0x1be   : > { %942 = vrot.lane.b32.xlu1 %v3862_v2, %s2907_s21  ;;  %560 = vrot.lane.b32.xlu0 %v3849_v32, %s2905_s19  ;;  %v1515_v32 = vsel %vm1496_vm0, %v200_v6, %v3923_v50 }
 0x1bf   : > { %v1548_v5 = vsel %vm1529_vm1, %v1515_v32, %v3943_v19  ;;  %v201_v19 = vld [vmem:[%s2947_s17 + $0xe0] sm:$0xff] }
 0x1c0   : > { %v4077_v45 = vpop.permute.xlu1 %800  ;;  %v4079_v4 = vpop.permute.xlu0 %674  ;;  %v1581_v51 = vsel %vm1562_vm2, %v1548_v5, %v3961_v62  ;;  %v1516_v6 = vsel %vm1496_vm0, %v201_v19, %v3945_v54 }
 0x1c1   : > { %v1614_v50 = vsel %vm1595_vm3, %v1581_v51, %v3986_v3 }
 0x1c2   : > { %1450 = vrot.lane.b32.xlu1 %v4072_v63, %s2911_s24  ;;  %1068 = vrot.lane.b32.xlu0 %v4075_v48, %s2908_s22  ;;  %v1647_v22 = vsel %vm1628_vm4, %v1614_v50, %v1053_v7 }
 0x1c3   : > { %v1680_v62 = vsel %vm1661_vm5, %v1647_v22, %v1181_v56 }
 0x1c4   : > { %v1309_v12 = vpop.permute.xlu1 %1308  ;;  %v1183_v10 = vpop.permute.xlu0 %1182 }
 0x1c5   : > { %v1713_v33 = vsel %vm1694_vm6, %v1680_v62, %v1309_v12  ;;  %v1549_v12 = vsel %vm1529_vm1, %v1516_v6, %v3963_v13  ;;  %v2517_v62 = vld [vmem:[%s2947_s17 + $0x1b2] sm:$0xff] }
 0x1c6   : > { %688 = vrot.lane.b32.xlu1 %v2453_v27, %s2904_s18  ;;  %562 = vrot.lane.b32.xlu0 %v3894_v43, %s2905_s19  ;;  %v1582_v32 = vsel %vm1562_vm2, %v1549_v12, %v3988_v30  ;;  %v2518_v12 = vld [vmem:[%s2947_s17 + $0x1ba] sm:$0xff] }
 0x1c7   : > { %v1615_v51 = vsel %vm1595_vm3, %v1582_v32, %v4037_v41 }
 0x1c8   : > { %v4099_v31 = vpop.permute.xlu1 %928  ;;  %v4101_v61 = vpop.permute.xlu0 %802 }
 0x1ca   : > { %v4106_v43 = vpop.f32.mrb[4].mxu0  ;;  %1196 = vrot.lane.b32.xlu1 %v3730_v49, %s2909_s8  ;;  %1070 = vrot.lane.b32.xlu0 %v4095_v21, %s2908_s22 }
 0x1cb   : > { %v4116_v14 = vmul.f32 %v4106_v43, %v4106_v43  ;;  %2271 = vst.msk [vmem:[%s3873_s28 + $0x28] sm:$0xff] %vm1496_vm0, %v4106_v43  ;;  %v4121_v3 = vpop.f32.mrb[5].mxu0 }
 0x1cc   : > { %v2823_v49 = vpack.c.bf16 %v4106_v43, %v4121_v3  ;;  %v4129_v16 = vmul.f32 %v4121_v3, %v4121_v3  ;;  %2270 = vst.msk [vmem:[%s3873_s28 + $0x20] sm:$0xff] %vm1496_vm0, %v4121_v3  ;;  %v1437_v7 = vpop.permute.xlu1 %1436  ;;  %v1311_v18 = vpop.permute.xlu0 %1310 }
 0x1cd   : > { %v1746_v56 = vsel %vm1727_vm7, %v1713_v33, %v1437_v7  ;;  %v202_v7 = vld [vmem:[%s2947_s17 + $0xf0] sm:$0xff] }
 0x1ce   : > { %816 = vrot.lane.b32.xlu1 %v3748_v23, %s2906_s20  ;;  %690 = vrot.lane.b32.xlu0 %v2454_v34, %s2904_s18  ;;  %v1648_v23 = vsel %vm1628_vm4, %v1615_v51, %v1055_v36 }
 0x1cf   : > { %2776 = vmatprep.mubr.msk.f32.mxu0 %vm1769_vm8, %v1746_v56  ;;  %v1681_v13 = vsel %vm1661_vm5, %v1648_v23, %v1183_v10 }
 0x1d0   : > { %v4147_v5 = vpop.permute.xlu1 %930  ;;  %v4149_v54 = vpop.permute.xlu0 %548  ;;  %v1714_v50 = vsel %vm1694_vm6, %v1681_v13, %v1311_v18  ;;  %v2455_v18 = vld [vmem:[%s2947_s17 + $0x1c8] sm:$0xff] }
 0x1d2   : > { %1324 = vrot.lane.b32.xlu1 %v3941_v26, %s2910_s15  ;;  %1198 = vrot.lane.b32.xlu0 %v3745_v17, %s2909_s8  ;;  %v4167_v17 = vld [vmem:[%s2947_s17 + $0x19c] sm:$0xff] }
 0x1d4   : > { %v1439_v30 = vpop.permute.xlu1 %1438  ;;  %v1057_v22 = vpop.permute.xlu0 %1056 }
 0x1d5   : > { %v1747_v19 = vsel %vm1727_vm7, %v1714_v50, %v1439_v30  ;;  %v2456_v30 = vld [vmem:[%s2947_s17 + $0x1d0] sm:$0xff] }
 0x1d6   : > { %944 = vrot.lane.b32.xlu1 %v3959_v59, %s2907_s21  ;;  %818 = vrot.lane.b32.xlu0 %v3771_v55, %s2906_s20  ;;  %v4182_v55 = vld [vmem:[%s2947_s17 + $0x1a4] sm:$0xff] }
 0x1d7   : > { %2777 = vmatmul.mubr.msk.f32.gmra.mrb[18].mxu0 %vm1769_vm8, %v1747_v19 }
 0x1d8   : > { %v4169_v41 = vpop.permute.xlu1 %676  ;;  %v4171_v36 = vpop.permute.xlu0 %550 }
 0x1da   : > { %1452 = vrot.lane.b32.xlu1 %v4167_v17, %s2911_s24  ;;  %1326 = vrot.lane.b32.xlu0 %v3956_v35, %s2910_s15 }
 0x1dc   : > { %v1185_v59 = vpop.permute.xlu1 %1184  ;;  %v1059_v10 = vpop.permute.xlu0 %1058 }
 0x1de   : > { %946 = vrot.lane.b32.xlu1 %v3982_v29, %s2907_s21  ;;  %564 = vrot.lane.b32.xlu0 %v3971_v39, %s2905_s19  ;;  %v1517_v39 = vsel %vm1496_vm0, %v202_v7, %v4039_v46 }
 0x1df   : > { %v1550_v6 = vsel %vm1529_vm1, %v1517_v39, %v4059_v44 }
 0x1e0   : > { %v4185_v34 = vpop.permute.xlu1 %804  ;;  %v4187_v33 = vpop.permute.xlu0 %678  ;;  %v1583_v32 = vsel %vm1562_vm2, %v1550_v6, %v4077_v45 }
 0x1e1   : > { %v1616_v46 = vsel %vm1595_vm3, %v1583_v32, %v4099_v31 }
 0x1e2   : > { %1454 = vrot.lane.b32.xlu1 %v4182_v55, %s2911_s24  ;;  %1072 = vrot.lane.b32.xlu0 %v2517_v62, %s2908_s22  ;;  %v1649_v13 = vsel %vm1628_vm4, %v1616_v46, %v1057_v22 }
 0x1e3   : > { %v1682_v44 = vsel %vm1661_vm5, %v1649_v13, %v1185_v59 }
 0x1e4   : > { %v1313_v29 = vpop.permute.xlu1 %1312  ;;  %v1187_v56 = vpop.permute.xlu0 %1186 }
 0x1e5   : > { %v1715_v22 = vsel %vm1694_vm6, %v1682_v44, %v1313_v29 }
 0x1e6   : > { %692 = vrot.lane.b32.xlu1 %v2455_v18, %s2904_s18  ;;  %566 = vrot.lane.b32.xlu0 %v4011_v47, %s2905_s19  ;;  %v203_v47 = vld [vmem:[%s2947_s17 + $0xf8] sm:$0xff] }
 0x1e7   : > { %v1518_v18 = vsel %vm1496_vm0, %v203_v47, %v4061_v53 }
 0x1e8   : > { %v4204_v51 = vpop.permute.xlu1 %932  ;;  %v4206_v23 = vpop.permute.xlu0 %806  ;;  %v1551_v39 = vsel %vm1529_vm1, %v1518_v18, %v4079_v4 }
 0x1e9   : > { %v1584_v6 = vsel %vm1562_vm2, %v1551_v39, %v4101_v61 }
 0x1ea   : > { %v4211_v50 = vpop.f32.mrb[6].mxu0  ;;  %1200 = vrot.lane.b32.xlu1 %v3820_v57, %s2909_s8  ;;  %1074 = vrot.lane.b32.xlu0 %v2518_v12, %s2908_s22  ;;  %v1617_v32 = vsel %vm1595_vm3, %v1584_v6, %v4147_v5 }
 0x1eb   : > { %v4220_v45 = vmul.f32 %v4211_v50, %v4211_v50  ;;  %2273 = vst.msk [vmem:[%s3873_s28 + $0x38] sm:$0xff] %vm1496_vm0, %v4211_v50  ;;  %v4225_v31 = vpop.f32.mrb[7].mxu0 }
 0x1ec   : > { %v2827_v57 = vpack.c.bf16 %v4211_v50, %v4225_v31  ;;  %v4233_v19 = vmul.f32 %v4225_v31, %v4225_v31  ;;  %2272 = vst.msk [vmem:[%s3873_s28 + $0x30] sm:$0xff] %vm1496_vm0, %v4225_v31  ;;  %v1441_v59 = vpop.permute.xlu1 %1440  ;;  %v1315_v62 = vpop.permute.xlu0 %1314 }
 0x1ed   : > { %v1748_v7 = vsel %vm1727_vm7, %v1715_v22, %v1441_v59  ;;  %v204_v59 = vld [vmem:[%s2947_s17 + $0x108] sm:$0xff] }
 0x1ee   : > { %820 = vrot.lane.b32.xlu1 %v3838_v24, %s2906_s20  ;;  %694 = vrot.lane.b32.xlu0 %v2456_v30, %s2904_s18  ;;  %v1650_v24 = vsel %vm1628_vm4, %v1617_v32, %v1059_v10  ;;  %v2519_v10 = vld [vmem:[%s2947_s17 + $0x1ca] sm:$0xff] }
 0x1ef   : > { %2779 = vmatprep.mubr.msk.f32.mxu0 %vm1769_vm8, %v1748_v7  ;;  %v1683_v4 = vsel %vm1661_vm5, %v1650_v24, %v1187_v56  ;;  %v1519_v7 = vsel %vm1496_vm0, %v204_v59, %v4149_v54  ;;  %v2584_v24 = vld [vmem:[%s2947_s17 + $0x1d4] sm:$0xff] }
 0x1f0   : > { %v4251_v12 = vpop.permute.xlu1 %934  ;;  %v4253_v53 = vpop.permute.xlu0 %552  ;;  %v1716_v61 = vsel %vm1694_vm6, %v1683_v4, %v1315_v62  ;;  %v2583_v4 = vld [vmem:[%s2947_s17 + $0x1cc] sm:$0xff] }
 0x1f2   : > { %1328 = vrot.lane.b32.xlu1 %v4057_v42, %s2910_s15  ;;  %1202 = vrot.lane.b32.xlu0 %v3835_v1, %s2909_s8  ;;  %v2581_v42 = vld [vmem:[%s2947_s17 + $0x1b4] sm:$0xff] }
 0x1f4   : > { %v1443_v46 = vpop.permute.xlu1 %1442  ;;  %v1061_v13 = vpop.permute.xlu0 %1060 }
 0x1f5   : > { %v1749_v47 = vsel %vm1727_vm7, %v1716_v61, %v1443_v46 }
 0x1f6   : > { %948 = vrot.lane.b32.xlu1 %v4075_v48, %s2907_s21  ;;  %822 = vrot.lane.b32.xlu0 %v3862_v2, %s2906_s20  ;;  %v2520_v2 = vld [vmem:[%s2947_s17 + $0x1d2] sm:$0xff]  ;;  %v2582_v48 = vld [vmem:[%s2947_s17 + $0x1bc] sm:$0xff] }
 0x1f7   : > { %2780 = vmatmul.mubr.msk.f32.gmra.mrb[20].mxu0 %vm1769_vm8, %v1749_v47 }
 0x1f8   : > { %v4271_v1 = vpop.permute.xlu1 %680  ;;  %v4273_v5 = vpop.permute.xlu0 %554 }
 0x1fa   : > { %1456 = vrot.lane.b32.xlu1 %v2581_v42, %s2911_s24  ;;  %1330 = vrot.lane.b32.xlu0 %v4072_v63, %s2910_s15 }
 0x1fc   : > { %v1189_v56 = vpop.permute.xlu1 %1188  ;;  %v1063_v44 = vpop.permute.xlu0 %1062 }
 0x1fe   : > { %1076 = vrot.lane.b32.xlu1 %v2519_v10, %s2908_s22  ;;  %950 = vrot.lane.b32.xlu0 %v4095_v21, %s2907_s21  ;;  %v1552_v21 = vsel %vm1529_vm1, %v1519_v7, %v4169_v41  ;;  %v209_v10 = vld [vmem:[%s2947_s17 + $0x140] sm:$0xff] }
 0x1ff   : > { %v1585_v18 = vsel %vm1562_vm2, %v1552_v21, %v4185_v34 }
 0x200   : > { %v809_v30 = vpop.permute.xlu1 %808  ;;  %v4284_v22 = vpop.permute.xlu0 %682  ;;  %v1618_v54 = vsel %vm1595_vm3, %v1585_v18, %v4204_v51 }
 0x202   : > { %1078 = vrot.lane.b32.xlu1 %v2520_v2, %s2908_s22  ;;  %1458 = vrot.lane.b32.xlu0 %v2582_v48, %s2911_s24 }
 0x204   : > { %v1317_v63 = vpop.permute.xlu1 %1316  ;;  %v1191_v62 = vpop.permute.xlu0 %1190 }
 0x206   : > { %1206 = vrot.lane.b32.xlu1 %v3956_v35, %s2909_s8  ;;  %1204 = vrot.lane.b32.xlu0 %v3941_v26, %s2909_s8  ;;  %v1651_v35 = vsel %vm1628_vm4, %v1618_v54, %v1061_v13  ;;  %v205_v26 = vld [vmem:[%s2947_s17 + $0x110] sm:$0xff] }
 0x207   : > { %v1684_v41 = vsel %vm1661_vm5, %v1651_v35, %v1189_v56  ;;  %v1520_v42 = vsel %vm1496_vm0, %v205_v26, %v4171_v36 }
 0x208   : > { %v937_v39 = vpop.permute.xlu1 %936  ;;  %v4299_v6 = vpop.permute.xlu0 %810  ;;  %v1717_v61 = vsel %vm1694_vm6, %v1684_v41, %v1317_v63  ;;  %v1553_v56 = vsel %vm1529_vm1, %v1520_v42, %v4187_v33 }
 0x209   : > { %v1586_v2 = vsel %vm1562_vm2, %v1553_v56, %v4206_v23 }
 0x20a   : > { %v4304_v32 = vpop.f32.mrb[8].mxu0  ;;  %1334 = vrot.lane.b32.xlu1 %v4182_v55, %s2910_s15  ;;  %1332 = vrot.lane.b32.xlu0 %v4167_v17, %s2910_s15  ;;  %v1619_v36 = vsel %vm1595_vm3, %v1586_v2, %v4251_v12 }
 0x20b   : > { %v4314_v34 = vmul.f32 %v4304_v32, %v4304_v32  ;;  %2275 = vst.msk [vmem:[%s3873_s28 + $0x48] sm:$0xff] %vm1496_vm0, %v4304_v32  ;;  %v4319_v51 = vpop.f32.mrb[9].mxu0  ;;  %v1652_v63 = vsel %vm1628_vm4, %v1619_v36, %v1063_v44  ;;  %v206_v44 = vld [vmem:[%s2947_s17 + $0x120] sm:$0xff] }
 0x20c   : > { %v2831_v55 = vpack.c.bf16 %v4304_v32, %v4319_v51  ;;  %v4328_v17 = vmul.f32 %v4319_v51, %v4319_v51  ;;  %2274 = vst.msk [vmem:[%s3873_s28 + $0x40] sm:$0xff] %vm1496_vm0, %v4319_v51  ;;  %v1445_v46 = vpop.permute.xlu1 %1444  ;;  %v1319_v13 = vpop.permute.xlu0 %1318  ;;  %v1685_v7 = vsel %vm1661_vm5, %v1652_v63, %v1191_v62  ;;  %v207_v63 = vld [vmem:[%s2947_s17 + $0x128] sm:$0xff] }
 0x20d   : > { %v1750_v47 = vsel %vm1727_vm7, %v1717_v61, %v1445_v46  ;;  %v1718_v21 = vsel %vm1694_vm6, %v1685_v7, %v1319_v13  ;;  %v1521_v61 = vsel %vm1496_vm0, %v206_v44, %v4253_v53 }
 0x20e   : > { %1462 = vrot.lane.b32.xlu1 %v2584_v24, %s2911_s24  ;;  %1460 = vrot.lane.b32.xlu0 %v2583_v4, %s2911_s24  ;;  %v1554_v46 = vsel %vm1529_vm1, %v1521_v61, %v4271_v1 }
 0x20f   : > { %2782 = vmatprep.mubr.msk.f32.mxu0 %vm1769_vm8, %v1750_v47  ;;  %v1587_v13 = vsel %vm1562_vm2, %v1554_v46, %v809_v30 }
 0x210   : > { %v939_v48 = vpop.permute.xlu1 %938  ;;  %v4345_v59 = vpop.permute.xlu0 %556  ;;  %v1620_v56 = vsel %vm1595_vm3, %v1587_v13, %v937_v39 }
 0x214   : > { %v1447_v18 = vpop.permute.xlu1 %1446  ;;  %v1065_v33 = vpop.permute.xlu0 %1064 }
 0x215   : > { %v1751_v54 = vsel %vm1727_vm7, %v1718_v21, %v1447_v18  ;;  %v1653_v2 = vsel %vm1628_vm4, %v1620_v56, %v1065_v33 }
 0x216   : > { %2783 = vmatmul.mubr.msk.f32.gmra.mrb[22].mxu0 %vm1769_vm8, %v1751_v54 }
 0x218   : > { %v685_v23 = vpop.permute.xlu1 %684  ;;  %v4354_v35 = vpop.permute.xlu0 %558 }
 0x21c   : > { %v1193_v26 = vpop.permute.xlu1 %1192  ;;  %v1067_v41 = vpop.permute.xlu0 %1066 }
 0x21d   : > { %v1686_v7 = vsel %vm1661_vm5, %v1653_v2, %v1193_v26  ;;  %v1522_v26 = vsel %vm1496_vm0, %v207_v63, %v4273_v5 }
 0x220   : > { %v813_v24 = vpop.permute.xlu1 %812  ;;  %v4356_v12 = vpop.permute.xlu0 %686 }
 0x224   : > { %v1321_v62 = vpop.permute.xlu1 %1320  ;;  %v1195_v4 = vpop.permute.xlu0 %1194 }
 0x225   : > { %v1719_v30 = vsel %vm1694_vm6, %v1686_v7, %v1321_v62  ;;  %v1555_v62 = vsel %vm1529_vm1, %v1522_v26, %v4284_v22 }
 0x226   : > { %v1588_v61 = vsel %vm1562_vm2, %v1555_v62, %v4299_v6 }
 0x227   : > { %v1621_v56 = vsel %vm1595_vm3, %v1588_v61, %v939_v48 }
 0x228   : > { %v941_v47 = vpop.permute.xlu1 %940  ;;  %v4364_v42 = vpop.permute.xlu0 %814  ;;  %v1654_v2 = vsel %vm1628_vm4, %v1621_v56, %v1067_v41  ;;  %v208_v41 = vld [vmem:[%s2947_s17 + $0x138] sm:$0xff] }
 0x229   : > { %v1687_v5 = vsel %vm1661_vm5, %v1654_v2, %v1195_v4 }
 0x22a   : > { %v4368_v36 = vpop.f32.mrb[10].mxu0 }
 0x22b   : > { %v4374_v53 = vmul.f32 %v4368_v36, %v4368_v36  ;;  %2277 = vst.msk [vmem:[%s3873_s28 + $0x58] sm:$0xff] %vm1496_vm0, %v4368_v36  ;;  %v4379_v1 = vpop.f32.mrb[11].mxu0 }
 0x22c   : > { %v4386_v21 = vmul.f32 %v4379_v1, %v4379_v1  ;;  %2276 = vst.msk [vmem:[%s3873_s28 + $0x50] sm:$0xff] %vm1496_vm0, %v4379_v1  ;;  %v1449_v18 = vpop.permute.xlu1 %1448  ;;  %v1323_v33 = vpop.permute.xlu0 %1322 }
 0x22d   : > { %v1752_v54 = vsel %vm1727_vm7, %v1719_v30, %v1449_v18  ;;  %v1720_v63 = vsel %vm1694_vm6, %v1687_v5, %v1323_v33  ;;  %v1523_v33 = vsel %vm1496_vm0, %v208_v41, %v4345_v59 }
 0x22e   : > { %2785 = vmatprep.mubr.msk.f32.mxu0 %vm1769_vm8, %v1752_v54  ;;  %v1556_v56 = vsel %vm1529_vm1, %v1523_v33, %v685_v23 }
 0x22f   : > { %v1589_v2 = vsel %vm1562_vm2, %v1556_v56, %v813_v24  ;;  %v1524_v56 = vsel %vm1496_vm0, %v209_v10, %v4354_v35 }
 0x230   : > { %v943_v46 = vpop.permute.xlu1 %942  ;;  %v4401_v13 = vpop.permute.xlu0 %560 }
 0x234   : > { %v1451_v7 = vpop.permute.xlu1 %1450  ;;  %v1069_v30 = vpop.permute.xlu0 %1068 }
 0x235   : > { %v1753_v18 = vsel %vm1727_vm7, %v1720_v63, %v1451_v7  ;;  %v1622_v7 = vsel %vm1595_vm3, %v1589_v2, %v941_v47 }
 0x236   : > { %2786 = vmatmul.mubr.msk.f32.gmra.mrb[24].mxu0 %vm1769_vm8, %v1753_v18  ;;  %v1655_v18 = vsel %vm1628_vm4, %v1622_v7, %v1069_v30 }
 0x238   : > { %v689_v22 = vpop.permute.xlu1 %688  ;;  %v4409_v6 = vpop.permute.xlu0 %562 }
 0x23c   : > { %v1197_v54 = vpop.permute.xlu1 %1196  ;;  %v1071_v26 = vpop.permute.xlu0 %1070 }
 0x23d   : > { %v1688_v29 = vsel %vm1661_vm5, %v1655_v18, %v1197_v54 }
 0x240   : > { %v817_v62 = vpop.permute.xlu1 %816  ;;  %v4411_v48 = vpop.permute.xlu0 %690 }
 0x244   : > { %v1325_v4 = vpop.permute.xlu1 %1324  ;;  %v1199_v61 = vpop.permute.xlu0 %1198 }
 0x245   : > { %v1721_v24 = vsel %vm1694_vm6, %v1688_v29, %v1325_v4  ;;  %v1557_v4 = vsel %vm1529_vm1, %v1524_v56, %v4356_v12 }
 0x246   : > { %v1590_v2 = vsel %vm1562_vm2, %v1557_v4, %v4364_v42 }
 0x247   : > { %v1623_v27 = vsel %vm1595_vm3, %v1590_v2, %v943_v46  ;;  %v210_v46 = vld [vmem:[%s2947_s17 + $0x150] sm:$0xff] }
 0x248   : > { %v945_v5 = vpop.permute.xlu1 %944  ;;  %v4418_v63 = vpop.permute.xlu0 %818 }
 0x24a   : > { %v4422_v44 = vpop.f32.mrb[12].mxu0 }
 0x24b   : > { %v4428_v59 = vmul.f32 %v4422_v44, %v4422_v44  ;;  %2279 = vst.msk [vmem:[%s3873_s28 + $0x68] sm:$0xff] %vm1496_vm0, %v4422_v44  ;;  %v4433_v23 = vpop.f32.mrb[13].mxu0 }
 0x24c   : > { %v4440_v30 = vmul.f32 %v4433_v23, %v4433_v23  ;;  %2278 = vst.msk [vmem:[%s3873_s28 + $0x60] sm:$0xff] %vm1496_vm0, %v4433_v23  ;;  %v1453_v54 = vpop.permute.xlu1 %1452  ;;  %v1327_v41 = vpop.permute.xlu0 %1326 }
 0x24d   : > { %v1754_v33 = vsel %vm1727_vm7, %v1721_v24, %v1453_v54  ;;  %v1656_v24 = vsel %vm1628_vm4, %v1623_v27, %v1071_v26  ;;  %v1525_v26 = vsel %vm1496_vm0, %v210_v46, %v4401_v13 }
 0x24e   : > { %2788 = vmatprep.mubr.msk.f32.mxu0 %vm1769_vm8, %v1754_v33  ;;  %v1689_v10 = vsel %vm1661_vm5, %v1656_v24, %v1199_v61  ;;  %v1558_v61 = vsel %vm1529_vm1, %v1525_v26, %v689_v22  ;;  %v2895_v26 = vld [vmem:[%s2947_s17 + $0x158] sm:$0xff]  ;;  %s2392_s17 = sshll.u32 %s4658_s13, 1 }
 0x24f   : > { %v1722_v35 = vsel %vm1694_vm6, %v1689_v10, %v1327_v41  ;;  %v1591_v41 = vsel %vm1562_vm2, %v1558_v61, %v817_v62  ;;  %v1526_v61 = vsel %vm1496_vm0, %v2895_v26, %v4409_v6  ;;  %s181_s20 = scalar_lea.vmem %s4645_s3, %s2392_s17 }
 0x250   : > { %v947_v7 = vpop.permute.xlu1 %946  ;;  %v565_v18 = vpop.permute.xlu0 %564 }
 0x254   : > { %v1455_v54 = vpop.permute.xlu1 %1454  ;;  %v1073_v29 = vpop.permute.xlu0 %1072 }
 0x255   : > { %v1755_v33 = vsel %vm1727_vm7, %v1722_v35, %v1455_v54  ;;  %v1624_v35 = vsel %vm1595_vm3, %v1591_v41, %v945_v5 }
 0x256   : > { %2789 = vmatmul.mubr.msk.f32.gmra.mrb[26].mxu0 %vm1769_vm8, %v1755_v33  ;;  %v1657_v54 = vsel %vm1628_vm4, %v1624_v35, %v1073_v29 }
 0x258   : > { %v693_v12 = vpop.permute.xlu1 %692  ;;  %v567_v56 = vpop.permute.xlu0 %566 }
 0x25c   : > { %v1201_v42 = vpop.permute.xlu1 %1200  ;;  %v1075_v4 = vpop.permute.xlu0 %1074 }
 0x25d   : > { %v1690_v47 = vsel %vm1661_vm5, %v1657_v54, %v1201_v42 }
 0x260   : > { %v821_v52 = vpop.permute.xlu1 %820  ;;  %v695_v37 = vpop.permute.xlu0 %694 }
 0x264   : > { %v1329_v2 = vpop.permute.xlu1 %1328  ;;  %v1203_v27 = vpop.permute.xlu0 %1202 }
 0x265   : > { %v1723_v22 = vsel %vm1694_vm6, %v1690_v47, %v1329_v2  ;;  %v1559_v2 = vsel %vm1529_vm1, %v1526_v61, %v4411_v48 }
 0x266   : > { %v1592_v41 = vsel %vm1562_vm2, %v1559_v2, %v4418_v63  ;;  %v1527_v63 = vsel %vm1496_vm0, %v3759_v25, %v565_v18 }
 0x267   : > { %v1625_v62 = vsel %vm1595_vm3, %v1592_v41, %v947_v7  ;;  %v1528_v7 = vsel %vm1496_vm0, %v3785_v8, %v567_v56 }
 0x268   : > { %v949_v24 = vpop.permute.xlu1 %948  ;;  %v823_v10 = vpop.permute.xlu0 %822 }
 0x26a   : > { %v4468_v33 = vpop.f32.mrb[14].mxu0 }
 0x26b   : > { %v4473_v39 = vmul.f32 %v4468_v33, %v4468_v33  ;;  %2281 = vst.msk [vmem:[%s3873_s28 + $0x78] sm:$0xff] %vm1496_vm0, %v4468_v33  ;;  %v4478_v13 = vpop.f32.mrb[15].mxu0 }
 0x26c   : > { %v4485_v5 = vmul.f32 %v4478_v13, %v4478_v13  ;;  %2280 = vst.msk [vmem:[%s3873_s28 + $0x70] sm:$0xff] %vm1496_vm0, %v4478_v13  ;;  %v1457_v29 = vpop.permute.xlu1 %1456  ;;  %v1331_v42 = vpop.permute.xlu0 %1330 }
 0x26d   : > { %v1756_v46 = vsel %vm1727_vm7, %v1723_v22, %v1457_v29  ;;  %v1658_v22 = vsel %vm1628_vm4, %v1625_v62, %v1075_v4  ;;  %v1560_v4 = vsel %vm1529_vm1, %v1527_v63, %v693_v12 }
 0x26e   : > { %2791 = vmatprep.mubr.msk.f32.mxu0 %vm1769_vm8, %v1756_v46  ;;  %v1691_v29 = vsel %vm1661_vm5, %v1658_v22, %v1203_v27  ;;  %v1561_v27 = vsel %vm1529_vm1, %v1528_v7, %v695_v37  ;;  %v1593_v62 = vsel %vm1562_vm2, %v1560_v4, %v821_v52 }
 0x26f   : > { %v1724_v6 = vsel %vm1694_vm6, %v1691_v29, %v1331_v42  ;;  %v1594_v42 = vsel %vm1562_vm2, %v1561_v27, %v823_v10  ;;  %v1626_v41 = vsel %vm1595_vm3, %v1593_v62, %v949_v24 }
 0x270   : > { %v1077_v35 = vpop.permute.xlu1 %1076  ;;  %v951_v54 = vpop.permute.xlu0 %950 }
 0x271   : > { %v1627_v22 = vsel %vm1595_vm3, %v1594_v42, %v951_v54  ;;  %v1659_v25 = vsel %vm1628_vm4, %v1626_v41, %v1077_v35 }
 0x274   : > { %v1079_v26 = vpop.permute.xlu1 %1078  ;;  %v1459_v47 = vpop.permute.xlu0 %1458 }
 0x275   : > { %v1757_v46 = vsel %vm1727_vm7, %v1724_v6, %v1459_v47  ;;  %v1660_v18 = vsel %vm1628_vm4, %v1627_v22, %v1079_v26 }
 0x276   : > { %2792 = vmatmul.mubr.msk.f32.gmra.mrb[28].mxu0 %vm1769_vm8, %v1757_v46 }
 0x278   : > { %v1207_v48 = vpop.permute.xlu1 %1206  ;;  %v1205_v61 = vpop.permute.xlu0 %1204 }
 0x279   : > { %v1693_v8 = vsel %vm1661_vm5, %v1660_v18, %v1207_v48  ;;  %v1692_v37 = vsel %vm1661_vm5, %v1659_v25, %v1205_v61 }
 0x27c   : > { %v1335_v2 = vpop.permute.xlu1 %1334  ;;  %v1333_v47 = vpop.permute.xlu0 %1332 }
 0x27d   : > { %v1726_v52 = vsel %vm1694_vm6, %v1693_v8, %v1335_v2  ;;  %v1725_v12 = vsel %vm1694_vm6, %v1692_v37, %v1333_v47 }
 0x280   : > { %v1463_v56 = vpop.permute.xlu1 %1462  ;;  %v1461_v10 = vpop.permute.xlu0 %1460 }
 0x281   : > { %v1759_v24 = vsel %vm1727_vm7, %v1726_v52, %v1463_v56  ;;  %v1758_v54 = vsel %vm1727_vm7, %v1725_v12, %v1461_v10 }
 0x282   : > { %2794 = vmatprep.mubr.msk.f32.mxu0 %vm1769_vm8, %v1758_v54 }
 0x283   : > { %2795 = vmatmul.mubr.msk.f32.gmra.mrb[30].mxu0 %vm1769_vm8, %v1759_v24  ;;  %v4646_v24 = vpack.c.bf16 %v4368_v36, %v4379_v1 }
 0x28a   : > { %v2775_v35 = vpop.f32.mrb[16].mxu0 }
 0x28b   : > { %v4527_v29 = vmul.f32 %v2775_v35, %v2775_v35  ;;  %2283 = vst.msk [vmem:[%s3873_s28 + $0x88] sm:$0xff] %vm1496_vm0, %v2775_v35  ;;  %v2012_v6 = vpop.f32.mrb[17].mxu0 }
 0x28c   : > { %v4531_v26 = vmul.f32 %v2012_v6, %v2012_v6  ;;  %2282 = vst.msk [vmem:[%s3873_s28 + $0x80] sm:$0xff] %vm1496_vm0, %v2012_v6  ;;  %v2813_v46 = vpack.c.bf16 %v2775_v35, %v2012_v6 }
 0x28e   : > { %2814 = vmatprep.subr.bf16.mxu1 %v2813_v46  ;;  %v2845_v48 = vpack.c.bf16 %v4527_v29, %v4531_v26  ;;  %v4647_v46 = vpack.c.bf16 %v4422_v44, %v4433_v23  ;;  %v4649_v44 = vpack.c.bf16 %v3886_v60, %v3899_v15  ;;  %v4650_v23 = vpack.c.bf16 %v4003_v28, %v4018_v0 }
 0x28f   : > { %2816 = vmatpush3.bf16.msra.mxu1 %v2815_v38  ;;  %v4652_v60 = vpack.c.bf16 %v4220_v45, %v4233_v19  ;;  %v4653_v15 = vpack.c.bf16 %v4314_v34, %v4328_v17  ;;  %v4654_v28 = vpack.c.bf16 %v4374_v53, %v4386_v21  ;;  %v4655_v0 = vpack.c.bf16 %v4428_v59, %v4440_v30 }
 0x2aa   : > { %v2778_v61 = vpop.f32.mrb[18].mxu0 }
 0x2ab   : > { %v4540_v63 = vmul.f32 %v2778_v61, %v2778_v61  ;;  %2285 = vst.msk [vmem:[%s3873_s28 + $0x98] sm:$0xff] %vm1496_vm0, %v2778_v61  ;;  %v2022_v7 = vpop.f32.mrb[19].mxu0 }
 0x2ac   : > { %v2817_v4 = vpack.c.bf16 %v2778_v61, %v2022_v7  ;;  %v4544_v27 = vmul.f32 %v2022_v7, %v2022_v7  ;;  %2284 = vst.msk [vmem:[%s3873_s28 + $0x90] sm:$0xff] %vm1496_vm0, %v2022_v7 }
 0x2ae   : > { %2818 = vmatprep.subr.bf16.mxu1 %v2817_v4  ;;  %v2849_v62 = vpack.c.bf16 %v4540_v63, %v4544_v27 }
 0x2af   : > { %2820 = vmatpush3.bf16.msra.mxu1 %v2819_v40 }
 0x2ca   : > { %v2781_v58 = vpop.f32.mrb[20].mxu0 }
 0x2cb   : > { %v4553_v9 = vmul.f32 %v2781_v58, %v2781_v58  ;;  %2287 = vst.msk [vmem:[%s3873_s28 + $0xa8] sm:$0xff] %vm1496_vm0, %v2781_v58  ;;  %v2032_v38 = vpop.f32.mrb[21].mxu0 }
 0x2cc   : > { %v2821_v42 = vpack.c.bf16 %v2781_v58, %v2032_v38  ;;  %v4557_v2 = vmul.f32 %v2032_v38, %v2032_v38  ;;  %2286 = vst.msk [vmem:[%s3873_s28 + $0xa0] sm:$0xff] %vm1496_vm0, %v2032_v38 }
 0x2ce   : > { %2822 = vmatprep.subr.bf16.mxu1 %v2821_v42  ;;  %v2853_v47 = vpack.c.bf16 %v4553_v9, %v4557_v2  ;;  %v4648_v9 = vpack.c.bf16 %v4468_v33, %v4478_v13  ;;  %v4651_v33 = vpack.c.bf16 %v4116_v14, %v4129_v16  ;;  %v4656_v14 = vpack.c.bf16 %v4473_v39, %v4485_v5 }
 0x2cf   : > { %2824 = vmatpush3.bf16.msra.mxu1 %v2823_v49 }
 0x2e9   : > { %v2784_v11 = vpop.f32.mrb[22].mxu0 }
 0x2ea   : > { %v2186_v40 = vmul.f32 %v2784_v11, %v2784_v11  ;;  %2289 = vst.msk [vmem:[%s3873_s28 + $0xb8] sm:$0xff] %vm1496_vm0, %v2784_v11  ;;  %v2042_v41 = vpop.f32.mrb[23].mxu0 }
 0x2eb   : > { %v2825_v22 = vpack.c.bf16 %v2784_v11, %v2042_v41  ;;  %v2185_v25 = vmul.f32 %v2042_v41, %v2042_v41  ;;  %2288 = vst.msk [vmem:[%s3873_s28 + $0xb0] sm:$0xff] %vm1496_vm0, %v2042_v41 }
 0x2ed   : > { %2826 = vmatprep.subr.bf16.mxu1 %v2825_v22  ;;  %v2857_v18 = vpack.c.bf16 %v2186_v40, %v2185_v25 }
 0x2ee   : > { %2828 = vmatpush3.bf16.msra.mxu1 %v2827_v57 }
 0x309   : > { %v2787_v43 = vpop.f32.mrb[24].mxu0 }
 0x30a   : > { %v2188_v3 = vmul.f32 %v2787_v43, %v2787_v43  ;;  %2291 = vst.msk [vmem:[%s3873_s28 + $0xc8] sm:$0xff] %vm1496_vm0, %v2787_v43  ;;  %v2052_v49 = vpop.f32.mrb[25].mxu0 }
 0x30b   : > { %v2829_v8 = vpack.c.bf16 %v2787_v43, %v2052_v49  ;;  %v2187_v37 = vmul.f32 %v2052_v49, %v2052_v49  ;;  %2290 = vst.msk [vmem:[%s3873_s28 + $0xc0] sm:$0xff] %vm1496_vm0, %v2052_v49 }
 0x30d   : > { %2830 = vmatprep.subr.bf16.mxu1 %v2829_v8  ;;  %v2861_v52 = vpack.c.bf16 %v2188_v3, %v2187_v37 }
 0x30e   : > { %2832 = vmatpush3.bf16.msra.mxu1 %v2831_v55 }
 0x329   : > { %v2790_v12 = vpop.f32.mrb[26].mxu0 }
 0x32a   : > { %v2190_v50 = vmul.f32 %v2790_v12, %v2790_v12  ;;  %2293 = vst.msk [vmem:[%s3873_s28 + $0xd8] sm:$0xff] %vm1496_vm0, %v2790_v12  ;;  %v2062_v31 = vpop.f32.mrb[27].mxu0 }
 0x32b   : > { %v2833_v57 = vpack.c.bf16 %v2790_v12, %v2062_v31  ;;  %v2189_v56 = vmul.f32 %v2062_v31, %v2062_v31  ;;  %2292 = vst.msk [vmem:[%s3873_s28 + $0xd0] sm:$0xff] %vm1496_vm0, %v2062_v31 }
 0x32d   : > { %2834 = vmatprep.subr.bf16.mxu1 %v2833_v57  ;;  %v2865_v10 = vpack.c.bf16 %v2190_v50, %v2189_v56 }
 0x32e   : > { %2836 = vmatpush3.bf16.msra.mxu1 %v4646_v24 }
 0x349   : > { %v2793_v54 = vpop.f32.mrb[28].mxu0 }
 0x34a   : > { %v2192_v32 = vmul.f32 %v2793_v54, %v2793_v54  ;;  %2295 = vst.msk [vmem:[%s3873_s28 + $0xe8] sm:$0xff] %vm1496_vm0, %v2793_v54  ;;  %v2072_v51 = vpop.f32.mrb[29].mxu0 }
 0x34b   : > { %v2837_v55 = vpack.c.bf16 %v2793_v54, %v2072_v51  ;;  %v2191_v35 = vmul.f32 %v2072_v51, %v2072_v51  ;;  %2294 = vst.msk [vmem:[%s3873_s28 + $0xe0] sm:$0xff] %vm1496_vm0, %v2072_v51 }
 0x34d   : > { %2838 = vmatprep.subr.bf16.mxu1 %v2837_v55  ;;  %v2869_v6 = vpack.c.bf16 %v2192_v32, %v2191_v35 }
 0x34e   : > { %2840 = vmatpush3.bf16.msra.mxu1 %v4647_v46 }
 0x356   : > { %v2796_v61 = vpop.f32.mrb[30].mxu0 }
 0x357   : > { %v2194_v7 = vmul.f32 %v2796_v61, %v2796_v61  ;;  %2297 = vst.msk [vmem:[%s3873_s28 + $0xf8] sm:$0xff] %vm1496_vm0, %v2796_v61  ;;  %v2082_v36 = vpop.f32.mrb[31].mxu0 }
 0x358   : > { %v2841_v1 = vpack.c.bf16 %v2796_v61, %v2082_v36  ;;  %v2193_v4 = vmul.f32 %v2082_v36, %v2082_v36  ;;  %2296 = vst.msk [vmem:[%s3873_s28 + $0xf0] sm:$0xff] %vm1496_vm0, %v2082_v36 }
 0x35a   : > { %v2873_v58 = vpack.c.bf16 %v2194_v7, %v2193_v4  ;;  %2842 = vmatprep.subr.bf16.mxu1 %v2841_v1 }
 0x35b   : > { %2844 = vmatpush3.bf16.msra.mxu1 %v4648_v9 }
 0x35c   : > { %2846 = vmatprep.subr.bf16.mxu1 %v2845_v48 }
 0x35e   : > { %2156 = vmatmul.mubr.f32.vlgmr.msra.gmra.mrb[0].mxu1 %v2912_v20 }
 0x35f   : > { %2848 = vmatpush3.bf16.msra.mxu1 %v4649_v44  ;;  %2259 = vmatprep.mubr.f32.mxu1 %v2912_v20 }
 0x360   : > { %2850 = vmatprep.subr.bf16.mxu1 %v2849_v62 }
 0x363   : > { %2852 = vmatpush3.bf16.msra.mxu1 %v4650_v23 }
 0x364   : > { %2854 = vmatprep.subr.bf16.mxu1 %v2853_v47 }
 0x367   : > { %2856 = vmatpush3.bf16.msra.mxu1 %v4651_v33 }
 0x368   : > { %2858 = vmatprep.subr.bf16.mxu1 %v2857_v18 }
 0x36b   : > { %2860 = vmatpush3.bf16.msra.mxu1 %v4652_v60 }
 0x36c   : > { %2862 = vmatprep.subr.bf16.mxu1 %v2861_v52 }
 0x36f   : > { %2864 = vmatpush3.bf16.msra.mxu1 %v4653_v15 }
 0x370   : > { %2866 = vmatprep.subr.bf16.mxu1 %v2865_v10 }
 0x373   : > { %2868 = vmatpush3.bf16.msra.mxu1 %v4654_v28 }
 0x374   : > { %2870 = vmatprep.subr.bf16.mxu1 %v2869_v6 }
 0x377   : > { %2872 = vmatpush3.bf16.msra.mxu1 %v4655_v0 }
 0x378   : > { %2874 = vmatprep.subr.bf16.mxu1 %v2873_v58 }
 0x37b   : > { %2876 = vmatpush3.bf16.msra.mxu1 %v4656_v14 }
 0x37e   : > { %2260 = vmatmul.mubr.f32.vlgmr.msra.gmra.mrb[2].mxu1 %v2912_v20 }
 0x431   : > { %v2693_v16 = vpop.f32.mrb[0].mxu1 }
 0x432   : > { %v2694_v45 = vpop.f32.mrb[1].mxu1 }
 0x433   : > { %v2695_v19 = vadd.f32 %v2694_v45, %v2693_v16 }
 0x435   : > { %2162 = vst.msk [vmem:[%s181_s20] sm:$0x1] %vm2161_vm9, %v2695_v19 }
 0x451   : > { %v2728_v34 = vpop.f32.mrb[2].mxu1 }
 0x452   : > { %v2729_v17 = vpop.f32.mrb[3].mxu1 }
 0x453   : > { %v2730_v53 = vadd.f32 %v2729_v17, %v2728_v34 }
 0x455   : > { %2265 = vst.msk [vmem:[%s181_s20 + $0x1] sm:$0x1] %vm2161_vm9, %v2730_v53 }
 0x456 PF: > { %s14_s12 = sadd.s32 1, %s2902_s12  }
 0x457   : > { %p11_p4 = scmp.ge.s32.totalorder %s14_s12, 4  }
 0x459   :  { %13 = sbr.rel (!%p11_p4) target bundleno = 1 (0x1), region = 72 }

// kernel: resnet_block_pallas.4
= control target key start
LH: loop header
LB: loop body
LE: loop exit
PB: predicated region body
PF: predicated region fallthrough
CT: control target
= control target key end

     0   :  { %s3034_s18 = smov 0   ;;  %s4838_s0 = inlined_call_operand.vmem [shape: f32[2,256,8], index: 0, kind: input, shape index: {}]   ;;  %s4839_s1 = inlined_call_operand.vmem [shape: f32[1,8], index: 1, kind: input, shape index: {}]   ;;  %s4840_s2 = inlined_call_operand.vmem [shape: f32[1,8], index: 2, kind: input, shape index: {}]   ;;  %s4841_s3 = inlined_call_operand.vmem [shape: f32[72,8], index: 3, kind: input, shape index: {}]   ;;  %s4842_s4 = inlined_call_operand.vmem [shape: f32[2,256,8], index: 4, kind: output, shape index: {0}]   ;;  %s4843_s5 = inlined_call_operand.vmem [shape: f32[2,2,8], index: 5, kind: output, shape index: {1}]  }
   0x1 LB: > { %s2659_s19 = sadd.s32 4294967295, %s2992_s18   ;;  %p2663_p0 = scmp.ge.s32.totalorder %s2992_s18, 1  ;;  %s2992_s18 = sphi %s3034_s18, %s16_s18  }
   0x2   : > { %p190_p1 = scmp.lt.s32.totalorder %s2992_s18, 3 }
   0x4   : > { %p191_p2 = pnand %p2663_p0, %p190_p1 }
   0x5   : > { %vm378_vm0 = vcmask (!%p191_p2), 64512   ;;  %vm381_vm1 = vcmask (!%p191_p2), 60416   ;;  %p3044_p3 = scmp.lt.s32.totalorder (!%p191_p2), %s2659_s19, 1  ;;  %vm394_vm2 = vcmask (!%p191_p2), 58368   ;;  %v2994_v0 = vmov (!%p191_p2), 0.0   ;;  %s2995_s29 = smov (!%p191_p2), 24  }
   0x6   : > { %194 = sbr.rel (%p191_p2) target bundleno = 1124 (0x464), region = 36  ;;  %380 = vst.msk [vmem:[#allocation2 + $0x8] sm:$0xff] (!%p191_p2), %vm378_vm0, %v2994_v0  ;;  %379 = vst.msk [vmem:[#allocation2] sm:$0xff] (!%p191_p2), %vm378_vm0, %v2994_v0  ;;  %v3098_v1 = vld [vmem:[%s4839_s1] ss:$0 sm:$0xff] (!%p191_p2)  ;;  %s2996_s30 = smov (!%p191_p2), 16  }
   0x7   : > { %382 = vst.msk [vmem:[#allocation2 + $0x10] sm:$0xf] (!%p191_p2), %vm381_vm1, %v2994_v0  ;;  %385 = vst.msk [vmem:[#allocation2 + $0x28] sm:$0xf] (!%p191_p2), %vm381_vm1, %v2994_v0  ;;  %v3110_v2 = vld [vmem:[%s4840_s2] ss:$0 sm:$0xff] (!%p191_p2) }
   0x8   : > { %383 = vst.msk [vmem:[#allocation2 + $0x18] sm:$0xff] (!%p191_p2), %vm378_vm0, %v2994_v0  ;;  %384 = vst.msk [vmem:[#allocation2 + $0x20] sm:$0xff] (!%p191_p2), %vm378_vm0, %v2994_v0  ;;  %s2997_s6 = smov (!%p191_p2), 8   ;;  %s2998_s7 = smov (!%p191_p2), 32   ;;  %vm1804_vm3 = vcmask (!%p191_p2), 130048   ;;  %vm1837_vm4 = vcmask (!%p191_p2), 195584  }
   0x9   : > { %387 = vst.msk [vmem:[#allocation2 + $0x1b0] sm:$0xff] (!%p191_p2), %vm378_vm0, %v2994_v0  ;;  %388 = vst.msk [vmem:[#allocation2 + $0x1b8] sm:$0xff] (!%p191_p2), %vm378_vm0, %v2994_v0  ;;  %s2999_s8 = smov (!%p191_p2), 40   ;;  %s3000_s24 = smov (!%p191_p2), 48   ;;  %vm1870_vm5 = vcmask (!%p191_p2), 261120   ;;  %vm1903_vm6 = vcmask (!%p191_p2), 326656  }
   0xa   : > { %389 = vst.msk [vmem:[#allocation2 + $0x1c0] sm:$0xf] (!%p191_p2), %vm381_vm1, %v2994_v0  ;;  %392 = vst.msk [vmem:[#allocation2 + $0x1d8] sm:$0xf] (!%p191_p2), %vm381_vm1, %v2994_v0  ;;  %s3001_s10 = smov (!%p191_p2), 56   ;;  %s3002_s13 = smov (!%p191_p2), 64  }
   0xb   : > { %390 = vst.msk [vmem:[#allocation2 + $0x1c8] sm:$0xff] (!%p191_p2), %vm378_vm0, %v2994_v0  ;;  %391 = vst.msk [vmem:[#allocation2 + $0x1d0] sm:$0xff] (!%p191_p2), %vm378_vm0, %v2994_v0  ;;  %vm1936_vm7 = vcmask (!%p191_p2), 392192   ;;  %vm1969_vm8 = vcmask (!%p191_p2), 457728   ;;  %vm2002_vm9 = vcmask (!%p191_p2), 523264   ;;  %vm2044_vm10 = vcmask (!%p191_p2), 588800  }
   0xc   : > { %397 = vst.msk [vmem:[#allocation2 + $0x60] sm:$0x3] (!%p191_p2), %vm394_vm2, %v2994_v0  ;;  %395 = vst.msk [vmem:[#allocation2 + $0x30] sm:$0x3] (!%p191_p2), %vm394_vm2, %v2994_v0  ;;  %vm2436_vm11 = vcmask (!%p191_p2), 57344  }
   0xd   : > { %396 = vst.msk [vmem:[#allocation2 + $0x48] sm:$0x3] %vm394_vm2, %v2994_v0  ;;  %398 = vst.msk [vmem:[#allocation2 + $0x78] sm:$0x3] %vm394_vm2, %v2994_v0  ;;  %s4857_s19 = smov (!%p3044_p3, %s2659_s19), 1  ;;  %v556_v13 = vld [vmem:[#allocation2 + $0x2] sm:$0xff] }
   0xe   : > { %399 = vst.msk [vmem:[#allocation2 + $0x90] sm:$0x3] %vm394_vm2, %v2994_v0  ;;  %400 = vst.msk [vmem:[#allocation2 + $0xa8] sm:$0x3] %vm394_vm2, %v2994_v0  ;;  %s2705_s21 = sshll.u32 %s4857_s19, 8  ;;  %v557_v12 = vld [vmem:[#allocation2 + $0xa] sm:$0xff]  ;;  %1036 = vrot.lane.b32.xlu0 %v556_v13, %s2995_s29 }
   0xf   : > { %401 = vst.msk [vmem:[#allocation2 + $0xc0] sm:$0x3] %vm394_vm2, %v2994_v0  ;;  %402 = vst.msk [vmem:[#allocation2 + $0xd8] sm:$0x3] %vm394_vm2, %v2994_v0  ;;  %s3105_s26 = scalar_lea.vmem %s4838_s0, %s2705_s21  ;;  %1038 = vrot.lane.b32.xlu1 %v557_v12, %s2995_s29  ;;  %s4110_s22 = scalar_lea.vmem %s4842_s4, %s2705_s21 }
  0x10   : > { %403 = vst.msk [vmem:[#allocation2 + $0xf0] sm:$0x3] %vm394_vm2, %v2994_v0  ;;  %404 = vst.msk [vmem:[#allocation2 + $0x108] sm:$0x3] %vm394_vm2, %v2994_v0  ;;  %v240_v3 = vld [vmem:[%s3105_s26 + $0x20] sm:$0xff]  ;;  %v241_v5 = vld [vmem:[%s3105_s26 + $0x28] sm:$0xff] }
  0x11   : > { %405 = vst.msk [vmem:[#allocation2 + $0x120] sm:$0x3] %vm394_vm2, %v2994_v0  ;;  %406 = vst.msk [vmem:[#allocation2 + $0x138] sm:$0x3] %vm394_vm2, %v2994_v0  ;;  %v236_v4 = vld [vmem:[%s3105_s26] sm:$0xff]  ;;  %v279_v6 = vmul.f32 %v3098_v1, %v240_v3  ;;  %v280_v8 = vmul.f32 %v3098_v1, %v241_v5  ;;  %v237_v9 = vld [vmem:[%s3105_s26 + $0x8] sm:$0xff] }
  0x12   : > { %407 = vst.msk [vmem:[#allocation2 + $0x150] sm:$0x3] %vm394_vm2, %v2994_v0  ;;  %408 = vst.msk [vmem:[#allocation2 + $0x168] sm:$0x3] %vm394_vm2, %v2994_v0  ;;  %v275_v7 = vmul.f32 %v3098_v1, %v236_v4  ;;  %v238_v10 = vld [vmem:[%s3105_s26 + $0x10] sm:$0xff]  ;;  %v276_v14 = vmul.f32 %v3098_v1, %v237_v9  ;;  %v239_v17 = vld [vmem:[%s3105_s26 + $0x18] sm:$0xff] }
  0x13   : > { %409 = vst.msk [vmem:[#allocation2 + $0x180] sm:$0x3] %vm394_vm2, %v2994_v0  ;;  %410 = vst.msk [vmem:[#allocation2 + $0x198] sm:$0x3] %vm394_vm2, %v2994_v0  ;;  %v242_v11 = vld [vmem:[%s3105_s26 + $0x30] sm:$0xff]  ;;  %v277_v15 = vmul.f32 %v3098_v1, %v238_v10  ;;  %v318_v18 = vadd.f32 %v3110_v2, %v279_v6  ;;  %v319_v20 = vadd.f32 %v3110_v2, %v280_v8  ;;  %v243_v21 = vld [vmem:[%s3105_s26 + $0x38] sm:$0xff] }
  0x14   : > { %411 = vst.msk [vmem:[#allocation2 + $0x42] sm:$0x3] %vm394_vm2, %v2994_v0  ;;  %412 = vst.msk [vmem:[#allocation2 + $0x5a] sm:$0x3] %vm394_vm2, %v2994_v0  ;;  %v281_v16 = vmul.f32 %v3098_v1, %v242_v11  ;;  %v314_v19 = vadd.f32 %v3110_v2, %v275_v7  ;;  %v315_v22 = vadd.f32 %v3110_v2, %v276_v14  ;;  %v244_v26 = vld [vmem:[%s3105_s26 + $0x40] sm:$0xff]  ;;  %v245_v31 = vld [vmem:[%s3105_s26 + $0x48] sm:$0xff] }
  0x15   : > { %413 = vst.msk [vmem:[#allocation2 + $0x72] sm:$0x3] %vm394_vm2, %v2994_v0  ;;  %414 = vst.msk [vmem:[#allocation2 + $0x8a] sm:$0x3] %vm394_vm2, %v2994_v0  ;;  %v316_v23 = vadd.f32 %v3110_v2, %v277_v15  ;;  %v278_v25 = vmul.f32 %v3098_v1, %v239_v17  ;;  %v350_v27 = vmax.f32 %v318_v18, 0.0  ;;  %v351_v29 = vmax.f32 %v319_v20, 0.0 }
  0x16   : > { %415 = vst.msk [vmem:[#allocation2 + $0xa2] sm:$0x3] %vm394_vm2, %v2994_v0  ;;  %416 = vst.msk [vmem:[#allocation2 + $0xba] sm:$0x3] %vm394_vm2, %v2994_v0  ;;  %v320_v24 = vadd.f32 %v3110_v2, %v281_v16  ;;  %v346_v28 = vmax.f32 %v314_v19, 0.0  ;;  %v282_v30 = vmul.f32 %v3098_v1, %v243_v21  ;;  %v347_v32 = vmax.f32 %v315_v22, 0.0 }
  0x17   : > { %417 = vst.msk [vmem:[#allocation2 + $0xd2] sm:$0x3] %vm394_vm2, %v2994_v0  ;;  %418 = vst.msk [vmem:[#allocation2 + $0xea] sm:$0x3] %vm394_vm2, %v2994_v0  ;;  %v348_v33 = vmax.f32 %v316_v23, 0.0  ;;  %v317_v35 = vadd.f32 %v3110_v2, %v278_v25  ;;  %v246_v36 = vld [vmem:[%s3105_s26 + $0x50] sm:$0xff]  ;;  %v283_v40 = vmul.f32 %v3098_v1, %v244_v26  ;;  %v284_v41 = vmul.f32 %v3098_v1, %v245_v31 }
  0x18   : > { %419 = vst.msk [vmem:[#allocation2 + $0x102] sm:$0x3] %vm394_vm2, %v2994_v0  ;;  %420 = vst.msk [vmem:[#allocation2 + $0x11a] sm:$0x3] %vm394_vm2, %v2994_v0  ;;  %v352_v34 = vmax.f32 %v320_v24, 0.0  ;;  %v247_v37 = vld [vmem:[%s3105_s26 + $0x58] sm:$0xff]  ;;  %v321_v39 = vadd.f32 %v3110_v2, %v282_v30  ;;  %v285_v42 = vmul.f32 %v3098_v1, %v246_v36 }
  0x19   : > { %421 = vst.msk [vmem:[#allocation2 + $0x132] sm:$0x3] %vm394_vm2, %v2994_v0  ;;  %422 = vst.msk [vmem:[#allocation2 + $0x14a] sm:$0x3] %vm394_vm2, %v2994_v0  ;;  %v248_v38 = vld [vmem:[%s3105_s26 + $0x60] sm:$0xff]  ;;  %v249_v43 = vld [vmem:[%s3105_s26 + $0x68] sm:$0xff]  ;;  %v286_v45 = vmul.f32 %v3098_v1, %v247_v37  ;;  %v322_v49 = vadd.f32 %v3110_v2, %v283_v40  ;;  %v323_v50 = vadd.f32 %v3110_v2, %v284_v41 }
  0x1a   : > { %423 = vst.msk [vmem:[#allocation2 + $0x162] sm:$0x3] %vm394_vm2, %v2994_v0  ;;  %424 = vst.msk [vmem:[#allocation2 + $0x17a] sm:$0x3] %vm394_vm2, %v2994_v0  ;;  %v349_v44 = vmax.f32 %v317_v35, 0.0  ;;  %v287_v46 = vmul.f32 %v3098_v1, %v248_v38  ;;  %v288_v47 = vmul.f32 %v3098_v1, %v249_v43  ;;  %v353_v48 = vmax.f32 %v321_v39, 0.0 }
  0x1b   : > { %425 = vst.msk [vmem:[#allocation2 + $0x192] sm:$0x3] %vm394_vm2, %v2994_v0  ;;  %426 = vst.msk [vmem:[#allocation2 + $0x1aa] sm:$0x3] %vm394_vm2, %v2994_v0  ;;  %v324_v51 = vadd.f32 %v3110_v2, %v285_v42  ;;  %v325_v52 = vadd.f32 %v3110_v2, %v286_v45  ;;  %v354_v55 = vmax.f32 %v322_v49, 0.0  ;;  %v355_v56 = vmax.f32 %v323_v50, 0.0 }
  0x1c   : > { %431 = vst.msk [vmem:[#allocation2 + $0x62] sm:$0xff] %vm378_vm0, %v350_v27  ;;  %427 = vst.msk [vmem:[#allocation2 + $0x32] sm:$0xff] %vm378_vm0, %v346_v28  ;;  %v326_v53 = vadd.f32 %v3110_v2, %v287_v46  ;;  %v327_v54 = vadd.f32 %v3110_v2, %v288_v47  ;;  %v2035_v8 = vld [vmem:[%s4841_s3] sm:$0xff]  ;;  %v2036_v9 = vld [vmem:[%s4841_s3 + $0x8] sm:$0xff]  ;;  %s2668_s21 = sshll.u32 %s4857_s19, 1 }
  0x1d   : > { %432 = vst.msk [vmem:[#allocation2 + $0x6a] sm:$0xff] %vm378_vm0, %v351_v29  ;;  %428 = vst.msk [vmem:[#allocation2 + $0x3a] sm:$0xff] %vm378_vm0, %v347_v32  ;;  %v356_v57 = vmax.f32 %v324_v51, 0.0  ;;  %v357_v58 = vmax.f32 %v325_v52, 0.0  ;;  %v2884_v11 = vpack.c.bf16 %v2036_v9, %v2035_v8  ;;  %v250_v12 = vld [vmem:[%s3105_s26 + $0x70] sm:$0xff]  ;;  %v251_v13 = vld [vmem:[%s3105_s26 + $0x78] sm:$0xff] }
  0x1e   : > { %429 = vst.msk [vmem:[#allocation2 + $0x4a] sm:$0xff] %vm378_vm0, %v348_v33  ;;  %433 = vst.msk [vmem:[#allocation2 + $0x7a] sm:$0xff] %vm378_vm0, %v352_v34  ;;  %v358_v59 = vmax.f32 %v326_v53, 0.0  ;;  %v359_v60 = vmax.f32 %v327_v54, 0.0  ;;  %v289_v14 = vmul.f32 %v3098_v1, %v250_v12  ;;  %v290_v15 = vmul.f32 %v3098_v1, %v251_v13  ;;  %v2037_v16 = vld [vmem:[%s4841_s3 + $0x10] sm:$0xff]  ;;  %v2038_v17 = vld [vmem:[%s4841_s3 + $0x18] sm:$0xff] }
  0x1f   : > { %430 = vst.msk [vmem:[#allocation2 + $0x52] sm:$0xff] %vm378_vm0, %v349_v44  ;;  %434 = vst.msk [vmem:[#allocation2 + $0x82] sm:$0xff] %vm378_vm0, %v353_v48  ;;  %2885 = vmatprep.subr.bf16.mxu0 %v2884_v11  ;;  %v2888_v19 = vpack.c.bf16 %v2038_v17, %v2037_v16  ;;  %v652_v21 = vld [vmem:[#allocation2 + $0x4] sm:$0xff]  ;;  %v558_v28 = vld [vmem:[#allocation2 + $0x1a] sm:$0xff] }
  0x20   : > { %435 = vst.msk [vmem:[#allocation2 + $0x92] sm:$0xff] %vm378_vm0, %v354_v55  ;;  %436 = vst.msk [vmem:[#allocation2 + $0x9a] sm:$0xff] %vm378_vm0, %v355_v56  ;;  %v328_v18 = vadd.f32 %v3110_v2, %v289_v14  ;;  %v329_v20 = vadd.f32 %v3110_v2, %v290_v15  ;;  %2887 = vmatpush3.bf16.msra.mxu0 %v2884_v11  ;;  %v2039_v25 = vld [vmem:[%s4841_s3 + $0x20] sm:$0xff]  ;;  %v2040_v26 = vld [vmem:[%s4841_s3 + $0x28] sm:$0xff] }
  0x21   : > { %437 = vst.msk [vmem:[#allocation2 + $0xaa] sm:$0xff] %vm378_vm0, %v356_v57  ;;  %438 = vst.msk [vmem:[#allocation2 + $0xb2] sm:$0xff] %vm378_vm0, %v357_v58  ;;  %2889 = vmatprep.subr.bf16.mxu0 %v2888_v19  ;;  %v2892_v27 = vpack.c.bf16 %v2040_v26, %v2039_v25  ;;  %v2041_v30 = vld [vmem:[%s4841_s3 + $0x30] sm:$0xff]  ;;  %v2042_v31 = vld [vmem:[%s4841_s3 + $0x38] sm:$0xff] }
  0x22   : > { %439 = vst.msk [vmem:[#allocation2 + $0xc2] sm:$0xff] %vm378_vm0, %v358_v59  ;;  %440 = vst.msk [vmem:[#allocation2 + $0xca] sm:$0xff] %vm378_vm0, %v359_v60  ;;  %v360_v23 = vmax.f32 %v328_v18, 0.0  ;;  %v361_v24 = vmax.f32 %v329_v20, 0.0  ;;  %v653_v33 = vld [vmem:[#allocation2 + $0xc] sm:$0xff]  ;;  %v2896_v34 = vpack.c.bf16 %v2042_v31, %v2041_v30  ;;  %v2043_v35 = vld [vmem:[%s4841_s3 + $0x40] sm:$0xff] }
  0x23   : > { %v3167_v61 = vld [vmem:[#allocation2 + $0x60] sm:$0xff]  ;;  %v3169_v62 = vld [vmem:[#allocation2 + $0x30] sm:$0xff]  ;;  %v253_v47 = vld [vmem:[%s3105_s26 + $0x88] sm:$0xff] }
  0x24   : > { %908 = vrot.lane.b32.xlu1 %v3167_v61, %s2996_s30  ;;  %780 = vrot.lane.b32.xlu0 %v3169_v62, %s2997_s6  ;;  %v3178_v63 = vld [vmem:[#allocation2 + $0x68] sm:$0xff]  ;;  %v3180_v0 = vld [vmem:[#allocation2 + $0x38] sm:$0xff]  ;;  %441 = vst.msk [vmem:[#allocation2 + $0xda] sm:$0xff] %vm378_vm0, %v360_v23  ;;  %442 = vst.msk [vmem:[#allocation2 + $0xe2] sm:$0xff] %vm378_vm0, %v361_v24  ;;  %v292_v48 = vmul.f32 %v3098_v1, %v253_v47 }
  0x25   : > { %v3186_v3 = vld [vmem:[#allocation2 + $0x48] sm:$0xff]  ;;  %v3188_v4 = vld [vmem:[#allocation2 + $0x32] sm:$0xff]  ;;  %v3196_v6 = vld [vmem:[#allocation2 + $0x3a] sm:$0xff]  ;;  %2891 = vmatpush3.bf16.msra.mxu0 %v2888_v19 }
  0x26   : > { %v3194_v5 = vld [vmem:[#allocation2 + $0x62] sm:$0xff]  ;;  %v3202_v7 = vld [vmem:[#allocation2 + $0x78] sm:$0xff]  ;;  %v3210_v10 = vld [vmem:[#allocation2 + $0x50] sm:$0xff]  ;;  %2893 = vmatprep.subr.bf16.mxu0 %v2892_v27  ;;  %v331_v50 = vadd.f32 %v3110_v2, %v292_v48 }
  0x27   : > { %v3228_v22 = vld [vmem:[#allocation2 + $0x6a] sm:$0xff]  ;;  %v3241_v29 = vld [vmem:[#allocation2 + $0x80] sm:$0xff]  ;;  %v3252_v32 = vld [vmem:[#allocation2 + $0x34] sm:$0xff] }
  0x28   : > { %910 = vrot.lane.b32.xlu1 %v3178_v63, %s2996_s30  ;;  %782 = vrot.lane.b32.xlu0 %v3180_v0, %s2997_s6  ;;  %v3260_v36 = vld [vmem:[#allocation2 + $0x4a] sm:$0xff]  ;;  %v559_v37 = vld [vmem:[#allocation2 + $0x22] sm:$0xff]  ;;  %v591_v42 = vld [vmem:[#allocation2 + $0x52] sm:$0xff]  ;;  %v363_v51 = vmax.f32 %v331_v50, 0.0 }
  0x29   : > { %2895 = vmatpush3.bf16.msra.mxu0 %v2892_v27  ;;  %v3265_v38 = vld [vmem:[#allocation2 + $0x64] sm:$0xff]  ;;  %v3267_v39 = vld [vmem:[#allocation2 + $0x3c] sm:$0xff]  ;;  %v3279_v45 = vld [vmem:[#allocation2 + $0x6c] sm:$0xff] }
  0x2a   : > { %2897 = vmatprep.subr.bf16.mxu0 %v2896_v34  ;;  %v252_v40 = vld [vmem:[%s3105_s26 + $0x80] sm:$0xff]  ;;  %v528_v49 = vld [vmem:[#allocation2 + $0x90] sm:$0xff]  ;;  %444 = vst.msk [vmem:[#allocation2 + $0xfa] sm:$0xff] %vm378_vm0, %v363_v51  ;;  %v3300_v54 = vld [vmem:[#allocation2 + $0x98] sm:$0xff] }
  0x2b   : > { %v291_v41 = vmul.f32 %v3098_v1, %v252_v40  ;;  %v3281_v46 = vld [vmem:[#allocation2 + $0x7a] sm:$0xff]  ;;  %v3294_v53 = vld [vmem:[#allocation2 + $0x82] sm:$0xff]  ;;  %v3306_v55 = vld [vmem:[#allocation2 + $0x4c] sm:$0xff] }
  0x2c   : > { %784 = vrot.lane.b32.xlu1 %v3186_v3, %s2997_s6  ;;  %1164 = vrot.lane.b32.xlu0 %v3188_v4, %s2998_s7  ;;  %v654_v52 = vld [vmem:[#allocation2 + $0x1c] sm:$0xff]  ;;  %v655_v56 = vld [vmem:[#allocation2 + $0x24] sm:$0xff]  ;;  %v3317_v58 = vld [vmem:[#allocation2 + $0x54] sm:$0xff] }
  0x2d   : > { %2899 = vmatpush3.bf16.msra.mxu0 %v2896_v34  ;;  %v330_v43 = vadd.f32 %v3110_v2, %v291_v41  ;;  %v3315_v57 = vld [vmem:[#allocation2 + $0x7c] sm:$0xff]  ;;  %v254_v59 = vld [vmem:[%s3105_s26 + $0x90] sm:$0xff]  ;;  %v3341_v13 = vld [vmem:[#allocation2 + $0xa8] sm:$0xff] }
  0x2e   : > { %2834 = vmatprep.subr.mxu0 %v2043_v35  ;;  %v293_v60 = vmul.f32 %v3098_v1, %v254_v59  ;;  %v3332_v9 = vld [vmem:[#allocation2 + $0x92] sm:$0xff]  ;;  %v3348_v15 = vld [vmem:[#allocation2 + $0x9a] sm:$0xff]  ;;  %v3382_v24 = vld [vmem:[#allocation2 + $0xaa] sm:$0xff] }
  0x2f   : > { %v362_v44 = vmax.f32 %v330_v43, 0.0  ;;  %v255_v11 = vld [vmem:[%s3105_s26 + $0x98] sm:$0xff]  ;;  %v3355_v16 = vld [vmem:[#allocation2 + $0xb0] sm:$0xff]  ;;  %v256_v18 = vld [vmem:[%s3105_s26 + $0xa0] sm:$0xff] }
  0x30   : > { %1292 = vrot.lane.b32.xlu1 %v3194_v5, %s2999_s8  ;;  %1166 = vrot.lane.b32.xlu0 %v3196_v6, %s2998_s7  ;;  %v294_v12 = vmul.f32 %v3098_v1, %v255_v11  ;;  %v3368_v17 = vld [vmem:[#allocation2 + $0x94] sm:$0xff]  ;;  %v295_v19 = vmul.f32 %v3098_v1, %v256_v18  ;;  %v3380_v23 = vld [vmem:[#allocation2 + $0x9c] sm:$0xff]  ;;  %v257_v25 = vld [vmem:[%s3105_s26 + $0xa8] sm:$0xff] }
  0x31   : > { %2835 = vmatpush3.msra.mxu0 %v2043_v35  ;;  %443 = vst.msk [vmem:[#allocation2 + $0xf2] sm:$0xff] %vm378_vm0, %v362_v44  ;;  %v296_v26 = vmul.f32 %v3098_v1, %v257_v25  ;;  %v3409_v35 = vld [vmem:[#allocation2 + $0xc8] sm:$0xff]  ;;  %v258_v47 = vld [vmem:[%s3105_s26 + $0xb0] sm:$0xff]  ;;  %v259_v59 = vld [vmem:[%s3105_s26 + $0xb8] sm:$0xff] }
  0x32   : > { %v333_v14 = vadd.f32 %v3110_v2, %v294_v12  ;;  %v334_v20 = vadd.f32 %v3110_v2, %v295_v19  ;;  %v297_v48 = vmul.f32 %v3098_v1, %v258_v47  ;;  %v460_v18 = vld [vmem:[#allocation2 + $0x8] sm:$0xff] }
  0x33   : > { %v335_v30 = vadd.f32 %v3110_v2, %v296_v26  ;;  %v3470_v19 = vld [vmem:[#allocation2 + $0xca] sm:$0xff] }
  0x34   : > { %912 = vrot.lane.b32.xlu1 %v3202_v7, %s2996_s30  ;;  %786 = vrot.lane.b32.xlu0 %v3210_v10, %s2997_s6 }
  0x35   : > { %v367_v31 = vmax.f32 %v335_v30, 0.0 }
  0x37   : > { %448 = vst.msk [vmem:[#allocation2 + $0x12a] sm:$0xff] %vm378_vm0, %v367_v31  ;;  %v3487_v31 = vld [vmem:[#allocation2 + $0xe0] sm:$0xff] }
  0x38   : > { %1420 = vrot.lane.b32.xlu1 %v652_v21, %s3000_s24  ;;  %1294 = vrot.lane.b32.xlu0 %v3228_v22, %s2999_s8  ;;  %v366_v21 = vmax.f32 %v334_v20, 0.0 }
  0x3a   : > { %447 = vst.msk [vmem:[#allocation2 + $0x122] sm:$0xff] %vm378_vm0, %v366_v21 }
  0x3c   : > { %1040 = vrot.lane.b32.xlu1 %v558_v28, %s2995_s29  ;;  %914 = vrot.lane.b32.xlu0 %v3241_v29, %s2996_s30 }
  0x40   : > { %1548 = vrot.lane.b32.xlu1 %v3252_v32, %s3001_s10  ;;  %1422 = vrot.lane.b32.xlu0 %v653_v33, %s3000_s24 }
  0x44   : > { %1168 = vrot.lane.b32.xlu1 %v3260_v36, %s2998_s7  ;;  %1042 = vrot.lane.b32.xlu0 %v559_v37, %s2995_s29 }
  0x48   : > { %1676 = vrot.lane.b32.xlu1 %v3265_v38, %s3002_s13  ;;  %1550 = vrot.lane.b32.xlu0 %v3267_v39, %s3001_s10 }
  0x4c   : > { %1170 = vrot.lane.b32.xlu1 %v591_v42, %s2998_s7  ;;  %788 = vrot.lane.b32.xlu0 %v3167_v61, %s2997_s6 }
  0x50   : > { %1678 = vrot.lane.b32.xlu1 %v3279_v45, %s3002_s13  ;;  %1296 = vrot.lane.b32.xlu0 %v3281_v46, %s2999_s8 }
  0x54   : > { %916 = vrot.lane.b32.xlu1 %v528_v49, %s2996_s30  ;;  %790 = vrot.lane.b32.xlu0 %v3178_v63, %s2997_s6 }
  0x58   : > { %1424 = vrot.lane.b32.xlu1 %v654_v52, %s3000_s24  ;;  %1298 = vrot.lane.b32.xlu0 %v3294_v53, %s2999_s8  ;;  %v459_v52 = vld [vmem:[#allocation2] sm:$0xff] }
  0x5c   : > { %1044 = vrot.lane.b32.xlu1 %v3188_v4, %s2995_s29  ;;  %918 = vrot.lane.b32.xlu0 %v3300_v54, %s2996_s30  ;;  %v332_v4 = vadd.f32 %v3110_v2, %v293_v60  ;;  %v298_v60 = vmul.f32 %v3098_v1, %v259_v59  ;;  %v260_v59 = vld [vmem:[%s3105_s26 + $0xc0] sm:$0xff] }
  0x5e   : > { %v364_v8 = vmax.f32 %v332_v4, 0.0  ;;  %v337_v11 = vadd.f32 %v3110_v2, %v298_v60  ;;  %v299_v60 = vmul.f32 %v3098_v1, %v260_v59 }
  0x60   : > { %1552 = vrot.lane.b32.xlu1 %v3306_v55, %s3001_s10  ;;  %1426 = vrot.lane.b32.xlu0 %v655_v56, %s3000_s24  ;;  %445 = vst.msk [vmem:[#allocation2 + $0x10a] sm:$0xff] %vm378_vm0, %v364_v8  ;;  %v3462_v8 = vld [vmem:[#allocation2 + $0xd8] sm:$0xff] }
  0x64   : > { %1172 = vrot.lane.b32.xlu1 %v3194_v5, %s2998_s7  ;;  %1046 = vrot.lane.b32.xlu0 %v3196_v6, %s2995_s29  ;;  %v3330_v6 = vld [vmem:[#allocation2 + $0x84] sm:$0xff] }
  0x68   : > { %1680 = vrot.lane.b32.xlu1 %v3315_v57, %s3002_s13  ;;  %1554 = vrot.lane.b32.xlu0 %v3317_v58, %s3001_s10 }
  0x6c   : > { %1174 = vrot.lane.b32.xlu1 %v3228_v22, %s2998_s7  ;;  %792 = vrot.lane.b32.xlu0 %v3202_v7, %s2997_s6  ;;  %v365_v7 = vmax.f32 %v333_v14, 0.0 }
  0x6e   : > { %446 = vst.msk [vmem:[#allocation2 + $0x112] sm:$0xff] %vm378_vm0, %v365_v7  ;;  %v369_v7 = vmax.f32 %v337_v11, 0.0 }
  0x70   : > { %1682 = vrot.lane.b32.xlu1 %v3330_v6, %s3002_s13  ;;  %1300 = vrot.lane.b32.xlu0 %v3332_v9, %s2999_s8  ;;  %450 = vst.msk [vmem:[#allocation2 + $0x142] sm:$0xff] %vm378_vm0, %v369_v7 }
  0x74   : > { %920 = vrot.lane.b32.xlu1 %v3341_v13, %s2996_s30  ;;  %794 = vrot.lane.b32.xlu0 %v3241_v29, %s2997_s6  ;;  %v3395_v29 = vld [vmem:[#allocation2 + $0xc0] sm:$0xff] }
  0x78   : > { %1428 = vrot.lane.b32.xlu1 %v3252_v32, %s3000_s24  ;;  %1302 = vrot.lane.b32.xlu0 %v3348_v15, %s2999_s8  ;;  %v3402_v32 = vld [vmem:[#allocation2 + $0xb2] sm:$0xff] }
  0x7c   : > { %1048 = vrot.lane.b32.xlu1 %v3260_v36, %s2995_s29  ;;  %922 = vrot.lane.b32.xlu0 %v3355_v16, %s2996_s30 }
  0x80   : > { %1556 = vrot.lane.b32.xlu1 %v3265_v38, %s3001_s10  ;;  %1430 = vrot.lane.b32.xlu0 %v3267_v39, %s3000_s24  ;;  %v3393_v28 = vpop.permute.xlu0 %1036 }
  0x81   : > { %v3391_v27 = vpop.permute.xlu1 %1038 }
  0x84   : > { %1176 = vrot.lane.b32.xlu1 %v3281_v46, %s2998_s7  ;;  %1050 = vrot.lane.b32.xlu0 %v591_v42, %s2995_s29 }
  0x88   : > { %1684 = vrot.lane.b32.xlu1 %v3368_v17, %s3002_s13  ;;  %1558 = vrot.lane.b32.xlu0 %v3279_v45, %s3001_s10 }
  0x8c   : > { %1178 = vrot.lane.b32.xlu1 %v3294_v53, %s2998_s7  ;;  %796 = vrot.lane.b32.xlu0 %v528_v49, %s2997_s6  ;;  %v336_v49 = vadd.f32 %v3110_v2, %v297_v48 }
  0x8e   : > { %v368_v51 = vmax.f32 %v336_v49, 0.0 }
  0x90   : > { %1686 = vrot.lane.b32.xlu1 %v3380_v23, %s3002_s13  ;;  %1304 = vrot.lane.b32.xlu0 %v3382_v24, %s2999_s8  ;;  %449 = vst.msk [vmem:[#allocation2 + $0x13a] sm:$0xff] %vm378_vm0, %v368_v51 }
  0x94   : > { %924 = vrot.lane.b32.xlu1 %v3395_v29, %s2996_s30  ;;  %798 = vrot.lane.b32.xlu0 %v3300_v54, %s2997_s6  ;;  %v3446_v54 = vld [vmem:[#allocation2 + $0xb4] sm:$0xff] }
  0x96   : > { %v909_v33 = vpop.permute.xlu1 %908  ;;  %v781_v34 = vpop.permute.xlu0 %780 }
  0x97   : > { %v1772_v4 = vsel %vm378_vm0, %v459_v52, %v781_v34 }
  0x98   : > { %1432 = vrot.lane.b32.xlu1 %v3306_v55, %s3000_s24  ;;  %1306 = vrot.lane.b32.xlu0 %v3402_v32, %s2999_s8  ;;  %v3448_v55 = vld [vmem:[#allocation2 + $0xc2] sm:$0xff]  ;;  %v1805_v14 = vsel %vm1804_vm3, %v1772_v4, %v909_v33 }
  0x99   : > { %v1838_v20 = vsel %vm1837_vm4, %v1805_v14, %v3393_v28  ;;  %v3538_v14 = vld [vmem:[#allocation2 + $0xda] sm:$0xff] }
  0x9a   : > { %v3411_v36 = vpop.permute.xlu1 %910  ;;  %v783_v37 = vpop.permute.xlu0 %782 }
  0x9b   : > { %v1773_v30 = vsel %vm378_vm0, %v460_v18, %v783_v37 }
  0x9c   : > { %1052 = vrot.lane.b32.xlu1 %v3194_v5, %s2995_s29  ;;  %926 = vrot.lane.b32.xlu0 %v3409_v35, %s2996_s30  ;;  %v3429_v5 = vld [vmem:[#allocation2 + $0xac] sm:$0xff]  ;;  %v1806_v37 = vsel %vm1804_vm3, %v1773_v30, %v3411_v36 }
  0x9d   : > { %v3551_v30 = vld [vmem:[#allocation2 + $0xf0] sm:$0xff] }
  0x9e   : > { %v3417_v39 = vpop.permute.xlu1 %784  ;;  %v1165_v40 = vpop.permute.xlu0 %1164 }
  0x9f   : > { %v1871_v26 = vsel %vm1870_vm5, %v1838_v20, %v1165_v40  ;;  %v261_v20 = vld [vmem:[%s3105_s26 + $0xc8] sm:$0xff] }
  0xa0   : > { %1560 = vrot.lane.b32.xlu1 %v3315_v57, %s3001_s10  ;;  %1434 = vrot.lane.b32.xlu0 %v3317_v58, %s3000_s24 }
  0xa2   : > { %v1293_v41 = vpop.permute.xlu1 %1292  ;;  %v3423_v42 = vpop.permute.xlu0 %1166 }
  0xa4   : > { %1180 = vrot.lane.b32.xlu1 %v3332_v9, %s2998_s7  ;;  %1054 = vrot.lane.b32.xlu0 %v3228_v22, %s2995_s29 }
  0xa6   : > { %v3431_v43 = vpop.permute.xlu1 %912  ;;  %v3433_v44 = vpop.permute.xlu0 %786 }
  0xa8   : > { %1688 = vrot.lane.b32.xlu1 %v3429_v5, %s3002_s13  ;;  %1562 = vrot.lane.b32.xlu0 %v3330_v6, %s3001_s10 }
  0xaa   : > { %v1421_v50 = vpop.permute.xlu1 %1420  ;;  %v1295_v22 = vpop.permute.xlu0 %1294 }
  0xac   : > { %1182 = vrot.lane.b32.xlu1 %v3348_v15, %s2998_s7  ;;  %800 = vrot.lane.b32.xlu0 %v3341_v13, %s2997_s6 }
  0xae   : > { %v3451_v56 = vpop.permute.xlu1 %1040  ;;  %v3453_v58 = vpop.permute.xlu0 %914 }
  0xb0   : > { %1690 = vrot.lane.b32.xlu1 %v3446_v54, %s3002_s13  ;;  %1308 = vrot.lane.b32.xlu0 %v3448_v55, %s2999_s8 }
  0xb2   : > { %v1549_v12 = vpop.permute.xlu1 %1548  ;;  %v1423_v13 = vpop.permute.xlu0 %1422 }
  0xb4   : > { %928 = vrot.lane.b32.xlu1 %v3462_v8, %s2996_s30  ;;  %802 = vrot.lane.b32.xlu0 %v3355_v16, %s2997_s6  ;;  %v1904_v16 = vsel %vm1903_vm6, %v1871_v26, %v1293_v41  ;;  %v300_v26 = vmul.f32 %v3098_v1, %v261_v20 }
  0xb5   : > { %v1937_v28 = vsel %vm1936_vm7, %v1904_v16, %v1421_v50 }
  0xb6   : > { %v3475_v21 = vpop.permute.xlu1 %1168  ;;  %v3477_v25 = vpop.permute.xlu0 %1042  ;;  %v1970_v33 = vsel %vm1969_vm8, %v1937_v28, %v1549_v12  ;;  %v339_v16 = vadd.f32 %v3110_v2, %v300_v26  ;;  %v262_v26 = vld [vmem:[%s3105_s26 + $0xd0] sm:$0xff] }
  0xb8   : > { %1436 = vrot.lane.b32.xlu1 %v3265_v38, %s3000_s24  ;;  %1310 = vrot.lane.b32.xlu0 %v3470_v19, %s2999_s8  ;;  %v1839_v38 = vsel %vm1837_vm4, %v1806_v37, %v3391_v27 }
  0xb9   : > { %v1872_v36 = vsel %vm1870_vm5, %v1839_v38, %v3423_v42  ;;  %v3519_v42 = vld [vmem:[#allocation2 + $0xc4] sm:$0xff] }
  0xba   : > { %v1677_v34 = vpop.permute.xlu1 %1676  ;;  %v1551_v40 = vpop.permute.xlu0 %1550  ;;  %v1905_v49 = vsel %vm1903_vm6, %v1872_v36, %v1295_v22 }
  0xbb   : > { %v2003_v41 = vsel %vm2002_vm9, %v1970_v33, %v1677_v34  ;;  %v371_v34 = vmax.f32 %v339_v16, 0.0 }
  0xbc   : > { %1056 = vrot.lane.b32.xlu1 %v3281_v46, %s2995_s29  ;;  %930 = vrot.lane.b32.xlu0 %v3487_v31, %s2996_s30  ;;  %v1938_v46 = vsel %vm1936_vm7, %v1905_v49, %v1423_v13  ;;  %v3536_v13 = vld [vmem:[#allocation2 + $0xcc] sm:$0xff] }
  0xbd   : > { %2836 = vmatprep.mubr.msk.f32.mxu0 %vm2044_vm10, %v2003_v41  ;;  %v1971_v27 = vsel %vm1969_vm8, %v1938_v46, %v1551_v40  ;;  %v3562_v41 = vld [vmem:[#allocation2 + $0xe2] sm:$0xff]  ;;  %452 = vst.msk [vmem:[#allocation2 + $0x15a] sm:$0xff] %vm378_vm0, %v371_v34 }
  0xbe   : > { %v3500_v47 = vpop.permute.xlu1 %1170  ;;  %v3502_v48 = vpop.permute.xlu0 %788  ;;  %v3630_v34 = vld [vmem:[#allocation2 + $0xe4] sm:$0xff] }
  0xc0   : > { %1564 = vrot.lane.b32.xlu1 %v3368_v17, %s3001_s10  ;;  %1438 = vrot.lane.b32.xlu0 %v3279_v45, %s3000_s24 }
  0xc2   : > { %v1679_v50 = vpop.permute.xlu1 %1678  ;;  %v1297_v51 = vpop.permute.xlu0 %1296 }
  0xc3   : > { %v2004_v52 = vsel %vm2002_vm9, %v1971_v27, %v1679_v50  ;;  %v3579_v27 = vld [vmem:[#allocation2 + $0xf8] sm:$0xff] }
  0xc4   : > { %1184 = vrot.lane.b32.xlu1 %v3382_v24, %s2998_s7  ;;  %1058 = vrot.lane.b32.xlu0 %v3294_v53, %s2995_s29  ;;  %v338_v53 = vadd.f32 %v3110_v2, %v299_v60 }
  0xc5   : > { %2837 = vmatmul.mubr.msk.f32.vlgmr.msra.gmra.mrb[0].mxu0 %vm2044_vm10, %v2004_v52 }
  0xc6   : > { %v3521_v22 = vpop.permute.xlu1 %916  ;;  %v3523_v45 = vpop.permute.xlu0 %790  ;;  %v370_v12 = vmax.f32 %v338_v53, 0.0 }
  0xc8   : > { %1692 = vrot.lane.b32.xlu1 %v3519_v42, %s3002_s13  ;;  %1566 = vrot.lane.b32.xlu0 %v3380_v23, %s3001_s10  ;;  %451 = vst.msk [vmem:[#allocation2 + $0x152] sm:$0xff] %vm378_vm0, %v370_v12 }
  0xca   : > { %v1425_v4 = vpop.permute.xlu1 %1424  ;;  %v1299_v11 = vpop.permute.xlu0 %1298 }
  0xcc   : > { %1186 = vrot.lane.b32.xlu1 %v3402_v32, %s2998_s7  ;;  %804 = vrot.lane.b32.xlu0 %v3395_v29, %s2997_s6  ;;  %v461_v29 = vld [vmem:[#allocation2 + $0x18] sm:$0xff] }
  0xcd   : > { %v1774_v40 = vsel %vm378_vm0, %v461_v29, %v3417_v39  ;;  %v301_v29 = vmul.f32 %v3098_v1, %v262_v26 }
  0xce   : > { %v3541_v7 = vpop.permute.xlu1 %1044  ;;  %v3543_v18 = vpop.permute.xlu0 %918  ;;  %v1807_v37 = vsel %vm1804_vm3, %v1774_v40, %v3431_v43  ;;  %v3632_v40 = vld [vmem:[#allocation2 + $0xf2] sm:$0xff] }
  0xcf   : > { %v1840_v38 = vsel %vm1837_vm4, %v1807_v37, %v3451_v56 }
  0xd0   : > { %1694 = vrot.lane.b32.xlu1 %v3536_v13, %s3002_s13  ;;  %1312 = vrot.lane.b32.xlu0 %v3538_v14, %s2999_s8  ;;  %v1873_v39 = vsel %vm1870_vm5, %v1840_v38, %v3475_v21 }
  0xd1   : > { %v1906_v46 = vsel %vm1903_vm6, %v1873_v39, %v1297_v51  ;;  %v263_v39 = vld [vmem:[%s3105_s26 + $0xd8] sm:$0xff] }
  0xd2   : > { %v1553_v28 = vpop.permute.xlu1 %1552  ;;  %v1427_v33 = vpop.permute.xlu0 %1426  ;;  %v1939_v43 = vsel %vm1936_vm7, %v1906_v46, %v1425_v4  ;;  %v302_v46 = vmul.f32 %v3098_v1, %v263_v39 }
  0xd3   : > { %v1972_v56 = vsel %vm1969_vm8, %v1939_v43, %v1553_v28 }
  0xd4   : > { %932 = vrot.lane.b32.xlu1 %v3551_v30, %s2996_s30  ;;  %806 = vrot.lane.b32.xlu0 %v3409_v35, %s2997_s6  ;;  %v462_v35 = vld [vmem:[#allocation2 + $0x20] sm:$0xff] }
  0xd5   : > { %v1775_v21 = vsel %vm378_vm0, %v462_v35, %v3433_v44  ;;  %v341_v35 = vadd.f32 %v3110_v2, %v302_v46 }
  0xd6   : > { %v3567_v36 = vpop.permute.xlu1 %1172  ;;  %v3569_v49 = vpop.permute.xlu0 %1046 }
  0xd8   : > { %1440 = vrot.lane.b32.xlu1 %v3315_v57, %s3000_s24  ;;  %1314 = vrot.lane.b32.xlu0 %v3562_v41, %s2999_s8  ;;  %v1808_v57 = vsel %vm1804_vm3, %v1775_v21, %v3453_v58  ;;  %v3657_v21 = vld [vmem:[#allocation2 + $0xfa] sm:$0xff] }
  0xd9   : > { %v1841_v51 = vsel %vm1837_vm4, %v1808_v57, %v3477_v25 }
  0xda   : > { %v1681_v50 = vpop.permute.xlu1 %1680  ;;  %v1555_v52 = vpop.permute.xlu0 %1554  ;;  %v1874_v44 = vsel %vm1870_vm5, %v1841_v51, %v3500_v47  ;;  %v3613_v47 = vld [vmem:[#allocation2 + $0xdc] sm:$0xff] }
  0xdb   : > { %v2005_v59 = vsel %vm2002_vm9, %v1972_v56, %v1681_v50  ;;  %v373_v50 = vmax.f32 %v341_v35, 0.0  ;;  %v3726_v35 = vld [vmem:[#allocation2 + $0xfc] sm:$0xff] }
  0xdc   : > { %1060 = vrot.lane.b32.xlu1 %v3332_v9, %s2995_s29  ;;  %934 = vrot.lane.b32.xlu0 %v3579_v27, %s2996_s30  ;;  %v1907_v9 = vsel %vm1903_vm6, %v1874_v44, %v1299_v11 }
  0xdd   : > { %2839 = vmatprep.mubr.msk.f32.mxu0 %vm2044_vm10, %v2005_v59  ;;  %v1940_v58 = vsel %vm1936_vm7, %v1907_v9, %v1427_v33  ;;  %454 = vst.msk [vmem:[#allocation2 + $0x172] sm:$0xff] %vm378_vm0, %v373_v50 }
  0xde   : > { %v3594_v60 = vpop.permute.xlu1 %1174  ;;  %v3596_v53 = vpop.permute.xlu0 %792  ;;  %v1973_v25 = vsel %vm1969_vm8, %v1940_v58, %v1555_v52  ;;  %v1776_v52 = vsel %vm378_vm0, %v3169_v62, %v3502_v48 }
  0xdf   : > { %v1809_v59 = vsel %vm1804_vm3, %v1776_v52, %v3521_v22  ;;  %v3674_v22 = vld [vmem:[#allocation2 + $0x110] sm:$0xff]  ;;  %v265_v52 = vld [vmem:[%s3105_s26 + $0xe8] sm:$0xff] }
  0xe0   : > { %1568 = vrot.lane.b32.xlu1 %v3429_v5, %s3001_s10  ;;  %1442 = vrot.lane.b32.xlu0 %v3330_v6, %s3000_s24  ;;  %v1842_v57 = vsel %vm1837_vm4, %v1809_v59, %v3541_v7  ;;  %v304_v59 = vmul.f32 %v3098_v1, %v265_v52  ;;  %v3826_v52 = vld [vmem:[#allocation2 + $0x114] sm:$0xff] }
  0xe1   : > { %v1875_v62 = vsel %vm1870_vm5, %v1842_v57, %v3567_v36  ;;  %v1777_v36 = vsel %vm378_vm0, %v3180_v0, %v3523_v45 }
  0xe2   : > { %v1683_v4 = vpop.permute.xlu1 %1682  ;;  %v1301_v12 = vpop.permute.xlu0 %1300  ;;  %v343_v57 = vadd.f32 %v3110_v2, %v304_v59  ;;  %v3828_v59 = vld [vmem:[#allocation2 + $0x122] sm:$0xff] }
  0xe3   : > { %v2006_v20 = vsel %vm2002_vm9, %v1973_v25, %v1683_v4  ;;  %v1908_v48 = vsel %vm1903_vm6, %v1875_v62, %v1301_v12 }
  0xe4   : > { %1188 = vrot.lane.b32.xlu1 %v3448_v55, %s2998_s7  ;;  %1062 = vrot.lane.b32.xlu0 %v3348_v15, %s2995_s29  ;;  %v340_v15 = vadd.f32 %v3110_v2, %v301_v29 }
  0xe5   : > { %2840 = vmatmul.mubr.msk.f32.gmra.mrb[2].mxu0 %vm2044_vm10, %v2006_v20 }
  0xe6   : > { %v3615_v11 = vpop.permute.xlu1 %920  ;;  %v3617_v6 = vpop.permute.xlu0 %794  ;;  %v372_v33 = vmax.f32 %v340_v15, 0.0 }
  0xe8   : > { %1696 = vrot.lane.b32.xlu1 %v3613_v47, %s3002_s13  ;;  %1570 = vrot.lane.b32.xlu0 %v3446_v54, %s3001_s10  ;;  %453 = vst.msk [vmem:[#allocation2 + $0x16a] sm:$0xff] %vm378_vm0, %v372_v33 }
  0xea   : > { %v1429_v16 = vpop.permute.xlu1 %1428  ;;  %v1303_v28 = vpop.permute.xlu0 %1302 }
  0xec   : > { %1190 = vrot.lane.b32.xlu1 %v3470_v19, %s2998_s7  ;;  %808 = vrot.lane.b32.xlu0 %v3462_v8, %s2997_s6  ;;  %v3645_v8 = vld [vmem:[#allocation2 + $0x108] sm:$0xff] }
  0xee   : > { %v3635_v37 = vpop.permute.xlu1 %1048  ;;  %v3637_v38 = vpop.permute.xlu0 %922 }
  0xf0   : > { %1698 = vrot.lane.b32.xlu1 %v3630_v34, %s3002_s13  ;;  %1316 = vrot.lane.b32.xlu0 %v3632_v40, %s2999_s8 }
  0xf2   : > { %v1557_v43 = vpop.permute.xlu1 %1556  ;;  %v1431_v56 = vpop.permute.xlu0 %1430 }
  0xf4   : > { %936 = vrot.lane.b32.xlu1 %v3645_v8, %s2996_s30  ;;  %810 = vrot.lane.b32.xlu0 %v3487_v31, %s2997_s6  ;;  %v1941_v31 = vsel %vm1936_vm7, %v1908_v48, %v1429_v16  ;;  %v264_v16 = vld [vmem:[%s3105_s26 + $0xe0] sm:$0xff] }
  0xf5   : > { %v1974_v7 = vsel %vm1969_vm8, %v1941_v31, %v1557_v43  ;;  %v3728_v43 = vld [vmem:[#allocation2 + $0x10a] sm:$0xff]  ;;  %v375_v31 = vmax.f32 %v343_v57, 0.0 }
  0xf6   : > { %v3662_v51 = vpop.permute.xlu1 %1176  ;;  %v3664_v44 = vpop.permute.xlu0 %1050 }
  0xf7   : > { %456 = vst.msk [vmem:[#allocation2 + $0x18a] sm:$0xff] %vm378_vm0, %v375_v31 }
  0xf8   : > { %1444 = vrot.lane.b32.xlu1 %v3368_v17, %s3000_s24  ;;  %1318 = vrot.lane.b32.xlu0 %v3657_v21, %s2999_s8  ;;  %v1810_v17 = vsel %vm1804_vm3, %v1777_v36, %v3543_v18 }
  0xf9   : > { %v1843_v4 = vsel %vm1837_vm4, %v1810_v17, %v3569_v49 }
  0xfa   : > { %v1685_v9 = vpop.permute.xlu1 %1684  ;;  %v1559_v58 = vpop.permute.xlu0 %1558  ;;  %v1876_v0 = vsel %vm1870_vm5, %v1843_v4, %v3594_v60  ;;  %v3709_v60 = vld [vmem:[#allocation2 + $0xf4] sm:$0xff] }
  0xfb   : > { %v2007_v25 = vsel %vm2002_vm9, %v1974_v7, %v1685_v9  ;;  %v1778_v7 = vsel %vm378_vm0, %v3186_v3, %v3596_v53  ;;  %v3753_v9 = vld [vmem:[#allocation2 + $0x112] sm:$0xff] }
  0xfc   : > { %1064 = vrot.lane.b32.xlu1 %v3382_v24, %s2995_s29  ;;  %938 = vrot.lane.b32.xlu0 %v3674_v22, %s2996_s30  ;;  %v1909_v24 = vsel %vm1903_vm6, %v1876_v0, %v1303_v28  ;;  %v303_v28 = vmul.f32 %v3098_v1, %v264_v16  ;;  %v1811_v1 = vsel %vm1804_vm3, %v1778_v7, %v3615_v11  ;;  %v3770_v11 = vld [vmem:[#allocation2 + $0x128] sm:$0xff]  ;;  %v2982_v16 = vld [vmem:[%s4839_s1] ss:$0 sm:$0xff]  ;;  %v3840_v7 = vld [vmem:[#allocation2 + $0x138] sm:$0xff] }
  0xfd   : > { %2842 = vmatprep.mubr.msk.f32.mxu0 %vm2044_vm10, %v2007_v25  ;;  %v1942_v45 = vsel %vm1936_vm7, %v1909_v24, %v1431_v56 }
  0xfe   : > { %v3690_v12 = vpop.permute.xlu1 %1178  ;;  %v3692_v20 = vpop.permute.xlu0 %796  ;;  %v1975_v18 = vsel %vm1969_vm8, %v1942_v45, %v1559_v58 }
 0x100   : > { %1572 = vrot.lane.b32.xlu1 %v3519_v42, %s3001_s10  ;;  %1446 = vrot.lane.b32.xlu0 %v3380_v23, %s3000_s24 }
 0x102   : > { %v1687_v49 = vpop.permute.xlu1 %1686  ;;  %v1305_v26 = vpop.permute.xlu0 %1304 }
 0x103   : > { %v2008_v29 = vsel %vm2002_vm9, %v1975_v18, %v1687_v49 }
 0x104   : > { %1192 = vrot.lane.b32.xlu1 %v3538_v14, %s2998_s7  ;;  %1066 = vrot.lane.b32.xlu0 %v3402_v32, %s2995_s29  ;;  %v342_v32 = vadd.f32 %v3110_v2, %v303_v28  ;;  %v1844_v2 = vsel %vm1837_vm4, %v1811_v1, %v3635_v37 }
 0x105   : > { %2843 = vmatmul.mubr.msk.f32.gmra.mrb[4].mxu0 %vm2044_vm10, %v2008_v29  ;;  %v1877_v3 = vsel %vm1870_vm5, %v1844_v2, %v3662_v51  ;;  %v1779_v51 = vsel %vm378_vm0, %v3210_v10, %v3617_v6  ;;  %v266_v29 = vld [vmem:[%s3105_s26 + $0xf0] sm:$0xff] }
 0x106   : > { %v3711_v15 = vpop.permute.xlu1 %924  ;;  %v3713_v23 = vpop.permute.xlu0 %798  ;;  %v374_v46 = vmax.f32 %v342_v32, 0.0  ;;  %v1910_v53 = vsel %vm1903_vm6, %v1877_v3, %v1305_v26  ;;  %v305_v28 = vmul.f32 %v2982_v16, %v266_v29 }
 0x108   : > { %1700 = vrot.lane.b32.xlu1 %v3709_v60, %s3002_s13  ;;  %1574 = vrot.lane.b32.xlu0 %v3536_v13, %s3001_s10  ;;  %455 = vst.msk [vmem:[#allocation2 + $0x182] sm:$0xff] %vm378_vm0, %v374_v46 }
 0x10a   : > { %v1433_v33 = vpop.permute.xlu1 %1432  ;;  %v1307_v39 = vpop.permute.xlu0 %1306 }
 0x10c   : > { %1194 = vrot.lane.b32.xlu1 %v3562_v41, %s2998_s7  ;;  %812 = vrot.lane.b32.xlu0 %v3551_v30, %s2997_s6  ;;  %v3741_v30 = vld [vmem:[#allocation2 + $0x120] sm:$0xff] }
 0x10e   : > { %v3731_v56 = vpop.permute.xlu1 %1052  ;;  %v3733_v50 = vpop.permute.xlu0 %926 }
 0x110   : > { %1702 = vrot.lane.b32.xlu1 %v3726_v35, %s3002_s13  ;;  %1320 = vrot.lane.b32.xlu0 %v3728_v43, %s2999_s8 }
 0x112   : > { %v1561_v62 = vpop.permute.xlu1 %1560  ;;  %v1435_v48 = vpop.permute.xlu0 %1434 }
 0x114   : > { %940 = vrot.lane.b32.xlu1 %v3741_v30, %s2996_s30  ;;  %814 = vrot.lane.b32.xlu0 %v3579_v27, %s2997_s6  ;;  %v1943_v27 = vsel %vm1936_vm7, %v1910_v53, %v1433_v33  ;;  %v1780_v53 = vsel %vm378_vm0, %v3167_v61, %v3692_v20 }
 0x115   : > { %v1976_v37 = vsel %vm1969_vm8, %v1943_v27, %v1561_v62  ;;  %v1813_v27 = vsel %vm1804_vm3, %v1780_v53, %v3711_v15  ;;  %v3866_v15 = vld [vmem:[#allocation2 + $0x140] sm:$0xff] }
 0x116   : > { %v3758_v58 = vpop.permute.xlu1 %1180  ;;  %v3760_v25 = vpop.permute.xlu0 %1054 }
 0x118   : > { %1448 = vrot.lane.b32.xlu1 %v3429_v5, %s3000_s24  ;;  %1322 = vrot.lane.b32.xlu0 %v3753_v9, %s2999_s8  ;;  %v1812_v5 = vsel %vm1804_vm3, %v1779_v51, %v3637_v38 }
 0x119   : > { %v1845_v0 = vsel %vm1837_vm4, %v1812_v5, %v3664_v44 }
 0x11a   : > { %v1689_v36 = vpop.permute.xlu1 %1688  ;;  %v1563_v17 = vpop.permute.xlu0 %1562  ;;  %v1878_v10 = vsel %vm1870_vm5, %v1845_v0, %v3690_v12  ;;  %v3805_v12 = vld [vmem:[#allocation2 + $0x10c] sm:$0xff] }
 0x11b   : > { %v2009_v4 = vsel %vm2002_vm9, %v1976_v37, %v1689_v36  ;;  %v3851_v37 = vld [vmem:[#allocation2 + $0x12a] sm:$0xff]  ;;  %v1846_v36 = vsel %vm1837_vm4, %v1813_v27, %v3731_v56 }
 0x11c   : > { %1068 = vrot.lane.b32.xlu1 %v3448_v55, %s2995_s29  ;;  %942 = vrot.lane.b32.xlu0 %v3770_v11, %s2996_s30  ;;  %v1911_v55 = vsel %vm1903_vm6, %v1878_v10, %v1307_v39  ;;  %v1879_v61 = vsel %vm1870_vm5, %v1846_v36, %v3758_v58  ;;  %v1781_v58 = vsel %vm378_vm0, %v3178_v63, %v3713_v23 }
 0x11d   : > { %2845 = vmatprep.mubr.msk.f32.mxu0 %vm2044_vm10, %v2009_v4  ;;  %v1944_v6 = vsel %vm1936_vm7, %v1911_v55, %v1435_v48  ;;  %v267_v48 = vld [vmem:[%s3105_s26 + $0xf8] sm:$0xff] }
 0x11e   : > { %v3786_v24 = vpop.permute.xlu1 %1182  ;;  %v3788_v45 = vpop.permute.xlu0 %800  ;;  %v1977_v38 = vsel %vm1969_vm8, %v1944_v6, %v1563_v17  ;;  %v306_v31 = vmul.f32 %v2982_v16, %v267_v48  ;;  %v3915_v16 = vld [vmem:[#allocation2 + $0x13a] sm:$0xff] }
 0x120   : > { %1576 = vrot.lane.b32.xlu1 %v3613_v47, %s3001_s10  ;;  %1450 = vrot.lane.b32.xlu0 %v3446_v54, %s3000_s24 }
 0x122   : > { %v1691_v44 = vpop.permute.xlu1 %1690  ;;  %v1309_v18 = vpop.permute.xlu0 %1308 }
 0x123   : > { %v2010_v49 = vsel %vm2002_vm9, %v1977_v38, %v1691_v44  ;;  %v1912_v20 = vsel %vm1903_vm6, %v1879_v61, %v1309_v18  ;;  %v2985_v61 = vld [vmem:[#allocation2 + $0x80] sm:$0xff] }
 0x124   : > { %1196 = vrot.lane.b32.xlu1 %v3632_v40, %s2998_s7  ;;  %1070 = vrot.lane.b32.xlu0 %v3470_v19, %s2995_s29  ;;  %v2983_v19 = vld [vmem:[%s4840_s2] ss:$0 sm:$0xff] }
 0x125   : > { %2846 = vmatmul.mubr.msk.f32.gmra.mrb[6].mxu0 %vm2044_vm10, %v2010_v49  ;;  %v344_v32 = vadd.f32 %v2983_v19, %v305_v28 }
 0x126   : > { %v3807_v26 = vpop.permute.xlu1 %928  ;;  %v3809_v54 = vpop.permute.xlu0 %802 }
 0x127   : > { %v376_v46 = vmax.f32 %v344_v32, 0.0  ;;  %v3925_v32 = vld [vmem:[#allocation2 + $0x150] sm:$0xff] }
 0x128   : > { %1704 = vrot.lane.b32.xlu1 %v3805_v12, %s3002_s13  ;;  %1578 = vrot.lane.b32.xlu0 %v3630_v34, %s3001_s10 }
 0x129   : > { %457 = vst.msk [vmem:[#allocation2 + $0x19a] sm:$0xff] %vm378_vm0, %v376_v46  ;;  %v2984_v46 = vld [vmem:[#allocation2 + $0x78] sm:$0xff] }
 0x12a   : > { %v1437_v33 = vpop.permute.xlu1 %1436  ;;  %v1311_v39 = vpop.permute.xlu0 %1310 }
 0x12c   : > { %1198 = vrot.lane.b32.xlu1 %v3657_v21, %s2998_s7  ;;  %816 = vrot.lane.b32.xlu0 %v3645_v8, %s2997_s6  ;;  %v345_v8 = vadd.f32 %v2983_v19, %v306_v31  ;;  %v3935_v31 = vld [vmem:[#allocation2 + $0x142] sm:$0xff] }
 0x12e   : > { %v3831_v57 = vpop.permute.xlu1 %1056  ;;  %v3833_v62 = vpop.permute.xlu0 %930  ;;  %v377_v3 = vmax.f32 %v345_v8, 0.0 }
 0x130   : > { %1706 = vrot.lane.b32.xlu1 %v3826_v52, %s3002_s13  ;;  %1324 = vrot.lane.b32.xlu0 %v3828_v59, %s2999_s8  ;;  %458 = vst.msk [vmem:[#allocation2 + $0x1a2] sm:$0xff] %vm378_vm0, %v377_v3 }
 0x132   : > { %v1565_v1 = vpop.permute.xlu1 %1564  ;;  %v1439_v2 = vpop.permute.xlu0 %1438 }
 0x134   : > { %944 = vrot.lane.b32.xlu1 %v3840_v7, %s2996_s30  ;;  %818 = vrot.lane.b32.xlu0 %v3674_v22, %s2997_s6  ;;  %v1945_v22 = vsel %vm1936_vm7, %v1912_v20, %v1437_v33 }
 0x135   : > { %v1978_v56 = vsel %vm1969_vm8, %v1945_v22, %v1565_v1 }
 0x136   : > { %v1185_v17 = vpop.permute.xlu1 %1184  ;;  %v3856_v4 = vpop.permute.xlu0 %1058 }
 0x138   : > { %1452 = vrot.lane.b32.xlu1 %v3519_v42, %s3000_s24  ;;  %1326 = vrot.lane.b32.xlu0 %v3851_v37, %s2999_s8  ;;  %v1814_v42 = vsel %vm1804_vm3, %v1781_v58, %v3733_v50  ;;  %v3979_v58 = vld [vmem:[#allocation2 + $0x13c] sm:$0xff] }
 0x139   : > { %v1847_v10 = vsel %vm1837_vm4, %v1814_v42, %v3760_v25 }
 0x13a   : > { %v1693_v51 = vpop.permute.xlu1 %1692  ;;  %v1567_v5 = vpop.permute.xlu0 %1566  ;;  %v1880_v63 = vsel %vm1870_vm5, %v1847_v10, %v3786_v24  ;;  %v3899_v24 = vld [vmem:[#allocation2 + $0x124] sm:$0xff] }
 0x13b   : > { %v2011_v0 = vsel %vm2002_vm9, %v1978_v56, %v1693_v51  ;;  %v1913_v23 = vsel %vm1903_vm6, %v1880_v63, %v1311_v39  ;;  %v3995_v63 = vld [vmem:[#allocation2 + $0x152] sm:$0xff] }
 0x13c   : > { %1072 = vrot.lane.b32.xlu1 %v3538_v14, %s2995_s29  ;;  %946 = vrot.lane.b32.xlu0 %v3866_v15, %s2996_s30  ;;  %v1946_v14 = vsel %vm1936_vm7, %v1913_v23, %v1439_v2 }
 0x13d   : > { %2848 = vmatprep.mubr.msk.f32.mxu0 %vm2044_vm10, %v2011_v0  ;;  %v1979_v50 = vsel %vm1969_vm8, %v1946_v14, %v1567_v5 }
 0x13e   : > { %v1187_v55 = vpop.permute.xlu1 %1186  ;;  %v3882_v6 = vpop.permute.xlu0 %804 }
 0x140   : > { %1580 = vrot.lane.b32.xlu1 %v3709_v60, %s3001_s10  ;;  %1454 = vrot.lane.b32.xlu0 %v3536_v13, %s3000_s24 }
 0x142   : > { %v1695_v38 = vpop.permute.xlu1 %1694  ;;  %v1313_v25 = vpop.permute.xlu0 %1312 }
 0x143   : > { %v2012_v44 = vsel %vm2002_vm9, %v1979_v50, %v1695_v38  ;;  %v471_v50 = vld [vmem:[#allocation2 + $0x90] sm:$0xff]  ;;  %v4005_v38 = vld [vmem:[#allocation2 + $0x168] sm:$0xff] }
 0x144   : > { %1200 = vrot.lane.b32.xlu1 %v3728_v43, %s2998_s7  ;;  %1074 = vrot.lane.b32.xlu0 %v3562_v41, %s2995_s29  ;;  %v3913_v41 = vld [vmem:[#allocation2 + $0x12c] sm:$0xff] }
 0x145   : > { %2849 = vmatmul.mubr.msk.f32.gmra.mrb[8].mxu0 %vm2044_vm10, %v2012_v44 }
 0x146   : > { %v3901_v18 = vpop.permute.xlu1 %932  ;;  %v3903_v13 = vpop.permute.xlu0 %806 }
 0x148   : > { %1708 = vrot.lane.b32.xlu1 %v3899_v24, %s3002_s13  ;;  %1582 = vrot.lane.b32.xlu0 %v3726_v35, %s3001_s10 }
 0x14a   : > { %v1441_v49 = vpop.permute.xlu1 %1440  ;;  %v1315_v29 = vpop.permute.xlu0 %1314 }
 0x14c   : > { %1202 = vrot.lane.b32.xlu1 %v3753_v9, %s2998_s7  ;;  %820 = vrot.lane.b32.xlu0 %v3741_v30, %s2997_s6  ;;  %v1782_v30 = vsel %vm378_vm0, %v2984_v46, %v3788_v45 }
 0x14d   : > { %v1815_v48 = vsel %vm1804_vm3, %v1782_v30, %v3807_v26  ;;  %v3948_v26 = vld [vmem:[#allocation2 + $0x158] sm:$0xff] }
 0x14e   : > { %v3917_v28 = vpop.permute.xlu1 %1060  ;;  %v3919_v19 = vpop.permute.xlu0 %934  ;;  %v1848_v8 = vsel %vm1837_vm4, %v1815_v48, %v3831_v57  ;;  %v4028_v48 = vld [vmem:[#allocation2 + $0x170] sm:$0xff] }
 0x14f   : > { %v1881_v3 = vsel %vm1870_vm5, %v1848_v8, %v1185_v17  ;;  %v1783_v17 = vsel %vm378_vm0, %v2985_v61, %v3809_v54 }
 0x150   : > { %1710 = vrot.lane.b32.xlu1 %v3913_v41, %s3002_s13  ;;  %1328 = vrot.lane.b32.xlu0 %v3915_v16, %s2999_s8  ;;  %v1914_v45 = vsel %vm1903_vm6, %v1881_v3, %v1313_v25 }
 0x152   : > { %v1569_v33 = vpop.permute.xlu1 %1568  ;;  %v1443_v39 = vpop.permute.xlu0 %1442 }
 0x154   : > { %948 = vrot.lane.b32.xlu1 %v3925_v32, %s2996_s30  ;;  %822 = vrot.lane.b32.xlu0 %v3770_v11, %s2997_s6  ;;  %v1947_v11 = vsel %vm1936_vm7, %v1914_v45, %v1441_v49 }
 0x155   : > { %v1980_v53 = vsel %vm1969_vm8, %v1947_v11, %v1569_v33 }
 0x156   : > { %v1189_v1 = vpop.permute.xlu1 %1188  ;;  %v3939_v2 = vpop.permute.xlu0 %1062 }
 0x158   : > { %1456 = vrot.lane.b32.xlu1 %v3613_v47, %s3000_s24  ;;  %1330 = vrot.lane.b32.xlu0 %v3935_v31, %s2999_s8  ;;  %v1816_v47 = vsel %vm1804_vm3, %v1783_v17, %v3833_v62  ;;  %v4061_v17 = vld [vmem:[#allocation2 + $0x154] sm:$0xff] }
 0x159   : > { %v1849_v20 = vsel %vm1837_vm4, %v1816_v47, %v3856_v4 }
 0x15a   : > { %v1697_v57 = vpop.permute.xlu1 %1696  ;;  %v1571_v27 = vpop.permute.xlu0 %1570  ;;  %v1882_v51 = vsel %vm1870_vm5, %v1849_v20, %v1187_v55 }
 0x15b   : > { %v2013_v36 = vsel %vm2002_vm9, %v1980_v53, %v1697_v57  ;;  %v1915_v54 = vsel %vm1903_vm6, %v1882_v51, %v1315_v29  ;;  %v4015_v29 = vld [vmem:[#allocation2 + $0x15a] sm:$0xff]  ;;  %v4077_v51 = vld [vmem:[#allocation2 + $0x16a] sm:$0xff] }
 0x15c   : > { %1076 = vrot.lane.b32.xlu1 %v3632_v40, %s2995_s29  ;;  %950 = vrot.lane.b32.xlu0 %v3948_v26, %s2996_s30  ;;  %v1948_v40 = vsel %vm1936_vm7, %v1915_v54, %v1443_v39 }
 0x15d   : > { %2851 = vmatprep.mubr.msk.f32.mxu0 %vm2044_vm10, %v2013_v36  ;;  %v1981_v62 = vsel %vm1969_vm8, %v1948_v40, %v1571_v27 }
 0x15e   : > { %v1191_v22 = vpop.permute.xlu1 %1190  ;;  %v3963_v56 = vpop.permute.xlu0 %808 }
 0x160   : > { %1584 = vrot.lane.b32.xlu1 %v3805_v12, %s3001_s10  ;;  %1458 = vrot.lane.b32.xlu0 %v3630_v34, %s3000_s24 }
 0x162   : > { %v1699_v5 = vpop.permute.xlu1 %1698  ;;  %v1317_v0 = vpop.permute.xlu0 %1316 }
 0x163   : > { %v2014_v4 = vsel %vm2002_vm9, %v1981_v62, %v1699_v5  ;;  %v473_v62 = vld [vmem:[#allocation2 + $0xa8] sm:$0xff]  ;;  %v4087_v5 = vld [vmem:[#allocation2 + $0x180] sm:$0xff] }
 0x164   : > { %1204 = vrot.lane.b32.xlu1 %v3828_v59, %s2998_s7  ;;  %1078 = vrot.lane.b32.xlu0 %v3657_v21, %s2995_s29  ;;  %v3993_v21 = vld [vmem:[#allocation2 + $0x144] sm:$0xff] }
 0x165   : > { %2852 = vmatmul.mubr.msk.f32.gmra.mrb[10].mxu0 %vm2044_vm10, %v2014_v4  ;;  %v1786_v4 = vsel %vm378_vm0, %v473_v62, %v3963_v56  ;;  %v475_v62 = vld [vmem:[#allocation2 + $0xc0] sm:$0xff] }
 0x166   : > { %v3981_v42 = vpop.permute.xlu1 %936  ;;  %v3983_v34 = vpop.permute.xlu0 %810 }
 0x168   : > { %1712 = vrot.lane.b32.xlu1 %v3979_v58, %s3002_s13  ;;  %1586 = vrot.lane.b32.xlu0 %v3826_v52, %s3001_s10 }
 0x16a   : > { %v1445_v10 = vpop.permute.xlu1 %1444  ;;  %v1319_v55 = vpop.permute.xlu0 %1318 }
 0x16c   : > { %1206 = vrot.lane.b32.xlu1 %v3851_v37, %s2998_s7  ;;  %824 = vrot.lane.b32.xlu0 %v3840_v7, %s2997_s6  ;;  %v1784_v7 = vsel %vm378_vm0, %v471_v50, %v3882_v6 }
 0x16d   : > { %v1817_v49 = vsel %vm1804_vm3, %v1784_v7, %v3901_v18 }
 0x16e   : > { %v3997_v23 = vpop.permute.xlu1 %1064  ;;  %v3999_v14 = vpop.permute.xlu0 %938  ;;  %v1850_v33 = vsel %vm1837_vm4, %v1817_v49, %v3917_v28 }
 0x16f   : > { %v1883_v30 = vsel %vm1870_vm5, %v1850_v33, %v1189_v1 }
 0x170   : > { %1714 = vrot.lane.b32.xlu1 %v3993_v21, %s3002_s13  ;;  %1332 = vrot.lane.b32.xlu0 %v3995_v63, %s2999_s8  ;;  %v1916_v6 = vsel %vm1903_vm6, %v1883_v30, %v1317_v0 }
 0x171   : > { %v1949_v18 = vsel %vm1936_vm7, %v1916_v6, %v1445_v10  ;;  %v1819_v10 = vsel %vm1804_vm3, %v1786_v4, %v3981_v42 }
 0x172   : > { %v1573_v25 = vpop.permute.xlu1 %1572  ;;  %v1447_v44 = vpop.permute.xlu0 %1446  ;;  %v1852_v50 = vsel %vm1837_vm4, %v1819_v10, %v3997_v23  ;;  %v474_v23 = vld [vmem:[#allocation2 + $0xb0] sm:$0xff] }
 0x173   : > { %v1982_v28 = vsel %vm1969_vm8, %v1949_v18, %v1573_v25 }
 0x174   : > { %952 = vrot.lane.b32.xlu1 %v4005_v38, %s2996_s30  ;;  %826 = vrot.lane.b32.xlu0 %v3866_v15, %s2997_s6  ;;  %v472_v15 = vld [vmem:[#allocation2 + $0x98] sm:$0xff] }
 0x175   : > { %v1785_v1 = vsel %vm378_vm0, %v472_v15, %v3903_v13 }
 0x176   : > { %v1193_v39 = vpop.permute.xlu1 %1192  ;;  %v4019_v46 = vpop.permute.xlu0 %1066 }
 0x178   : > { %1460 = vrot.lane.b32.xlu1 %v3709_v60, %s3000_s24  ;;  %1334 = vrot.lane.b32.xlu0 %v4015_v29, %s2999_s8  ;;  %v1818_v60 = vsel %vm1804_vm3, %v1785_v1, %v3919_v19 }
 0x179   : > { %v1851_v11 = vsel %vm1837_vm4, %v1818_v60, %v3939_v2 }
 0x17a   : > { %v1701_v8 = vpop.permute.xlu1 %1700  ;;  %v1575_v3 = vpop.permute.xlu0 %1574  ;;  %v1884_v13 = vsel %vm1870_vm5, %v1851_v11, %v1191_v22 }
 0x17b   : > { %v2015_v45 = vsel %vm2002_vm9, %v1982_v28, %v1701_v8  ;;  %v1917_v27 = vsel %vm1903_vm6, %v1884_v13, %v1319_v55  ;;  %v4097_v55 = vld [vmem:[#allocation2 + $0x172] sm:$0xff]  ;;  %v1787_v8 = vsel %vm378_vm0, %v474_v23, %v3983_v34 }
 0x17c   : > { %1080 = vrot.lane.b32.xlu1 %v3728_v43, %s2995_s29  ;;  %954 = vrot.lane.b32.xlu0 %v4028_v48, %s2996_s30  ;;  %v1950_v43 = vsel %vm1936_vm7, %v1917_v27, %v1447_v44 }
 0x17d   : > { %2854 = vmatprep.mubr.msk.f32.mxu0 %vm2044_vm10, %v2015_v45  ;;  %v1983_v19 = vsel %vm1969_vm8, %v1950_v43, %v1575_v3  ;;  %v1820_v45 = vsel %vm1804_vm3, %v1787_v8, %v3999_v14  ;;  %v488_v3 = vld [vmem:[#allocation2 + $0x158] sm:$0xff] }
 0x17e   : > { %v4043_v53 = vpop.permute.xlu1 %1194  ;;  %v4045_v57 = vpop.permute.xlu0 %812  ;;  %v1853_v1 = vsel %vm1837_vm4, %v1820_v45, %v4019_v46 }
 0x17f   : > { %v1886_v11 = vsel %vm1870_vm5, %v1853_v1, %v4043_v53  ;;  %v4175_v53 = vld [vmem:[#allocation2 + $0x16c] sm:$0xff] }
 0x180   : > { %1588 = vrot.lane.b32.xlu1 %v3899_v24, %s3001_s10  ;;  %1462 = vrot.lane.b32.xlu0 %v3726_v35, %s3000_s24 }
 0x182   : > { %v1703_v36 = vpop.permute.xlu1 %1702  ;;  %v1321_v2 = vpop.permute.xlu0 %1320 }
 0x183   : > { %v2016_v61 = vsel %vm2002_vm9, %v1983_v19, %v1703_v36 }
 0x184   : > { %1208 = vrot.lane.b32.xlu1 %v3915_v16, %s2998_s7  ;;  %1082 = vrot.lane.b32.xlu0 %v3753_v9, %s2995_s29  ;;  %v4075_v9 = vld [vmem:[#allocation2 + $0x15c] sm:$0xff] }
 0x185   : > { %2855 = vmatmul.mubr.msk.f32.gmra.mrb[12].mxu0 %vm2044_vm10, %v2016_v61  ;;  %v4191_v61 = vld [vmem:[#allocation2 + $0x182] sm:$0xff] }
 0x186   : > { %v4063_v47 = vpop.permute.xlu1 %940  ;;  %v4065_v35 = vpop.permute.xlu0 %814 }
 0x188   : > { %1716 = vrot.lane.b32.xlu1 %v4061_v17, %s3002_s13  ;;  %1590 = vrot.lane.b32.xlu0 %v3913_v41, %s3001_s10 }
 0x18a   : > { %v1449_v20 = vpop.permute.xlu1 %1448  ;;  %v1323_v22 = vpop.permute.xlu0 %1322 }
 0x18c   : > { %1210 = vrot.lane.b32.xlu1 %v3935_v31, %s2998_s7  ;;  %828 = vrot.lane.b32.xlu0 %v3925_v32, %s2997_s6 }
 0x18e   : > { %v4079_v54 = vpop.permute.xlu1 %1068  ;;  %v4081_v40 = vpop.permute.xlu0 %942 }
 0x190   : > { %1718 = vrot.lane.b32.xlu1 %v4075_v9, %s3002_s13  ;;  %1336 = vrot.lane.b32.xlu0 %v4077_v51, %s2999_s8 }
 0x192   : > { %v1577_v0 = vpop.permute.xlu1 %1576  ;;  %v1451_v32 = vpop.permute.xlu0 %1450 }
 0x194   : > { %956 = vrot.lane.b32.xlu1 %v4087_v5, %s2996_s30  ;;  %830 = vrot.lane.b32.xlu0 %v3948_v26, %s2997_s6  ;;  %v1885_v26 = vsel %vm1870_vm5, %v1852_v50, %v1193_v39  ;;  %v4130_v39 = vld [vmem:[#allocation2 + $0x188] sm:$0xff] }
 0x195   : > { %v1918_v56 = vsel %vm1903_vm6, %v1885_v26, %v1321_v2  ;;  %v4211_v50 = vld [vmem:[#allocation2 + $0x18a] sm:$0xff] }
 0x196   : > { %v4101_v25 = vpop.permute.xlu1 %1196  ;;  %v4103_v44 = vpop.permute.xlu0 %1070  ;;  %v1951_v7 = vsel %vm1936_vm7, %v1918_v56, %v1449_v20 }
 0x197   : > { %v1984_v30 = vsel %vm1969_vm8, %v1951_v7, %v1577_v0  ;;  %v4201_v0 = vld [vmem:[#allocation2 + $0x198] sm:$0xff] }
 0x198   : > { %v4114_v42 = vpop.f32.mrb[0].mxu0  ;;  %1464 = vrot.lane.b32.xlu1 %v3805_v12, %s3000_s24  ;;  %1338 = vrot.lane.b32.xlu0 %v4097_v55, %s2999_s8 }
 0x199   : > { %v4123_v49 = vmul.f32 %v4114_v42, %v4114_v42  ;;  %2542 = vst.msk [vmem:[%s4110_s22 + $0x8] sm:$0xff] %vm378_vm0, %v4114_v42  ;;  %v4128_v33 = vpop.f32.mrb[1].mxu0 }
 0x19a   : > { %v4135_v12 = vmul.f32 %v4128_v33, %v4128_v33  ;;  %2541 = vst.msk [vmem:[%s4110_s22] sm:$0xff] %vm378_vm0, %v4128_v33  ;;  %v1705_v6 = vpop.permute.xlu1 %1704  ;;  %v1579_v15 = vpop.permute.xlu0 %1578  ;;  %v2902_v18 = vpack.c.bf16 %v4114_v42, %v4128_v33 }
 0x19b   : > { %v2017_v28 = vsel %vm2002_vm9, %v1984_v30, %v1705_v6 }
 0x19c   : > { %1084 = vrot.lane.b32.xlu1 %v3828_v59, %s2995_s29  ;;  %958 = vrot.lane.b32.xlu0 %v4130_v39, %s2996_s30  ;;  %v1919_v59 = vsel %vm1903_vm6, %v1886_v11, %v1323_v22 }
 0x19d   : > { %2857 = vmatprep.mubr.msk.f32.mxu0 %vm2044_vm10, %v2017_v28  ;;  %v1952_v14 = vsel %vm1936_vm7, %v1919_v59, %v1451_v32 }
 0x19e   : > { %v4156_v60 = vpop.permute.xlu1 %1198  ;;  %v4158_v34 = vpop.permute.xlu0 %816  ;;  %v1985_v13 = vsel %vm1969_vm8, %v1952_v14, %v1579_v15  ;;  %v4238_v15 = vld [vmem:[#allocation2 + $0x1a0] sm:$0xff] }
 0x1a0   : > { %1592 = vrot.lane.b32.xlu1 %v3979_v58, %s3001_s10  ;;  %1466 = vrot.lane.b32.xlu0 %v3826_v52, %s3000_s24 }
 0x1a2   : > { %v1707_v46 = vpop.permute.xlu1 %1706  ;;  %v1325_v27 = vpop.permute.xlu0 %1324 }
 0x1a3   : > { %v2018_v43 = vsel %vm2002_vm9, %v1985_v13, %v1707_v46 }
 0x1a4   : > { %1212 = vrot.lane.b32.xlu1 %v3995_v63, %s2998_s7  ;;  %1086 = vrot.lane.b32.xlu0 %v3851_v37, %s2995_s29  ;;  %v4189_v37 = vld [vmem:[#allocation2 + $0x174] sm:$0xff] }
 0x1a5   : > { %2858 = vmatmul.mubr.msk.f32.gmra.mrb[14].mxu0 %vm2044_vm10, %v2018_v43 }
 0x1a6   : > { %v4177_v19 = vpop.permute.xlu1 %944  ;;  %v4179_v52 = vpop.permute.xlu0 %818 }
 0x1a8   : > { %1720 = vrot.lane.b32.xlu1 %v4175_v53, %s3002_s13  ;;  %1594 = vrot.lane.b32.xlu0 %v3993_v21, %s3001_s10 }
 0x1aa   : > { %v1453_v36 = vpop.permute.xlu1 %1452  ;;  %v1327_v2 = vpop.permute.xlu0 %1326 }
 0x1ac   : > { %1214 = vrot.lane.b32.xlu1 %v4015_v29, %s2998_s7  ;;  %832 = vrot.lane.b32.xlu0 %v4005_v38, %s2997_s6  ;;  %v1788_v38 = vsel %vm378_vm0, %v475_v62, %v4045_v57 }
 0x1ad   : > { %v1821_v10 = vsel %vm1804_vm3, %v1788_v38, %v4063_v47  ;;  %v476_v47 = vld [vmem:[#allocation2 + $0xc8] sm:$0xff] }
 0x1ae   : > { %v4193_v20 = vpop.permute.xlu1 %1072  ;;  %v4195_v22 = vpop.permute.xlu0 %946  ;;  %v1854_v26 = vsel %vm1837_vm4, %v1821_v10, %v4079_v54  ;;  %v1789_v59 = vsel %vm378_vm0, %v476_v47, %v4065_v35  ;;  %v4299_v10 = vld [vmem:[#allocation2 + $0x19a] sm:$0xff]  ;;  %v552_v47 = vld [vmem:[#allocation2 + $0x1b0] sm:$0xff] }
 0x1af   : > { %v1887_v57 = vsel %vm1870_vm5, %v1854_v26, %v4101_v25  ;;  %v1822_v13 = vsel %vm1804_vm3, %v1789_v59, %v4081_v40 }
 0x1b0   : > { %1722 = vrot.lane.b32.xlu1 %v4189_v37, %s3002_s13  ;;  %1340 = vrot.lane.b32.xlu0 %v4191_v61, %s2999_s8  ;;  %v1920_v7 = vsel %vm1903_vm6, %v1887_v57, %v1325_v27  ;;  %v1855_v46 = vsel %vm1837_vm4, %v1822_v13, %v4103_v44 }
 0x1b1   : > { %v1953_v54 = vsel %vm1936_vm7, %v1920_v7, %v1453_v36  ;;  %v1888_v43 = vsel %vm1870_vm5, %v1855_v46, %v4156_v60  ;;  %v4283_v60 = vld [vmem:[#allocation2 + $0x184] sm:$0xff]  ;;  %v477_v7 = vld [vmem:[#allocation2 + $0xd8] sm:$0xff] }
 0x1b2   : > { %v1581_v32 = vpop.permute.xlu1 %1580  ;;  %v1455_v4 = vpop.permute.xlu0 %1454 }
 0x1b3   : > { %v1986_v28 = vsel %vm1969_vm8, %v1953_v54, %v1581_v32 }
 0x1b4   : > { %960 = vrot.lane.b32.xlu1 %v4201_v0, %s2996_s30  ;;  %834 = vrot.lane.b32.xlu0 %v4028_v48, %s2997_s6 }
 0x1b6   : > { %v4215_v56 = vpop.permute.xlu1 %1200  ;;  %v4217_v23 = vpop.permute.xlu0 %1074 }
 0x1b8   : > { %v4222_v30 = vpop.f32.mrb[2].mxu0  ;;  %1468 = vrot.lane.b32.xlu1 %v3899_v24, %s3000_s24  ;;  %1342 = vrot.lane.b32.xlu0 %v4211_v50, %s2999_s8 }
 0x1b9   : > { %v4231_v6 = vmul.f32 %v4222_v30, %v4222_v30  ;;  %2544 = vst.msk [vmem:[%s4110_s22 + $0x18] sm:$0xff] %vm378_vm0, %v4222_v30  ;;  %v4236_v25 = vpop.f32.mrb[3].mxu0 }
 0x1ba   : > { %v2906_v24 = vpack.c.bf16 %v4222_v30, %v4236_v25  ;;  %v4245_v8 = vmul.f32 %v4236_v25, %v4236_v25  ;;  %2543 = vst.msk [vmem:[%s4110_s22 + $0x10] sm:$0xff] %vm378_vm0, %v4236_v25  ;;  %v1709_v45 = vpop.permute.xlu1 %1708  ;;  %v1583_v1 = vpop.permute.xlu0 %1582  ;;  %v3003_v30 = vmov 1.0  }
 0x1bb   : > { %v2019_v11 = vsel %vm2002_vm9, %v1986_v28, %v1709_v45  ;;  %2430 = vmatprep.mubr.f32.mxu1 %v3003_v30 }
 0x1bc   : > { %1088 = vrot.lane.b32.xlu1 %v3915_v16, %s2995_s29  ;;  %962 = vrot.lane.b32.xlu0 %v4238_v15, %s2996_s30  ;;  %v1921_v16 = vsel %vm1903_vm6, %v1888_v43, %v1327_v2 }
 0x1bd   : > { %2860 = vmatprep.mubr.msk.f32.mxu0 %vm2044_vm10, %v2019_v11  ;;  %v1954_v40 = vsel %vm1936_vm7, %v1921_v16, %v1455_v4  ;;  %v553_v16 = vld [vmem:[#allocation2 + $0x1b8] sm:$0xff] }
 0x1be   : > { %v4264_v27 = vpop.permute.xlu1 %1202  ;;  %v4266_v35 = vpop.permute.xlu0 %820  ;;  %v1987_v36 = vsel %vm1969_vm8, %v1954_v40, %v1583_v1  ;;  %v4316_v1 = vld [vmem:[#allocation2 + $0x1a2] sm:$0xff] }
 0x1c0   : > { %1596 = vrot.lane.b32.xlu1 %v4061_v17, %s3001_s10  ;;  %1470 = vrot.lane.b32.xlu0 %v3913_v41, %s3000_s24 }
 0x1c2   : > { %v1711_v44 = vpop.permute.xlu1 %1710  ;;  %v1329_v62 = vpop.permute.xlu0 %1328 }
 0x1c3   : > { %v2020_v32 = vsel %vm2002_vm9, %v1987_v36, %v1711_v44 }
 0x1c4   : > { %1216 = vrot.lane.b32.xlu1 %v4077_v51, %s2998_s7  ;;  %1090 = vrot.lane.b32.xlu0 %v3935_v31, %s2995_s29  ;;  %v4297_v31 = vld [vmem:[#allocation2 + $0x18c] sm:$0xff] }
 0x1c5   : > { %2861 = vmatmul.mubr.msk.f32.gmra.mrb[16].mxu0 %vm2044_vm10, %v2020_v32 }
 0x1c6   : > { %v4285_v2 = vpop.permute.xlu1 %948  ;;  %v4287_v41 = vpop.permute.xlu0 %822 }
 0x1c8   : > { %1724 = vrot.lane.b32.xlu1 %v4283_v60, %s3002_s13  ;;  %1598 = vrot.lane.b32.xlu0 %v4075_v9, %s3001_s10 }
 0x1ca   : > { %v1457_v4 = vpop.permute.xlu1 %1456  ;;  %v1331_v38 = vpop.permute.xlu0 %1330 }
 0x1cc   : > { %1218 = vrot.lane.b32.xlu1 %v4097_v55, %s2998_s7  ;;  %836 = vrot.lane.b32.xlu0 %v4087_v5, %s2997_s6  ;;  %v1790_v5 = vsel %vm378_vm0, %v477_v7, %v4158_v34 }
 0x1cd   : > { %v1823_v45 = vsel %vm1804_vm3, %v1790_v5, %v4177_v19 }
 0x1ce   : > { %v4301_v26 = vpop.permute.xlu1 %1076  ;;  %v4303_v57 = vpop.permute.xlu0 %950  ;;  %v1856_v11 = vsel %vm1837_vm4, %v1823_v45, %v4193_v20 }
 0x1cf   : > { %v1889_v34 = vsel %vm1870_vm5, %v1856_v11, %v4215_v56 }
 0x1d0   : > { %1726 = vrot.lane.b32.xlu1 %v4297_v31, %s3002_s13  ;;  %1344 = vrot.lane.b32.xlu0 %v4299_v10, %s2999_s8  ;;  %v1922_v46 = vsel %vm1903_vm6, %v1889_v34, %v1329_v62 }
 0x1d1   : > { %v1955_v19 = vsel %vm1936_vm7, %v1922_v46, %v1457_v4 }
 0x1d2   : > { %v1585_v54 = vpop.permute.xlu1 %1584  ;;  %v1459_v28 = vpop.permute.xlu0 %1458 }
 0x1d3   : > { %v1988_v40 = vsel %vm1969_vm8, %v1955_v19, %v1585_v54 }
 0x1d4   : > { %964 = vrot.lane.b32.xlu1 %v552_v47, %s2996_s30  ;;  %838 = vrot.lane.b32.xlu0 %v4130_v39, %s2997_s6  ;;  %v478_v39 = vld [vmem:[#allocation2 + $0xe0] sm:$0xff] }
 0x1d5   : > { %v1791_v4 = vsel %vm378_vm0, %v478_v39, %v4179_v52 }
 0x1d6   : > { %v4320_v59 = vpop.permute.xlu1 %1204  ;;  %v4322_v13 = vpop.permute.xlu0 %1078  ;;  %v1824_v47 = vsel %vm1804_vm3, %v1791_v4, %v4195_v22  ;;  %v649_v4 = vld [vmem:[#allocation2 + $0x1ba] sm:$0xff] }
 0x1d7   : > { %v1857_v54 = vsel %vm1837_vm4, %v1824_v47, %v4217_v23 }
 0x1d8   : > { %v4327_v43 = vpop.f32.mrb[4].mxu0  ;;  %1472 = vrot.lane.b32.xlu1 %v3979_v58, %s3000_s24  ;;  %1346 = vrot.lane.b32.xlu0 %v4316_v1, %s2999_s8  ;;  %v1890_v52 = vsel %vm1870_vm5, %v1857_v54, %v4264_v27  ;;  %v4385_v27 = vld [vmem:[#allocation2 + $0x19c] sm:$0xff] }
 0x1d9   : > { %v4336_v20 = vmul.f32 %v4327_v43, %v4327_v43  ;;  %2546 = vst.msk [vmem:[%s4110_s22 + $0x28] sm:$0xff] %vm378_vm0, %v4327_v43  ;;  %v4341_v56 = vpop.f32.mrb[5].mxu0  ;;  %v1923_v11 = vsel %vm1903_vm6, %v1890_v52, %v1331_v38 }
 0x1da   : > { %v2910_v58 = vpack.c.bf16 %v4327_v43, %v4341_v56  ;;  %v4348_v36 = vmul.f32 %v4341_v56, %v4341_v56  ;;  %2545 = vst.msk [vmem:[%s4110_s22 + $0x20] sm:$0xff] %vm378_vm0, %v4341_v56  ;;  %v1713_v44 = vpop.permute.xlu1 %1712  ;;  %v1587_v62 = vpop.permute.xlu0 %1586 }
 0x1db   : > { %v2021_v32 = vsel %vm2002_vm9, %v1988_v40, %v1713_v44  ;;  %v479_v40 = vld [vmem:[#allocation2 + $0xf0] sm:$0xff]  ;;  %v554_v44 = vld [vmem:[#allocation2 + $0x1c8] sm:$0xff] }
 0x1dc   : > { %1092 = vrot.lane.b32.xlu1 %v3995_v63, %s2995_s29  ;;  %966 = vrot.lane.b32.xlu0 %v553_v16, %s2996_s30  ;;  %v1956_v63 = vsel %vm1936_vm7, %v1923_v11, %v1459_v28 }
 0x1dd   : > { %2863 = vmatprep.mubr.msk.f32.mxu0 %vm2044_vm10, %v2021_v32  ;;  %v1989_v22 = vsel %vm1969_vm8, %v1956_v63, %v1587_v62 }
 0x1de   : > { %v4366_v5 = vpop.permute.xlu1 %1206  ;;  %v4368_v45 = vpop.permute.xlu0 %824 }
 0x1e0   : > { %1600 = vrot.lane.b32.xlu1 %v4175_v53, %s3001_s10  ;;  %1474 = vrot.lane.b32.xlu0 %v3993_v21, %s3000_s24 }
 0x1e2   : > { %v1715_v23 = vpop.permute.xlu1 %1714  ;;  %v1333_v34 = vpop.permute.xlu0 %1332 }
 0x1e3   : > { %v2022_v46 = vsel %vm2002_vm9, %v1989_v22, %v1715_v23  ;;  %v555_v22 = vld [vmem:[#allocation2 + $0x1d0] sm:$0xff] }
 0x1e4   : > { %1220 = vrot.lane.b32.xlu1 %v4191_v61, %s2998_s7  ;;  %1094 = vrot.lane.b32.xlu0 %v4015_v29, %s2995_s29  ;;  %v4399_v29 = vld [vmem:[#allocation2 + $0x1a4] sm:$0xff]  ;;  %v648_v61 = vld [vmem:[#allocation2 + $0x1b2] sm:$0xff] }
 0x1e5   : > { %2864 = vmatmul.mubr.msk.f32.gmra.mrb[18].mxu0 %vm2044_vm10, %v2022_v46 }
 0x1e6   : > { %v4387_v38 = vpop.permute.xlu1 %952  ;;  %v4389_v21 = vpop.permute.xlu0 %826 }
 0x1e8   : > { %1728 = vrot.lane.b32.xlu1 %v4385_v27, %s3002_s13  ;;  %1602 = vrot.lane.b32.xlu0 %v4189_v37, %s3001_s10 }
 0x1ea   : > { %v1461_v28 = vpop.permute.xlu1 %1460  ;;  %v1335_v39 = vpop.permute.xlu0 %1334 }
 0x1ec   : > { %1222 = vrot.lane.b32.xlu1 %v4211_v50, %s2998_s7  ;;  %840 = vrot.lane.b32.xlu0 %v4201_v0, %s2997_s6  ;;  %v1792_v50 = vsel %vm378_vm0, %v479_v40, %v4266_v35 }
 0x1ed   : > { %v1825_v0 = vsel %vm1804_vm3, %v1792_v50, %v4285_v2 }
 0x1ee   : > { %v4401_v19 = vpop.permute.xlu1 %1080  ;;  %v4403_v16 = vpop.permute.xlu0 %954  ;;  %v1858_v47 = vsel %vm1837_vm4, %v1825_v0, %v4301_v26 }
 0x1ef   : > { %v1891_v35 = vsel %vm1870_vm5, %v1858_v47, %v4320_v59 }
 0x1f0   : > { %1730 = vrot.lane.b32.xlu1 %v4399_v29, %s3002_s13  ;;  %1348 = vrot.lane.b32.xlu0 %v648_v61, %s2999_s8  ;;  %v1924_v11 = vsel %vm1903_vm6, %v1891_v35, %v1333_v34 }
 0x1f1   : > { %v1957_v2 = vsel %vm1936_vm7, %v1924_v11, %v1461_v28 }
 0x1f2   : > { %v1589_v62 = vpop.permute.xlu1 %1588  ;;  %v1463_v32 = vpop.permute.xlu0 %1462 }
 0x1f3   : > { %v1990_v23 = vsel %vm1969_vm8, %v1957_v2, %v1589_v62 }
 0x1f4   : > { %968 = vrot.lane.b32.xlu1 %v554_v44, %s2996_s30  ;;  %842 = vrot.lane.b32.xlu0 %v4238_v15, %s2997_s6  ;;  %v480_v15 = vld [vmem:[#allocation2 + $0xf8] sm:$0xff]  ;;  %s235_s6 = scalar_lea.vmem %s4843_s5, %s2668_s21 }
 0x1f5   : > { %v1793_v40 = vsel %vm378_vm0, %v480_v15, %v4287_v41 }
 0x1f6   : > { %v4417_v54 = vpop.permute.xlu1 %1208  ;;  %v4419_v52 = vpop.permute.xlu0 %1082  ;;  %v1826_v62 = vsel %vm1804_vm3, %v1793_v40, %v4303_v57 }
 0x1f7   : > { %v1859_v50 = vsel %vm1837_vm4, %v1826_v62, %v4322_v13 }
 0x1f8   : > { %v4424_v63 = vpop.f32.mrb[6].mxu0  ;;  %1476 = vrot.lane.b32.xlu1 %v4061_v17, %s3000_s24  ;;  %1350 = vrot.lane.b32.xlu0 %v649_v4, %s2999_s8  ;;  %v1892_v41 = vsel %vm1870_vm5, %v1859_v50, %v4366_v5 }
 0x1f9   : > { %v4432_v26 = vmul.f32 %v4424_v63, %v4424_v63  ;;  %2548 = vst.msk [vmem:[%s4110_s22 + $0x38] sm:$0xff] %vm378_vm0, %v4424_v63  ;;  %v4437_v59 = vpop.f32.mrb[7].mxu0  ;;  %v1925_v47 = vsel %vm1903_vm6, %v1892_v41, %v1335_v39  ;;  %v650_v39 = vld [vmem:[#allocation2 + $0x1ca] sm:$0xff] }
 0x1fa   : > { %v2914_v17 = vpack.c.bf16 %v4424_v63, %v4437_v59  ;;  %v4444_v34 = vmul.f32 %v4437_v59, %v4437_v59  ;;  %2547 = vst.msk [vmem:[%s4110_s22 + $0x30] sm:$0xff] %vm378_vm0, %v4437_v59  ;;  %v1717_v46 = vpop.permute.xlu1 %1716  ;;  %v1591_v28 = vpop.permute.xlu0 %1590 }
 0x1fb   : > { %v2023_v61 = vsel %vm2002_vm9, %v1990_v23, %v1717_v46  ;;  %v481_v23 = vld [vmem:[#allocation2 + $0x108] sm:$0xff] }
 0x1fc   : > { %1096 = vrot.lane.b32.xlu1 %v4077_v51, %s2995_s29  ;;  %970 = vrot.lane.b32.xlu0 %v555_v22, %s2996_s30  ;;  %v1958_v51 = vsel %vm1936_vm7, %v1925_v47, %v1463_v32  ;;  %v746_v47 = vld [vmem:[#allocation2 + $0x1cc] sm:$0xff] }
 0x1fd   : > { %2866 = vmatprep.mubr.msk.f32.mxu0 %vm2044_vm10, %v2023_v61  ;;  %v1991_v57 = vsel %vm1969_vm8, %v1958_v51, %v1591_v28  ;;  %v1794_v28 = vsel %vm378_vm0, %v481_v23, %v4368_v45 }
 0x1fe   : > { %v4462_v0 = vpop.permute.xlu1 %1210  ;;  %v4464_v4 = vpop.permute.xlu0 %828 }
 0x200   : > { %1604 = vrot.lane.b32.xlu1 %v4283_v60, %s3001_s10  ;;  %1478 = vrot.lane.b32.xlu0 %v4075_v9, %s3000_s24  ;;  %v744_v60 = vld [vmem:[#allocation2 + $0x1b4] sm:$0xff] }
 0x202   : > { %v1719_v13 = vpop.permute.xlu1 %1718  ;;  %v1337_v35 = vpop.permute.xlu0 %1336 }
 0x203   : > { %v2024_v11 = vsel %vm2002_vm9, %v1991_v57, %v1719_v13 }
 0x204   : > { %1224 = vrot.lane.b32.xlu1 %v4299_v10, %s2998_s7  ;;  %1098 = vrot.lane.b32.xlu0 %v4097_v55, %s2995_s29  ;;  %v651_v55 = vld [vmem:[#allocation2 + $0x1d2] sm:$0xff]  ;;  %v745_v10 = vld [vmem:[#allocation2 + $0x1bc] sm:$0xff] }
 0x205   : > { %2867 = vmatmul.mubr.msk.f32.gmra.mrb[20].mxu0 %vm2044_vm10, %v2024_v11 }
 0x206   : > { %v4481_v5 = vpop.permute.xlu1 %956  ;;  %v4483_v9 = vpop.permute.xlu0 %830 }
 0x208   : > { %1732 = vrot.lane.b32.xlu1 %v744_v60, %s3002_s13  ;;  %1606 = vrot.lane.b32.xlu0 %v4297_v31, %s3001_s10 }
 0x20a   : > { %v1465_v32 = vpop.permute.xlu1 %1464  ;;  %v1339_v15 = vpop.permute.xlu0 %1338 }
 0x20c   : > { %1352 = vrot.lane.b32.xlu1 %v650_v39, %s2999_s8  ;;  %1226 = vrot.lane.b32.xlu0 %v4316_v1, %s2998_s7  ;;  %v1827_v1 = vsel %vm1804_vm3, %v1794_v28, %v4387_v38 }
 0x20d   : > { %v1860_v61 = vsel %vm1837_vm4, %v1827_v1, %v4401_v19 }
 0x20e   : > { %v1085_v2 = vpop.permute.xlu1 %1084  ;;  %v4491_v22 = vpop.permute.xlu0 %958  ;;  %v1893_v50 = vsel %vm1870_vm5, %v1860_v61, %v4417_v54  ;;  %v747_v54 = vld [vmem:[#allocation2 + $0x1d4] sm:$0xff] }
 0x20f   : > { %v1926_v45 = vsel %vm1903_vm6, %v1893_v50, %v1337_v35 }
 0x210   : > { %1354 = vrot.lane.b32.xlu1 %v651_v55, %s2999_s8  ;;  %1734 = vrot.lane.b32.xlu0 %v745_v10, %s3002_s13 }
 0x212   : > { %v1593_v46 = vpop.permute.xlu1 %1592  ;;  %v1467_v31 = vpop.permute.xlu0 %1466 }
 0x214   : > { %1482 = vrot.lane.b32.xlu1 %v4189_v37, %s3000_s24  ;;  %1480 = vrot.lane.b32.xlu0 %v4175_v53, %s3000_s24  ;;  %v482_v53 = vld [vmem:[#allocation2 + $0x110] sm:$0xff]  ;;  %v1959_v37 = vsel %vm1936_vm7, %v1926_v45, %v1465_v32 }
 0x215   : > { %v1992_v51 = vsel %vm1969_vm8, %v1959_v37, %v1593_v46  ;;  %v1795_v11 = vsel %vm378_vm0, %v482_v53, %v4389_v21 }
 0x216   : > { %v1213_v40 = vpop.permute.xlu1 %1212  ;;  %v4505_v62 = vpop.permute.xlu0 %1086  ;;  %v1828_v39 = vsel %vm1804_vm3, %v1795_v11, %v4403_v16 }
 0x217   : > { %v1861_v32 = vsel %vm1837_vm4, %v1828_v39, %v4419_v52 }
 0x218   : > { %v4510_v41 = vpop.f32.mrb[8].mxu0  ;;  %1610 = vrot.lane.b32.xlu1 %v4399_v29, %s3001_s10  ;;  %1608 = vrot.lane.b32.xlu0 %v4385_v27, %s3001_s10  ;;  %v1894_v21 = vsel %vm1870_vm5, %v1861_v32, %v4462_v0 }
 0x219   : > { %v4519_v38 = vmul.f32 %v4510_v41, %v4510_v41  ;;  %2550 = vst.msk [vmem:[%s4110_s22 + $0x48] sm:$0xff] %vm378_vm0, %v4510_v41  ;;  %v4524_v19 = vpop.f32.mrb[9].mxu0  ;;  %v1927_v23 = vsel %vm1903_vm6, %v1894_v21, %v1339_v15  ;;  %v483_v15 = vld [vmem:[#allocation2 + $0x120] sm:$0xff]  ;;  %v484_v21 = vld [vmem:[#allocation2 + $0x128] sm:$0xff] }
 0x21a   : > { %v2918_v29 = vpack.c.bf16 %v4510_v41, %v4524_v19  ;;  %v4531_v27 = vmul.f32 %v4524_v19, %v4524_v19  ;;  %2549 = vst.msk [vmem:[%s4110_s22 + $0x40] sm:$0xff] %vm378_vm0, %v4524_v19  ;;  %v1721_v57 = vpop.permute.xlu1 %1720  ;;  %v1595_v13 = vpop.permute.xlu0 %1594  ;;  %v1960_v46 = vsel %vm1936_vm7, %v1927_v23, %v1467_v31 }
 0x21b   : > { %v2025_v35 = vsel %vm2002_vm9, %v1992_v51, %v1721_v57  ;;  %v1993_v28 = vsel %vm1969_vm8, %v1960_v46, %v1595_v13 }
 0x21c   : > { %1738 = vrot.lane.b32.xlu1 %v747_v54, %s3002_s13  ;;  %1736 = vrot.lane.b32.xlu0 %v746_v47, %s3002_s13  ;;  %v1796_v47 = vsel %vm378_vm0, %v483_v15, %v4464_v4 }
 0x21d   : > { %2869 = vmatprep.mubr.msk.f32.mxu0 %vm2044_vm10, %v2025_v35  ;;  %v1829_v51 = vsel %vm1804_vm3, %v1796_v47, %v4481_v5 }
 0x21e   : > { %v1215_v55 = vpop.permute.xlu1 %1214  ;;  %v4548_v10 = vpop.permute.xlu0 %832  ;;  %v1862_v57 = vsel %vm1837_vm4, %v1829_v51, %v1085_v2 }
 0x21f   : > { %v1895_v11 = vsel %vm1870_vm5, %v1862_v57, %v1213_v40 }
 0x222   : > { %v1723_v1 = vpop.permute.xlu1 %1722  ;;  %v1341_v61 = vpop.permute.xlu0 %1340 }
 0x223   : > { %v2026_v16 = vsel %vm2002_vm9, %v1993_v28, %v1723_v1  ;;  %v1928_v39 = vsel %vm1903_vm6, %v1895_v11, %v1341_v61 }
 0x224   : > { %2870 = vmatmul.mubr.msk.f32.gmra.mrb[22].mxu0 %vm2044_vm10, %v2026_v16  ;;  %v1797_v16 = vsel %vm378_vm0, %v484_v21, %v4483_v9 }
 0x225   : > { %v1830_v15 = vsel %vm1804_vm3, %v1797_v16, %v4491_v22 }
 0x226   : > { %v961_v50 = vpop.permute.xlu1 %960  ;;  %v4557_v52 = vpop.permute.xlu0 %834 }
 0x22a   : > { %v1469_v45 = vpop.permute.xlu1 %1468  ;;  %v1343_v53 = vpop.permute.xlu0 %1342 }
 0x22b   : > { %v1961_v23 = vsel %vm1936_vm7, %v1928_v39, %v1469_v45  ;;  %v486_v45 = vld [vmem:[#allocation2 + $0x140] sm:$0xff] }
 0x22e   : > { %v1089_v37 = vpop.permute.xlu1 %1088  ;;  %v4559_v0 = vpop.permute.xlu0 %962 }
 0x232   : > { %v1597_v54 = vpop.permute.xlu1 %1596  ;;  %v1471_v31 = vpop.permute.xlu0 %1470 }
 0x233   : > { %v1994_v2 = vsel %vm1969_vm8, %v1961_v23, %v1597_v54  ;;  %v1863_v54 = vsel %vm1837_vm4, %v1830_v15, %v4505_v62 }
 0x234   : > { %v1896_v57 = vsel %vm1870_vm5, %v1863_v54, %v1215_v55 }
 0x235   : > { %v1929_v11 = vsel %vm1903_vm6, %v1896_v57, %v1343_v53  ;;  %v485_v53 = vld [vmem:[#allocation2 + $0x138] sm:$0xff] }
 0x236   : > { %v1217_v13 = vpop.permute.xlu1 %1216  ;;  %v4566_v35 = vpop.permute.xlu0 %1090  ;;  %v1962_v9 = vsel %vm1936_vm7, %v1929_v11, %v1471_v31 }
 0x238   : > { %v4570_v32 = vpop.f32.mrb[10].mxu0 }
 0x239   : > { %v4575_v4 = vmul.f32 %v4570_v32, %v4570_v32  ;;  %2552 = vst.msk [vmem:[%s4110_s22 + $0x58] sm:$0xff] %vm378_vm0, %v4570_v32  ;;  %v4580_v5 = vpop.f32.mrb[11].mxu0 }
 0x23a   : > { %v4587_v46 = vmul.f32 %v4580_v5, %v4580_v5  ;;  %2551 = vst.msk [vmem:[%s4110_s22 + $0x50] sm:$0xff] %vm378_vm0, %v4580_v5  ;;  %v1725_v28 = vpop.permute.xlu1 %1724  ;;  %v1599_v1 = vpop.permute.xlu0 %1598 }
 0x23b   : > { %v2027_v61 = vsel %vm2002_vm9, %v1994_v2, %v1725_v28  ;;  %v1995_v39 = vsel %vm1969_vm8, %v1962_v9, %v1599_v1  ;;  %v1798_v1 = vsel %vm378_vm0, %v485_v53, %v4548_v10 }
 0x23c   : > { %2872 = vmatprep.mubr.msk.f32.mxu0 %vm2044_vm10, %v2027_v61  ;;  %v1831_v54 = vsel %vm1804_vm3, %v1798_v1, %v961_v50 }
 0x23d   : > { %v1864_v57 = vsel %vm1837_vm4, %v1831_v54, %v1089_v37  ;;  %v1799_v54 = vsel %vm378_vm0, %v486_v45, %v4557_v52 }
 0x23e   : > { %v1219_v47 = vpop.permute.xlu1 %1218  ;;  %v4602_v51 = vpop.permute.xlu0 %836 }
 0x242   : > { %v1727_v21 = vpop.permute.xlu1 %1726  ;;  %v1345_v23 = vpop.permute.xlu0 %1344 }
 0x243   : > { %v2028_v2 = vsel %vm2002_vm9, %v1995_v39, %v1727_v21  ;;  %v1897_v39 = vsel %vm1870_vm5, %v1864_v57, %v1217_v13 }
 0x244   : > { %2873 = vmatmul.mubr.msk.f32.gmra.mrb[24].mxu0 %vm2044_vm10, %v2028_v2  ;;  %v1930_v21 = vsel %vm1903_vm6, %v1897_v39, %v1345_v23 }
 0x246   : > { %v965_v22 = vpop.permute.xlu1 %964  ;;  %v4610_v28 = vpop.permute.xlu0 %838 }
 0x24a   : > { %v1473_v62 = vpop.permute.xlu1 %1472  ;;  %v1347_v61 = vpop.permute.xlu0 %1346 }
 0x24b   : > { %v1963_v60 = vsel %vm1936_vm7, %v1930_v21, %v1473_v62 }
 0x24e   : > { %v1093_v16 = vpop.permute.xlu1 %1092  ;;  %v4612_v55 = vpop.permute.xlu0 %966 }
 0x252   : > { %v1601_v15 = vpop.permute.xlu1 %1600  ;;  %v1475_v31 = vpop.permute.xlu0 %1474 }
 0x253   : > { %v1996_v37 = vsel %vm1969_vm8, %v1963_v60, %v1601_v15  ;;  %v1832_v15 = vsel %vm1804_vm3, %v1799_v54, %v4559_v0 }
 0x254   : > { %v1865_v57 = vsel %vm1837_vm4, %v1832_v15, %v4566_v35 }
 0x255   : > { %v1898_v44 = vsel %vm1870_vm5, %v1865_v57, %v1219_v47  ;;  %v487_v47 = vld [vmem:[#allocation2 + $0x150] sm:$0xff] }
 0x256   : > { %v1221_v11 = vpop.permute.xlu1 %1220  ;;  %v4618_v9 = vpop.permute.xlu0 %1094 }
 0x258   : > { %v4622_v2 = vpop.f32.mrb[12].mxu0 }
 0x259   : > { %v4627_v10 = vmul.f32 %v4622_v2, %v4622_v2  ;;  %2554 = vst.msk [vmem:[%s4110_s22 + $0x68] sm:$0xff] %vm378_vm0, %v4622_v2  ;;  %v4632_v50 = vpop.f32.mrb[13].mxu0 }
 0x25a   : > { %v4639_v23 = vmul.f32 %v4632_v50, %v4632_v50  ;;  %2553 = vst.msk [vmem:[%s4110_s22 + $0x60] sm:$0xff] %vm378_vm0, %v4632_v50  ;;  %v1729_v62 = vpop.permute.xlu1 %1728  ;;  %v1603_v53 = vpop.permute.xlu0 %1602 }
 0x25b   : > { %v2029_v1 = vsel %vm2002_vm9, %v1996_v37, %v1729_v62  ;;  %v1931_v37 = vsel %vm1903_vm6, %v1898_v44, %v1347_v61  ;;  %v1800_v61 = vsel %vm378_vm0, %v487_v47, %v4602_v51 }
 0x25c   : > { %2875 = vmatprep.mubr.msk.f32.mxu0 %vm2044_vm10, %v2029_v1  ;;  %v1964_v62 = vsel %vm1936_vm7, %v1931_v37, %v1475_v31  ;;  %v1833_v31 = vsel %vm1804_vm3, %v1800_v61, %v965_v22  ;;  %v1801_v61 = vsel %vm378_vm0, %v488_v3, %v4610_v28 }
 0x25d   : > { %v1997_v52 = vsel %vm1969_vm8, %v1964_v62, %v1603_v53  ;;  %v1866_v53 = vsel %vm1837_vm4, %v1833_v31, %v1093_v16 }
 0x25e   : > { %v1223_v39 = vpop.permute.xlu1 %1222  ;;  %v841_v21 = vpop.permute.xlu0 %840 }
 0x262   : > { %v1731_v45 = vpop.permute.xlu1 %1730  ;;  %v1349_v60 = vpop.permute.xlu0 %1348 }
 0x263   : > { %v2030_v1 = vsel %vm2002_vm9, %v1997_v52, %v1731_v45  ;;  %v1899_v52 = vsel %vm1870_vm5, %v1866_v53, %v1221_v11 }
 0x264   : > { %2876 = vmatmul.mubr.msk.f32.gmra.mrb[26].mxu0 %vm2044_vm10, %v2030_v1  ;;  %v1932_v45 = vsel %vm1903_vm6, %v1899_v52, %v1349_v60 }
 0x266   : > { %v969_v0 = vpop.permute.xlu1 %968  ;;  %v843_v54 = vpop.permute.xlu0 %842 }
 0x26a   : > { %v1477_v7 = vpop.permute.xlu1 %1476  ;;  %v1351_v35 = vpop.permute.xlu0 %1350 }
 0x26b   : > { %v1965_v13 = vsel %vm1936_vm7, %v1932_v45, %v1477_v7 }
 0x26e   : > { %v1097_v15 = vpop.permute.xlu1 %1096  ;;  %v971_v14 = vpop.permute.xlu0 %970 }
 0x272   : > { %v1605_v57 = vpop.permute.xlu1 %1604  ;;  %v1479_v44 = vpop.permute.xlu0 %1478 }
 0x273   : > { %v1998_v22 = vsel %vm1969_vm8, %v1965_v13, %v1605_v57  ;;  %v1834_v57 = vsel %vm1804_vm3, %v1801_v61, %v4612_v55  ;;  %v489_v55 = vld [vmem:[#allocation2 + $0x168] sm:$0xff] }
 0x274   : > { %v1867_v31 = vsel %vm1837_vm4, %v1834_v57, %v4618_v9  ;;  %v1802_v9 = vsel %vm378_vm0, %v489_v55, %v841_v21 }
 0x275   : > { %v1900_v45 = vsel %vm1870_vm5, %v1867_v31, %v1223_v39  ;;  %v1803_v39 = vsel %vm378_vm0, %v4028_v48, %v843_v54 }
 0x276   : > { %v1225_v37 = vpop.permute.xlu1 %1224  ;;  %v1099_v62 = vpop.permute.xlu0 %1098 }
 0x278   : > { %v4666_v1 = vpop.f32.mrb[14].mxu0 }
 0x279   : > { %v4671_v40 = vmul.f32 %v4666_v1, %v4666_v1  ;;  %2556 = vst.msk [vmem:[%s4110_s22 + $0x78] sm:$0xff] %vm378_vm0, %v4666_v1  ;;  %v4676_v51 = vpop.f32.mrb[15].mxu0 }
 0x27a   : > { %v4683_v11 = vmul.f32 %v4676_v51, %v4676_v51  ;;  %2555 = vst.msk [vmem:[%s4110_s22 + $0x70] sm:$0xff] %vm378_vm0, %v4676_v51  ;;  %v1733_v7 = vpop.permute.xlu1 %1732  ;;  %v1607_v60 = vpop.permute.xlu0 %1606 }
 0x27b   : > { %v2031_v47 = vsel %vm2002_vm9, %v1998_v22, %v1733_v7  ;;  %v1933_v22 = vsel %vm1903_vm6, %v1900_v45, %v1351_v35  ;;  %v1835_v35 = vsel %vm1804_vm3, %v1802_v9, %v969_v0 }
 0x27c   : > { %2878 = vmatprep.mubr.msk.f32.mxu0 %vm2044_vm10, %v2031_v47  ;;  %v1966_v7 = vsel %vm1936_vm7, %v1933_v22, %v1479_v44  ;;  %v1836_v44 = vsel %vm1804_vm3, %v1803_v39, %v971_v14 }
 0x27d   : > { %v1999_v3 = vsel %vm1969_vm8, %v1966_v7, %v1607_v60  ;;  %v1868_v60 = vsel %vm1837_vm4, %v1835_v35, %v1097_v15  ;;  %v1869_v57 = vsel %vm1837_vm4, %v1836_v44, %v1099_v62 }
 0x27e   : > { %v1353_v53 = vpop.permute.xlu1 %1352  ;;  %v1227_v52 = vpop.permute.xlu0 %1226  ;;  %v1901_v45 = vsel %vm1870_vm5, %v1868_v60, %v1225_v37 }
 0x27f   : > { %v1902_v22 = vsel %vm1870_vm5, %v1869_v57, %v1227_v52  ;;  %v1934_v21 = vsel %vm1903_vm6, %v1901_v45, %v1353_v53 }
 0x282   : > { %v1355_v28 = vpop.permute.xlu1 %1354  ;;  %v1735_v13 = vpop.permute.xlu0 %1734 }
 0x283   : > { %v2032_v47 = vsel %vm2002_vm9, %v1999_v3, %v1735_v13  ;;  %v1935_v7 = vsel %vm1903_vm6, %v1902_v22, %v1355_v28 }
 0x284   : > { %2879 = vmatmul.mubr.msk.f32.gmra.mrb[28].mxu0 %vm2044_vm10, %v2032_v47 }
 0x286   : > { %v1483_v61 = vpop.permute.xlu1 %1482  ;;  %v1481_v16 = vpop.permute.xlu0 %1480 }
 0x287   : > { %v1968_v48 = vsel %vm1936_vm7, %v1935_v7, %v1483_v61  ;;  %v1967_v14 = vsel %vm1936_vm7, %v1934_v21, %v1481_v16 }
 0x28a   : > { %v1611_v31 = vpop.permute.xlu1 %1610  ;;  %v1609_v13 = vpop.permute.xlu0 %1608 }
 0x28b   : > { %v2001_v0 = vsel %vm1969_vm8, %v1968_v48, %v1611_v31  ;;  %v2000_v54 = vsel %vm1969_vm8, %v1967_v14, %v1609_v13 }
 0x28e   : > { %v1739_v15 = vpop.permute.xlu1 %1738  ;;  %v1737_v62 = vpop.permute.xlu0 %1736 }
 0x28f   : > { %v2034_v37 = vsel %vm2002_vm9, %v2001_v0, %v1739_v15  ;;  %v2033_v52 = vsel %vm2002_vm9, %v2000_v54, %v1737_v62 }
 0x290   : > { %2881 = vmatprep.mubr.msk.f32.mxu0 %vm2044_vm10, %v2033_v52 }
 0x291   : > { %2882 = vmatmul.mubr.msk.f32.gmra.mrb[30].mxu0 %vm2044_vm10, %v2034_v37  ;;  %v4845_v37 = vpack.c.bf16 %v4570_v32, %v4580_v5 }
 0x298   : > { %v2862_v53 = vpop.f32.mrb[16].mxu0 }
 0x299   : > { %v4723_v3 = vmul.f32 %v2862_v53, %v2862_v53  ;;  %2558 = vst.msk [vmem:[%s4110_s22 + $0x88] sm:$0xff] %vm378_vm0, %v2862_v53  ;;  %v2287_v16 = vpop.f32.mrb[17].mxu0 }
 0x29a   : > { %v4727_v28 = vmul.f32 %v2287_v16, %v2287_v16  ;;  %2557 = vst.msk [vmem:[%s4110_s22 + $0x80] sm:$0xff] %vm378_vm0, %v2287_v16  ;;  %v2900_v47 = vpack.c.bf16 %v2862_v53, %v2287_v16 }
 0x29c   : > { %2901 = vmatprep.subr.bf16.mxu1 %v2900_v47  ;;  %v2932_v55 = vpack.c.bf16 %v4723_v3, %v4727_v28  ;;  %v4846_v47 = vpack.c.bf16 %v4622_v2, %v4632_v50  ;;  %v4848_v2 = vpack.c.bf16 %v4123_v49, %v4135_v12  ;;  %v4849_v50 = vpack.c.bf16 %v4231_v6, %v4245_v8 }
 0x29d   : > { %2903 = vmatpush3.bf16.msra.mxu1 %v2902_v18  ;;  %v4851_v49 = vpack.c.bf16 %v4432_v26, %v4444_v34  ;;  %v4852_v12 = vpack.c.bf16 %v4519_v38, %v4531_v27  ;;  %v4853_v6 = vpack.c.bf16 %v4575_v4, %v4587_v46  ;;  %v4854_v8 = vpack.c.bf16 %v4627_v10, %v4639_v23 }
 0x2b8   : > { %v2865_v61 = vpop.f32.mrb[18].mxu0 }
 0x2b9   : > { %v4736_v9 = vmul.f32 %v2865_v61, %v2865_v61  ;;  %2560 = vst.msk [vmem:[%s4110_s22 + $0x98] sm:$0xff] %vm378_vm0, %v2865_v61  ;;  %v2297_v39 = vpop.f32.mrb[19].mxu0 }
 0x2ba   : > { %v2904_v35 = vpack.c.bf16 %v2865_v61, %v2297_v39  ;;  %v4740_v44 = vmul.f32 %v2297_v39, %v2297_v39  ;;  %2559 = vst.msk [vmem:[%s4110_s22 + $0x90] sm:$0xff] %vm378_vm0, %v2297_v39 }
 0x2bc   : > { %2905 = vmatprep.subr.bf16.mxu1 %v2904_v35  ;;  %v2936_v60 = vpack.c.bf16 %v4736_v9, %v4740_v44 }
 0x2bd   : > { %2907 = vmatpush3.bf16.msra.mxu1 %v2906_v24 }
 0x2d8   : > { %v2868_v42 = vpop.f32.mrb[20].mxu0 }
 0x2d9   : > { %v4749_v33 = vmul.f32 %v2868_v42, %v2868_v42  ;;  %2562 = vst.msk [vmem:[%s4110_s22 + $0xa8] sm:$0xff] %vm378_vm0, %v2868_v42  ;;  %v2307_v18 = vpop.f32.mrb[21].mxu0 }
 0x2da   : > { %v2908_v57 = vpack.c.bf16 %v2868_v42, %v2307_v18  ;;  %v4753_v31 = vmul.f32 %v2307_v18, %v2307_v18  ;;  %2561 = vst.msk [vmem:[%s4110_s22 + $0xa0] sm:$0xff] %vm378_vm0, %v2307_v18 }
 0x2dc   : > { %2909 = vmatprep.subr.bf16.mxu1 %v2908_v57  ;;  %v2940_v13 = vpack.c.bf16 %v4749_v33, %v4753_v31  ;;  %v4847_v33 = vpack.c.bf16 %v4666_v1, %v4676_v51  ;;  %v4850_v1 = vpack.c.bf16 %v4336_v20, %v4348_v36  ;;  %v4855_v20 = vpack.c.bf16 %v4671_v40, %v4683_v11 }
 0x2dd   : > { %2911 = vmatpush3.bf16.msra.mxu1 %v2910_v58 }
 0x2f7   : > { %v2871_v25 = vpop.f32.mrb[22].mxu0 }
 0x2f8   : > { %v2461_v24 = vmul.f32 %v2871_v25, %v2871_v25  ;;  %2564 = vst.msk [vmem:[%s4110_s22 + $0xb8] sm:$0xff] %vm378_vm0, %v2871_v25  ;;  %v2317_v45 = vpop.f32.mrb[23].mxu0 }
 0x2f9   : > { %v2912_v22 = vpack.c.bf16 %v2871_v25, %v2317_v45  ;;  %v2460_v21 = vmul.f32 %v2317_v45, %v2317_v45  ;;  %2563 = vst.msk [vmem:[%s4110_s22 + $0xb0] sm:$0xff] %vm378_vm0, %v2317_v45 }
 0x2fb   : > { %2913 = vmatprep.subr.bf16.mxu1 %v2912_v22  ;;  %v2944_v7 = vpack.c.bf16 %v2461_v24, %v2460_v21 }
 0x2fc   : > { %2915 = vmatpush3.bf16.msra.mxu1 %v2914_v17 }
 0x317   : > { %v2874_v43 = vpop.f32.mrb[24].mxu0 }
 0x318   : > { %v2463_v56 = vmul.f32 %v2874_v43, %v2874_v43  ;;  %2566 = vst.msk [vmem:[%s4110_s22 + $0xc8] sm:$0xff] %vm378_vm0, %v2874_v43  ;;  %v2327_v58 = vpop.f32.mrb[25].mxu0 }
 0x319   : > { %v2916_v48 = vpack.c.bf16 %v2874_v43, %v2327_v58  ;;  %v2462_v14 = vmul.f32 %v2327_v58, %v2327_v58  ;;  %2565 = vst.msk [vmem:[%s4110_s22 + $0xc0] sm:$0xff] %vm378_vm0, %v2327_v58 }
 0x31b   : > { %2917 = vmatprep.subr.bf16.mxu1 %v2916_v48  ;;  %v2948_v0 = vpack.c.bf16 %v2463_v56, %v2462_v14 }
 0x31c   : > { %2919 = vmatpush3.bf16.msra.mxu1 %v2918_v29 }
 0x337   : > { %v2877_v54 = vpop.f32.mrb[26].mxu0 }
 0x338   : > { %v2465_v63 = vmul.f32 %v2877_v54, %v2877_v54  ;;  %2568 = vst.msk [vmem:[%s4110_s22 + $0xd8] sm:$0xff] %vm378_vm0, %v2877_v54  ;;  %v2337_v59 = vpop.f32.mrb[27].mxu0 }
 0x339   : > { %v2920_v17 = vpack.c.bf16 %v2877_v54, %v2337_v59  ;;  %v2464_v15 = vmul.f32 %v2337_v59, %v2337_v59  ;;  %2567 = vst.msk [vmem:[%s4110_s22 + $0xd0] sm:$0xff] %vm378_vm0, %v2337_v59 }
 0x33b   : > { %2921 = vmatprep.subr.bf16.mxu1 %v2920_v17  ;;  %v2952_v62 = vpack.c.bf16 %v2465_v63, %v2464_v15 }
 0x33c   : > { %2923 = vmatpush3.bf16.msra.mxu1 %v4845_v37 }
 0x357   : > { %v2880_v52 = vpop.f32.mrb[28].mxu0 }
 0x358   : > { %v2467_v41 = vmul.f32 %v2880_v52, %v2880_v52  ;;  %2570 = vst.msk [vmem:[%s4110_s22 + $0xe8] sm:$0xff] %vm378_vm0, %v2880_v52  ;;  %v2347_v19 = vpop.f32.mrb[29].mxu0 }
 0x359   : > { %v2924_v29 = vpack.c.bf16 %v2880_v52, %v2347_v19  ;;  %v2466_v53 = vmul.f32 %v2347_v19, %v2347_v19  ;;  %2569 = vst.msk [vmem:[%s4110_s22 + $0xe0] sm:$0xff] %vm378_vm0, %v2347_v19 }
 0x35b   : > { %2925 = vmatprep.subr.bf16.mxu1 %v2924_v29  ;;  %v2956_v16 = vpack.c.bf16 %v2467_v41, %v2466_v53 }
 0x35c   : > { %2927 = vmatpush3.bf16.msra.mxu1 %v4846_v47 }
 0x364   : > { %v2883_v61 = vpop.f32.mrb[30].mxu0 }
 0x365   : > { %v2469_v39 = vmul.f32 %v2883_v61, %v2883_v61  ;;  %2572 = vst.msk [vmem:[%s4110_s22 + $0xf8] sm:$0xff] %vm378_vm0, %v2883_v61  ;;  %v2357_v32 = vpop.f32.mrb[31].mxu0 }
 0x366   : > { %v2928_v5 = vpack.c.bf16 %v2883_v61, %v2357_v32  ;;  %v2468_v35 = vmul.f32 %v2357_v32, %v2357_v32  ;;  %2571 = vst.msk [vmem:[%s4110_s22 + $0xf0] sm:$0xff] %vm378_vm0, %v2357_v32 }
 0x368   : > { %v2960_v42 = vpack.c.bf16 %v2469_v39, %v2468_v35  ;;  %2929 = vmatprep.subr.bf16.mxu1 %v2928_v5 }
 0x369   : > { %2931 = vmatpush3.bf16.msra.mxu1 %v4847_v33 }
 0x36a   : > { %2933 = vmatprep.subr.bf16.mxu1 %v2932_v55 }
 0x36c   : > { %2431 = vmatmul.mubr.f32.vlgmr.msra.gmra.mrb[0].mxu1 %v3003_v30 }
 0x36d   : > { %2935 = vmatpush3.bf16.msra.mxu1 %v4848_v2  ;;  %2534 = vmatprep.mubr.f32.mxu1 %v3003_v30 }
 0x36e   : > { %2937 = vmatprep.subr.bf16.mxu1 %v2936_v60 }
 0x371   : > { %2939 = vmatpush3.bf16.msra.mxu1 %v4849_v50 }
 0x372   : > { %2941 = vmatprep.subr.bf16.mxu1 %v2940_v13 }
 0x375   : > { %2943 = vmatpush3.bf16.msra.mxu1 %v4850_v1 }
 0x376   : > { %2945 = vmatprep.subr.bf16.mxu1 %v2944_v7 }
 0x379   : > { %2947 = vmatpush3.bf16.msra.mxu1 %v4851_v49 }
 0x37a   : > { %2949 = vmatprep.subr.bf16.mxu1 %v2948_v0 }
 0x37d   : > { %2951 = vmatpush3.bf16.msra.mxu1 %v4852_v12 }
 0x37e   : > { %2953 = vmatprep.subr.bf16.mxu1 %v2952_v62 }
 0x381   : > { %2955 = vmatpush3.bf16.msra.mxu1 %v4853_v6 }
 0x382   : > { %2957 = vmatprep.subr.bf16.mxu1 %v2956_v16 }
 0x385   : > { %2959 = vmatpush3.bf16.msra.mxu1 %v4854_v8 }
 0x386   : > { %2961 = vmatprep.subr.bf16.mxu1 %v2960_v42 }
 0x389   : > { %2963 = vmatpush3.bf16.msra.mxu1 %v4855_v20 }
 0x38c   : > { %2535 = vmatmul.mubr.f32.vlgmr.msra.gmra.mrb[2].mxu1 %v3003_v30 }
 0x43f   : > { %v2780_v36 = vpop.f32.mrb[0].mxu1 }
 0x440   : > { %v2781_v26 = vpop.f32.mrb[1].mxu1 }
 0x441   : > { %v2782_v34 = vadd.f32 %v2781_v26, %v2780_v36 }
 0x443   : > { %2437 = vst.msk [vmem:[%s235_s6] sm:$0x1] %vm2436_vm11, %v2782_v34 }
 0x45f   : > { %v2815_v38 = vpop.f32.mrb[2].mxu1 }
 0x460   : > { %v2816_v27 = vpop.f32.mrb[3].mxu1 }
 0x461   : > { %v2817_v4 = vadd.f32 %v2816_v27, %v2815_v38 }
 0x463   : > { %2540 = vst.msk [vmem:[%s235_s6 + $0x1] sm:$0x1] %vm2436_vm11, %v2817_v4 }
 0x464 PF: > { %s16_s18 = sadd.s32 1, %s2992_s18  }
 0x465   : > { %p13_p4 = scmp.ge.s32.totalorder %s16_s18, 4  }
 0x467   :  { %15 = sbr.rel (!%p13_p4) target bundleno = 1 (0x1), region = 81 }

</bundles_post_ra>
